<compile_context>
chip_gen: v7x
topology: tpu7x:2x2x1
jax: 0.10.0
libtpu: 0.0.40
codegen_flags: <defaults>
</compile_context>

<pallas_src>
import math

import jax
import jax.numpy as jnp
from jax.experimental import pallas as pl
from jax.experimental.pallas import tpu as pltpu

_BN_EPS = 1e-5
_VMEM_LIMIT = 48 * 1024 * 1024   # explicit scoped-VMEM limit, safe on v5e/v6e/v7x


# ---------------------------------------------------------------------------
# Pallas kernels
# ---------------------------------------------------------------------------

def _conv3x3_bn_relu_kernel(x_ref, w_ref, g_ref, b_ref, o_ref, acc_ref):
    """Fused 3x3 conv (one long-K matmul) + BatchNorm (batch stats) + ReLU.

    x_ref:   (M, k_blk)      bf16 im2col taps; K = 9*Cin tiled on grid axis 1
    w_ref:   (k_blk, co_blk) bf16 weights (tap-major, cin-minor rows)
    g_ref:   (1, co_blk)     f32 BN gamma
    b_ref:   (1, co_blk)     f32 BN beta
    o_ref:   (M, co_blk)     f32 output
    acc_ref: (M, co_blk)     f32 scratch, persists across the K reduction axis
    """
    k = pl.program_id(1)

    @pl.when(k == 0)
    def _init():
        acc_ref[...] = jnp.zeros_like(acc_ref)

    acc_ref[...] += jnp.dot(x_ref[...], w_ref[...],
                            preferred_element_type=jnp.float32)

    @pl.when(k == pl.num_programs(1) - 1)
    def _finalize():
        acc = acc_ref[...]
        inv_m = 1.0 / acc.shape[0]
        mean = jnp.sum(acc, axis=0, keepdims=True) * inv_m
        xc = acc - mean
        var = jnp.sum(xc * xc, axis=0, keepdims=True) * inv_m
        y = xc * jax.lax.rsqrt(var + _BN_EPS) * g_ref[...] + b_ref[...]
        o_ref[...] = jnp.maximum(y, 0.0).astype(o_ref.dtype)


def _matmul_bias_sigmoid_kernel(x_ref, w_ref, b_ref, o_ref):
    """1x1 conv (plain matmul) + bias + sigmoid."""
    y = jnp.dot(x_ref[...], w_ref[...],
                preferred_element_type=jnp.float32) + b_ref[...]
    o_ref[...] = jax.nn.sigmoid(y).astype(o_ref.dtype)


# ---------------------------------------------------------------------------
# Wrappers (glue: padding, tap layout, reshapes)
# ---------------------------------------------------------------------------

def _pick_block(c, preferred=256):
    """Largest block <= preferred that divides c (avoids silently dropping
    channels for non-multiple channel counts)."""
    if c <= preferred:
        return c
    for blk in (preferred, 128, 64, 32, 16, 8):
        if c % blk == 0:
            return blk
    return c


def conv3x3_bn_relu(x, w, gamma, beta):
    """x: (N,H,W,Cin) f32; w: (3,3,Cin,Cout); gamma/beta: (Cout,)
    -> ReLU(BN(conv3x3(x, w))) of shape (N,H,W,Cout), f32.
    (Conv bias omitted: cancelled exactly by the BN mean subtraction.)"""
    N, H, W, Cin = x.shape
    Cout = w.shape[-1]
    M = N * H * W

    # Glue: zero-pad once, lay the 9 shifted halo views out as a single
    # (M, 9*Cin) bf16 operand (tap-major, cin-minor) so the kernel issues one
    # long-K contraction per grid step.
    xp = jnp.pad(x.astype(jnp.bfloat16), ((0, 0), (1, 1), (1, 1), (0, 0)))
    taps = jnp.concatenate(
        [xp[:, dy:dy + H, dx:dx + W, :].reshape(M, Cin)
         for dy in range(3) for dx in range(3)],
        axis=-1)                                          # (M, 9*Cin) bf16
    w2 = w.reshape(9 * Cin, Cout).astype(jnp.bfloat16)    # matches tap layout
    g2 = gamma.reshape(1, Cout).astype(jnp.float32)
    b2 = beta.reshape(1, Cout).astype(jnp.float32)

    ci_blk = _pick_block(Cin)
    co_blk = _pick_block(Cout)
    k_blk = 9 * ci_blk
    assert Cin % ci_blk == 0 and Cout % co_blk == 0

    # TODO(synk): for large M (big batch / resolution) the fused-BN design
    # needs a two-pass, M-tiled variant (partial stats then normalize); at the
    # spec'd shapes M = N*H*W <= 512 so one M block + full-M accumulator fits
    # VMEM comfortably and gives BN for free in the conv finalize.

    out = pl.pallas_call(
        _conv3x3_bn_relu_kernel,
        out_shape=jax.ShapeDtypeStruct((M, Cout), jnp.float32),
        grid_spec=pltpu.PrefetchScalarGridSpec(
            num_scalar_prefetch=0,
            grid=(Cout // co_blk, Cin // ci_blk),          # (parallel, reduce)
            in_specs=[
                pl.BlockSpec((M, k_blk), lambda co, k: (0, k)),
                pl.BlockSpec((k_blk, co_blk), lambda co, k: (k, co)),
                pl.BlockSpec((1, co_blk), lambda co, k: (0, co)),
                pl.BlockSpec((1, co_blk), lambda co, k: (0, co)),
            ],
            out_specs=pl.BlockSpec((M, co_blk), lambda co, k: (0, co)),
            scratch_shapes=[pltpu.VMEM((M, co_blk), jnp.float32)],
        ),
        compiler_params=pltpu.CompilerParams(
            dimension_semantics=("parallel", "arbitrary"),
            vmem_limit_bytes=_VMEM_LIMIT),
    )(taps, w2, g2, b2)
    return out.reshape(N, H, W, Cout)


def conv1x1_sigmoid(x, w, b):
    """x: (N,H,W,Ci); w: (Ci,Co); b: (Co,)  ->  sigmoid(x @ w + b)."""
    N, H, W, Ci = x.shape
    Co = w.shape[-1]
    M = N * H * W
    # Note: Co=1 output lane width -> masked stores; acceptable, op is tiny.
    out = pl.pallas_call(
        _matmul_bias_sigmoid_kernel,
        out_shape=jax.ShapeDtypeStruct((M, Co), jnp.float32),
        grid=(1,),
        in_specs=[
            pl.BlockSpec((M, Ci), lambda i: (0, 0)),
            pl.BlockSpec((Ci, Co), lambda i: (0, 0)),
            pl.BlockSpec((1, Co), lambda i: (0, 0)),
        ],
        out_specs=pl.BlockSpec((M, Co), lambda i: (0, 0)),
        compiler_params=pltpu.CompilerParams(vmem_limit_bytes=_VMEM_LIMIT),
    )(x.reshape(M, Ci), w, b.reshape(1, Co))
    return out.reshape(N, H, W, Co)


# Glue ops (pure data movement, kept in plain JAX).
def maxpool2x2(x):
    N, H, W, C = x.shape
    return jnp.max(x.reshape(N, H // 2, 2, W // 2, 2, C), axis=(2, 4))


def upsample2x_nearest(x):
    x = jnp.repeat(x, 2, axis=1)
    return jnp.repeat(x, 2, axis=2)


# ---------------------------------------------------------------------------
# Model: parameters + forward
# ---------------------------------------------------------------------------

def init_block_params(key, cin, cout):
    ks = jax.random.split(key, 2)
    # Conv biases are intentionally omitted: they are mathematically no-ops
    # because every conv here is immediately followed by training-mode BN.
    return {
        "w1": jax.random.normal(ks[0], (3, 3, cin, cout), jnp.float32)
              / math.sqrt(9 * cin),
        "g1": jnp.ones((cout,), jnp.float32),      # BatchNorm weight init (1)
        "beta1": jnp.zeros((cout,), jnp.float32),  # BatchNorm bias init (0)
        "w2": jax.random.normal(ks[1], (3, 3, cout, cout), jnp.float32)
              / math.sqrt(9 * cout),
        "g2": jnp.ones((cout,), jnp.float32),
        "beta2": jnp.zeros((cout,), jnp.float32),
    }


def init_unet_params(key, input_channel=2, n_chans_out=1, nblocs=3,
                     n_chans_base=256):
    keys = jax.random.split(key, 2 * nblocs + 3)
    down, up = [], []
    cin = input_channel
    for i in range(nblocs):
        cout = (2 ** i) * n_chans_base
        down.append(init_block_params(keys[i], cin, cout))
        cin = cout
        up.append(init_block_params(keys[nblocs + i], 2 * cin, cin // 2))
    bottom = init_block_params(keys[2 * nblocs], cin, cin)
    wlast = (jax.random.normal(keys[2 * nblocs + 1],
                               (n_chans_base // 2, n_chans_out), jnp.float32)
             / math.sqrt(n_chans_base // 2))
    blast = 0.01 * jax.random.normal(keys[2 * nblocs + 2],
                                     (n_chans_out,), jnp.float32)
    return {"down": down, "up": up, "bottom": bottom,
            "wlast": wlast, "blast": blast}


def basic_block(x, p):
    # conv -> BN -> ReLU, twice; each triple is ONE fused Pallas call.
    x = conv3x3_bn_relu(x, p["w1"], p["g1"], p["beta1"])
    x = conv3x3_bn_relu(x, p["w2"], p["g2"], p["beta2"])
    return x


def unet_forward(x_nchw, params):
    # TODO(synk): BatchNorm implemented with training-mode batch statistics
    # only (matches a freshly-constructed PyTorch module in train mode); no
    # running-stat buffers, so eval-mode parity is not provided.
    x = jnp.transpose(x_nchw, (0, 2, 3, 1))            # NCHW -> NHWC
    skips = []
    for p in params["down"]:
        x = basic_block(x, p)
        skips.append(x)
        x = maxpool2x2(x)
    x = basic_block(x, params["bottom"])
    for p, skip in zip(params["up"][::-1], skips[::-1]):
        x = upsample2x_nearest(x)
        x = jnp.concatenate([x, skip], axis=-1)        # cat along channels
        x = basic_block(x, p)
    y = conv1x1_sigmoid(x, params["wlast"], params["blast"])
    return jnp.transpose(y, (0, 3, 1, 2))              # NHWC -> NCHW


# ---------------------------------------------------------------------------

if __name__ == "__main__":
    key = jax.random.PRNGKey(0)
    pkey, xkey = jax.random.split(key)

    params = init_unet_params(pkey, input_channel=2, n_chans_out=1, nblocs=3)
    # Small input consistent with Unet(input_channel=2): NCHW (2, 2, 16, 16).
    x = jax.random.normal(xkey, (2, 2, 16, 16), jnp.float32)

    y = unet_forward(x, params)
    y = jax.block_until_ready(y)

    assert y.shape == (2, 1, 16, 16), y.shape
    assert bool(jnp.all(jnp.isfinite(y)))
    print("KERNEL_OK")
</pallas_src>

<mosaic_0001>
module attributes {stable_mosaic.version = 11 : i64} {
  func.func @_conv3x3_bn_relu_kernel(%arg0: i32, %arg1: i32, %arg2: memref<512x18xbf16, #tpu.memory_space<vmem>>, %arg3: memref<18x256xbf16, #tpu.memory_space<vmem>>, %arg4: memref<1x256xf32, #tpu.memory_space<vmem>>, %arg5: memref<1x256xf32, #tpu.memory_space<vmem>>, %arg6: memref<512x256xf32, #tpu.memory_space<vmem>>, %arg7: memref<512x256xf32, #tpu.memory_space<vmem>>) attributes {dimension_semantics = [#tpu.dimension_semantics<parallel>, #tpu.dimension_semantics<arbitrary>], iteration_bounds = array<i64: 1, 1>, scalar_prefetch = 0 : i64, scratch_operands = 1 : i64, tpu.core_type = #tpu.core_type<tc>, window_params = [{transform_indices = @transform_0, window_bounds = array<i64: 512, 18>}, {transform_indices = @transform_1, window_bounds = array<i64: 18, 256>}, {transform_indices = @transform_2, window_bounds = array<i64: 1, 256>}, {transform_indices = @transform_3, window_bounds = array<i64: 1, 256>}, {transform_indices = @transform_4, window_bounds = array<i64: 512, 256>}]} {
    %c0_i32 = arith.constant 0 : i32
    %0 = arith.cmpi eq, %arg1, %c0_i32 : i32
    %1 = arith.extui %0 : i1 to i32
    %c0_i32_0 = arith.constant 0 : i32
    %2 = arith.cmpi ne, %1, %c0_i32_0 : i32
    scf.if %2 {
      %cst_10 = arith.constant 0.000000e+00 : f32
      %12 = vector.broadcast %cst_10 : f32 to vector<512x256xf32>
      %c0_11 = arith.constant 0 : index
      %c0_12 = arith.constant 0 : index
      %13 = vector.load %arg7[%c0_11, %c0_12] : memref<512x256xf32, #tpu.memory_space<vmem>>, vector<512x256xf32>
      tpu.vector_store %arg7[%c0_11, %c0_12], %12 {strides = array<i32>} : memref<512x256xf32, #tpu.memory_space<vmem>>, vector<512x256xf32>,
    } else {
    }
    %c0 = arith.constant 0 : index
    %c0_1 = arith.constant 0 : index
    %3 = vector.load %arg7[%c0, %c0_1] : memref<512x256xf32, #tpu.memory_space<vmem>>, vector<512x256xf32>
    %c0_2 = arith.constant 0 : index
    %c0_3 = arith.constant 0 : index
    %4 = vector.load %arg2[%c0_2, %c0_3] : memref<512x18xbf16, #tpu.memory_space<vmem>>, vector<512x18xbf16>
    %c0_4 = arith.constant 0 : index
    %c0_5 = arith.constant 0 : index
    %5 = vector.load %arg3[%c0_4, %c0_5] : memref<18x256xbf16, #tpu.memory_space<vmem>>, vector<18x256xbf16>
    %cst = arith.constant dense<0.000000e+00> : vector<512x256xf32>
    %6 = tpu.matmul %4, %5, %cst {dimension_numbers = #tpu.dot_dimension_numbers<[1], [0], [0], [1], [0, 0, 1, 1], [], []>} : vector<512x18xbf16>, vector<18x256xbf16>, vector<512x256xf32> -> vector<512x256xf32>
    %7 = arith.addf %3, %6 : vector<512x256xf32>
    %c0_6 = arith.constant 0 : index
    %c0_7 = arith.constant 0 : index
    %8 = vector.load %arg7[%c0_6, %c0_7] : memref<512x256xf32, #tpu.memory_space<vmem>>, vector<512x256xf32>
    tpu.vector_store %arg7[%c0_6, %c0_7], %7 {strides = array<i32>} : memref<512x256xf32, #tpu.memory_space<vmem>>, vector<512x256xf32>,
    %c0_i32_8 = arith.constant 0 : i32
    %9 = arith.cmpi eq, %arg1, %c0_i32_8 : i32
    %10 = arith.extui %9 : i1 to i32
    %c0_i32_9 = arith.constant 0 : i32
    %11 = arith.cmpi ne, %10, %c0_i32_9 : i32
    scf.if %11 {
      %c0_10 = arith.constant 0 : index
      %c0_11 = arith.constant 0 : index
      %12 = vector.load %arg7[%c0_10, %c0_11] : memref<512x256xf32, #tpu.memory_space<vmem>>, vector<512x256xf32>
      %cst_12 = arith.constant dense<0.000000e+00> : vector<256xf32>
      %13 = vector.multi_reduction <add>, %12, %cst_12 [0] : vector<512x256xf32> to vector<256xf32>
      %14 = vector.shape_cast %13 : vector<256xf32> to vector<1x256xf32>
      %cst_13 = arith.constant 0.001953125 : f32
      %15 = vector.broadcast %cst_13 : f32 to vector<1x256xf32>
      %16 = arith.mulf %14, %15 : vector<1x256xf32>
      %17 = vector.broadcast %16 : vector<1x256xf32> to vector<512x256xf32>
      %18 = arith.subf %12, %17 : vector<512x256xf32>
      %19 = arith.mulf %18, %18 : vector<512x256xf32>
      %cst_14 = arith.constant dense<0.000000e+00> : vector<256xf32>
      %20 = vector.multi_reduction <add>, %19, %cst_14 [0] : vector<512x256xf32> to vector<256xf32>
      %21 = vector.shape_cast %20 : vector<256xf32> to vector<1x256xf32>
      %cst_15 = arith.constant 0.001953125 : f32
      %22 = vector.broadcast %cst_15 : f32 to vector<1x256xf32>
      %23 = arith.mulf %21, %22 : vector<1x256xf32>
      %cst_16 = arith.constant 9.99999974E-6 : f32
      %24 = vector.broadcast %cst_16 : f32 to vector<1x256xf32>
      %25 = arith.addf %23, %24 : vector<1x256xf32>
      %26 = math.rsqrt %25 : vector<1x256xf32>
      %27 = vector.broadcast %26 : vector<1x256xf32> to vector<512x256xf32>
      %28 = arith.mulf %18, %27 : vector<512x256xf32>
      %c0_17 = arith.constant 0 : index
      %c0_18 = arith.constant 0 : index
      %29 = vector.load %arg4[%c0_17, %c0_18] : memref<1x256xf32, #tpu.memory_space<vmem>>, vector<1x256xf32>
      %30 = vector.broadcast %29 : vector<1x256xf32> to vector<512x256xf32>
      %31 = arith.mulf %28, %30 : vector<512x256xf32>
      %c0_19 = arith.constant 0 : index
      %c0_20 = arith.constant 0 : index
      %32 = vector.load %arg5[%c0_19, %c0_20] : memref<1x256xf32, #tpu.memory_space<vmem>>, vector<1x256xf32>
      %33 = vector.broadcast %32 : vector<1x256xf32> to vector<512x256xf32>
      %34 = arith.addf %31, %33 : vector<512x256xf32>
      %cst_21 = arith.constant 0.000000e+00 : f32
      %35 = vector.broadcast %cst_21 : f32 to vector<512x256xf32>
      %36 = arith.maximumf %34, %35 : vector<512x256xf32>
      %c0_22 = arith.constant 0 : index
      %c0_23 = arith.constant 0 : index
      %37 = vector.load %arg6[%c0_22, %c0_23] : memref<512x256xf32, #tpu.memory_space<vmem>>, vector<512x256xf32>
      tpu.vector_store %arg6[%c0_22, %c0_23], %36 {strides = array<i32>} : memref<512x256xf32, #tpu.memory_space<vmem>>, vector<512x256xf32>,
    } else {
    }
    return
  }
  func.func @transform_0(%arg0: i32, %arg1: i32) -> (i32, i32) {
    %c0_i32 = arith.constant 0 : i32
    %c0_i32_0 = arith.constant 0 : i32
    return %c0_i32, %arg1 : i32, i32
  }
  func.func @transform_1(%arg0: i32, %arg1: i32) -> (i32, i32) {
    %c0_i32 = arith.constant 0 : i32
    return %arg1, %arg0 : i32, i32
  }
  func.func @transform_2(%arg0: i32, %arg1: i32) -> (i32, i32) {
    %c0_i32 = arith.constant 0 : i32
    %c0_i32_0 = arith.constant 0 : i32
    return %c0_i32, %arg0 : i32, i32
  }
  func.func @transform_3(%arg0: i32, %arg1: i32) -> (i32, i32) {
    %c0_i32 = arith.constant 0 : i32
    %c0_i32_0 = arith.constant 0 : i32
    return %c0_i32, %arg0 : i32, i32
  }
  func.func @transform_4(%arg0: i32, %arg1: i32) -> (i32, i32) {
    %c0_i32 = arith.constant 0 : i32
    %c0_i32_0 = arith.constant 0 : i32
    return %c0_i32, %arg0 : i32, i32
  }
}

</mosaic_0001>

<bundles_post_ra>
// kernel: tpu_custom_call.1
= control target key start
LH: loop header
LB: loop body
LE: loop exit
PB: predicated region body
PF: predicated region fallthrough
CT: control target
= control target key end

     0   :  { %vm618_vm0 = vcmask 1040384   ;;  %v2727_v3 = vmov 0   ;;  %vm521_vm1 = vcmask 146432   ;;  %s5784_s0 = inlined_call_operand.vmem [shape: bf16[512,18], index: 0, kind: input, shape index: {}]   ;;  %s5785_s1 = inlined_call_operand.vmem [shape: bf16[18,256], index: 1, kind: input, shape index: {}]   ;;  %s5786_s2 = inlined_call_operand.vmem [shape: f32[1,256], index: 2, kind: input, shape index: {}]   ;;  %s5787_s3 = inlined_call_operand.vmem [shape: f32[1,256], index: 3, kind: input, shape index: {}]   ;;  %s5788_s4 = inlined_call_operand.hbm [shape: f32[512,256], index: 4, kind: output, shape index: {}]  }
   0x1   :  { %v2662_v0 = vld [vmem:[%s5785_s1 + $0x4] ss:$8 sps:$4 sm:$0xff]   ;;  %v2664_v1 = vld [vmem:[%s5785_s1] ss:$8 sps:$4 sm:$0xff]   ;;  %v345_v2 = vld [vmem:[%s5785_s1 + $0x10] sm:$0x11]  ;;  %657 = vmatprep.mubr.bf16.mxu0 %v2727_v3  ;;  %817 = vmatprep.mubr.bf16.mxu1 %v2727_v3 }
   0x2   :  { %625 = vmatprep.subr.bf16.mxu0 %v2662_v0  ;;  %v2620_v4 = vcombine.high %v345_v2, %v345_v2  ;;  %v2619_v5 = vcombine.low %v345_v2, %v345_v2  ;;  %2654 = vmatprep.subr.bf16.mxu1 %v2662_v0  ;;  %v2667_v7 = vld [vmem:[%s5784_s0] sm:$0xff]   ;;  %v2668_v9 = vld [vmem:[%s5784_s0 + $0x8] sm:$0xff]   ;;  %v2669_v11 = vld [vmem:[%s5784_s0 + $0x10] sm:$0xff]  }
   0x3   :  { %626 = vmatpush1.bf16.msra.mxu0 %v2664_v1  ;;  %2656 = vmatpush1.bf16.msra.mxu1 %v2664_v1  ;;  %v2675_v8 = vld [vmem:[%s5784_s0 + $0x80] sm:$0xff]   ;;  %v2677_v10 = vld [vmem:[%s5784_s0 + $0x88] sm:$0xff]   ;;  %v2679_v12 = vld [vmem:[%s5784_s0 + $0x90] sm:$0xff]  }
   0x4   :  { %2621 = vmatprep.subr.msk.bf16.mxu0 %vm618_vm0, %v2620_v4  ;;  %v620_v6 = vsel %vm618_vm0, %v2619_v5, 0  ;;  %2655 = vmatprep.subr.msk.bf16.mxu1 %vm618_vm0, %v2620_v4  ;;  %v2670_v13 = vld [vmem:[%s5784_s0 + $0x18] sm:$0xff]  }
   0x5   :  { %v2681_v14 = vld [vmem:[%s5784_s0 + $0x98] sm:$0xff]  }
   0x7   :  { %628 = vmatpush1.bf16.msra.mxu0 %v620_v6  ;;  %2657 = vmatpush1.bf16.msra.mxu1 %v620_v6 }
   0xa   :  { %2622 = vmatmul.mubr.msk.bf16.vlgmr.msra.gmra.mrb[0].mxu0 %vm521_vm1, %v2667_v7  ;;  %2638 = vmatmul.mubr.msk.bf16.vlgmr.msra.gmra.mrb[0].mxu1 %vm521_vm1, %v2675_v8 }
   0xb   :  { %667 = vmatprep.mubr.bf16.mxu0 %v2727_v3  ;;  %827 = vmatprep.mubr.bf16.mxu1 %v2727_v3 }
  0x12   :  { %2623 = vmatmul.mubr.msk.bf16.gmra.mrb[4].mxu0 %vm521_vm1, %v2668_v9  ;;  %2639 = vmatmul.mubr.msk.bf16.gmra.mrb[4].mxu1 %vm521_vm1, %v2677_v10 }
  0x13   :  { %677 = vmatprep.mubr.bf16.mxu0 %v2727_v3  ;;  %837 = vmatprep.mubr.bf16.mxu1 %v2727_v3 }
  0x1a   :  { %2624 = vmatmul.mubr.msk.bf16.gmra.mrb[8].mxu0 %vm521_vm1, %v2669_v11  ;;  %2640 = vmatmul.mubr.msk.bf16.gmra.mrb[8].mxu1 %vm521_vm1, %v2679_v12 }
  0x1b   :  { %687 = vmatprep.mubr.bf16.mxu0 %v2727_v3  ;;  %847 = vmatprep.mubr.bf16.mxu1 %v2727_v3 }
  0x1c   :  { %9 = vsyncpa [#allocation4], 0  ;;  %v2671_v15 = vld [vmem:[%s5784_s0 + $0x20] sm:$0xff]   ;;  %v2672_v17 = vld [vmem:[%s5784_s0 + $0x28] sm:$0xff]  }
  0x1d   :  { %v2683_v16 = vld [vmem:[%s5784_s0 + $0xa0] sm:$0xff]   ;;  %v2685_v18 = vld [vmem:[%s5784_s0 + $0xa8] sm:$0xff]   ;;  %v2673_v19 = vld [vmem:[%s5784_s0 + $0x30] sm:$0xff]  }
  0x1e   :  { %v2687_v20 = vld [vmem:[%s5784_s0 + $0xb0] sm:$0xff]   ;;  %v2674_v21 = vld [vmem:[%s5784_s0 + $0x38] sm:$0xff]   ;;  %v2676_v23 = vld [vmem:[%s5784_s0 + $0x40] sm:$0xff]  }
  0x1f   :  { %v2689_v22 = vld [vmem:[%s5784_s0 + $0xb8] sm:$0xff]   ;;  %v2691_v24 = vld [vmem:[%s5784_s0 + $0xc0] sm:$0xff]   ;;  %v2678_v25 = vld [vmem:[%s5784_s0 + $0x48] sm:$0xff]  }
  0x20   :  { %v2692_v26 = vld [vmem:[%s5784_s0 + $0xc8] sm:$0xff]   ;;  %v2680_v27 = vld [vmem:[%s5784_s0 + $0x50] sm:$0xff]   ;;  %v2682_v29 = vld [vmem:[%s5784_s0 + $0x58] sm:$0xff]  }
  0x21   :  { %v2693_v28 = vld [vmem:[%s5784_s0 + $0xd0] sm:$0xff]   ;;  %v2694_v30 = vld [vmem:[%s5784_s0 + $0xd8] sm:$0xff]   ;;  %v2684_v31 = vld [vmem:[%s5784_s0 + $0x60] sm:$0xff]  }
  0x22   :  { %2625 = vmatmul.mubr.msk.bf16.gmra.mrb[12].mxu0 %vm521_vm1, %v2670_v13  ;;  %2641 = vmatmul.mubr.msk.bf16.gmra.mrb[12].mxu1 %vm521_vm1, %v2681_v14  ;;  %v2695_v32 = vld [vmem:[%s5784_s0 + $0xe0] sm:$0xff]   ;;  %v2686_v33 = vld [vmem:[%s5784_s0 + $0x68] sm:$0xff]   ;;  %v2688_v35 = vld [vmem:[%s5784_s0 + $0x70] sm:$0xff]  }
  0x23   :  { %697 = vmatprep.mubr.bf16.mxu0 %v2727_v3  ;;  %857 = vmatprep.mubr.bf16.mxu1 %v2727_v3  ;;  %v2696_v34 = vld [vmem:[%s5784_s0 + $0xe8] sm:$0xff]   ;;  %v2697_v36 = vld [vmem:[%s5784_s0 + $0xf0] sm:$0xff]   ;;  %v2690_v37 = vld [vmem:[%s5784_s0 + $0x78] sm:$0xff]  }
  0x24   :  { %v2698_v38 = vld [vmem:[%s5784_s0 + $0xf8] sm:$0xff]  }
  0x2a   :  { %2626 = vmatmul.mubr.msk.bf16.gmra.mrb[16].mxu0 %vm521_vm1, %v2671_v15  ;;  %2642 = vmatmul.mubr.msk.bf16.gmra.mrb[16].mxu1 %vm521_vm1, %v2683_v16 }
  0x2b   :  { %707 = vmatprep.mubr.bf16.mxu0 %v2727_v3  ;;  %867 = vmatprep.mubr.bf16.mxu1 %v2727_v3 }
  0x32   :  { %2627 = vmatmul.mubr.msk.bf16.gmra.mrb[20].mxu0 %vm521_vm1, %v2672_v17  ;;  %2643 = vmatmul.mubr.msk.bf16.gmra.mrb[20].mxu1 %vm521_vm1, %v2685_v18 }
  0x33   :  { %717 = vmatprep.mubr.bf16.mxu0 %v2727_v3  ;;  %877 = vmatprep.mubr.bf16.mxu1 %v2727_v3 }
  0x3a   :  { %2628 = vmatmul.mubr.msk.bf16.gmra.mrb[24].mxu0 %vm521_vm1, %v2673_v19  ;;  %2644 = vmatmul.mubr.msk.bf16.gmra.mrb[24].mxu1 %vm521_vm1, %v2687_v20 }
  0x3b   :  { %727 = vmatprep.mubr.bf16.mxu0 %v2727_v3  ;;  %887 = vmatprep.mubr.bf16.mxu1 %v2727_v3 }
  0x42   :  { %2629 = vmatmul.mubr.msk.bf16.gmra.mrb[28].mxu0 %vm521_vm1, %v2674_v21  ;;  %2645 = vmatmul.mubr.msk.bf16.gmra.mrb[28].mxu1 %vm521_vm1, %v2689_v22 }
  0x43   :  { %737 = vmatprep.mubr.bf16.mxu0 %v2727_v3  ;;  %897 = vmatprep.mubr.bf16.mxu1 %v2727_v3 }
  0x4a   :  { %2630 = vmatmul.mubr.msk.bf16.gmra.mrb[32].mxu0 %vm521_vm1, %v2676_v23  ;;  %2646 = vmatmul.mubr.msk.bf16.gmra.mrb[32].mxu1 %vm521_vm1, %v2691_v24 }
  0x4b   :  { %747 = vmatprep.mubr.bf16.mxu0 %v2727_v3  ;;  %907 = vmatprep.mubr.bf16.mxu1 %v2727_v3 }
  0x52   :  { %2631 = vmatmul.mubr.msk.bf16.gmra.mrb[36].mxu0 %vm521_vm1, %v2678_v25  ;;  %2647 = vmatmul.mubr.msk.bf16.gmra.mrb[36].mxu1 %vm521_vm1, %v2692_v26 }
  0x53   :  { %757 = vmatprep.mubr.bf16.mxu0 %v2727_v3  ;;  %917 = vmatprep.mubr.bf16.mxu1 %v2727_v3 }
  0x5a   :  { %2632 = vmatmul.mubr.msk.bf16.gmra.mrb[40].mxu0 %vm521_vm1, %v2680_v27  ;;  %2648 = vmatmul.mubr.msk.bf16.gmra.mrb[40].mxu1 %vm521_vm1, %v2693_v28 }
  0x5b   :  { %767 = vmatprep.mubr.bf16.mxu0 %v2727_v3  ;;  %927 = vmatprep.mubr.bf16.mxu1 %v2727_v3 }
  0x62   :  { %2633 = vmatmul.mubr.msk.bf16.gmra.mrb[44].mxu0 %vm521_vm1, %v2682_v29  ;;  %2649 = vmatmul.mubr.msk.bf16.gmra.mrb[44].mxu1 %vm521_vm1, %v2694_v30 }
  0x63   :  { %777 = vmatprep.mubr.bf16.mxu0 %v2727_v3  ;;  %937 = vmatprep.mubr.bf16.mxu1 %v2727_v3 }
  0x6a   :  { %2634 = vmatmul.mubr.msk.bf16.gmra.mrb[48].mxu0 %vm521_vm1, %v2684_v31  ;;  %2650 = vmatmul.mubr.msk.bf16.gmra.mrb[48].mxu1 %vm521_vm1, %v2695_v32 }
  0x6b   :  { %787 = vmatprep.mubr.bf16.mxu0 %v2727_v3  ;;  %947 = vmatprep.mubr.bf16.mxu1 %v2727_v3 }
  0x72   :  { %2635 = vmatmul.mubr.msk.bf16.gmra.mrb[52].mxu0 %vm521_vm1, %v2686_v33  ;;  %2651 = vmatmul.mubr.msk.bf16.gmra.mrb[52].mxu1 %vm521_vm1, %v2696_v34 }
  0x73   :  { %797 = vmatprep.mubr.bf16.mxu0 %v2727_v3  ;;  %957 = vmatprep.mubr.bf16.mxu1 %v2727_v3 }
  0x7a   :  { %2636 = vmatmul.mubr.msk.bf16.gmra.mrb[56].mxu0 %vm521_vm1, %v2688_v35  ;;  %2652 = vmatmul.mubr.msk.bf16.gmra.mrb[56].mxu1 %vm521_vm1, %v2697_v36 }
  0x7b   :  { %807 = vmatprep.mubr.bf16.mxu0 %v2727_v3  ;;  %967 = vmatprep.mubr.bf16.mxu1 %v2727_v3 }
  0x82   :  { %2637 = vmatmul.mubr.msk.bf16.gmra.mrb[60].mxu0 %vm521_vm1, %v2690_v37  ;;  %2653 = vmatmul.mubr.msk.bf16.gmra.mrb[60].mxu1 %vm521_vm1, %v2698_v38 }
  0xdd   :  { %v2925_v39 = vpop.f32.mrb[0].mxu0  ;;  %v2931_v42 = vpop.f32.mrb[0].mxu1 }
  0xde   :  { %6001 = vst [vmem:[#allocation6_spill] sm:$0xff] %v2925_v39  ;;  %v2927_v40 = vpop.f32.mrb[1].mxu0  ;;  %6004 = vst [vmem:[#allocation9_spill] sm:$0xff] %v2931_v42  ;;  %v2937_v45 = vpop.f32.mrb[1].mxu1 }
  0xdf   :  { %6002 = vst [vmem:[#allocation7_spill] sm:$0xff] %v2927_v40  ;;  %v2929_v41 = vpop.f32.mrb[2].mxu0  ;;  %v2941_v47 = vpop.f32.mrb[2].mxu1 }
  0xe0   :  { %6003 = vst [vmem:[#allocation8_spill] sm:$0xff] %v2929_v41  ;;  %v1365_v43 = vadd.f32 %v2929_v41, %v2925_v39  ;;  %v2935_v44 = vpop.f32.mrb[3].mxu0  ;;  %v2943_v48 = vpop.f32.mrb[3].mxu1 }
  0xe1   :  { %6005 = vst [vmem:[#allocation10_spill] sm:$0xff] %v2935_v44  ;;  %v1434_v46 = vadd.f32 %v2935_v44, %v2927_v40 }
  0xe5   :  { %v2945_v49 = vpop.f32.mrb[4].mxu0  ;;  %v2953_v54 = vpop.f32.mrb[4].mxu1 }
  0xe6   :  { %6006 = vst [vmem:[#allocation11_spill] sm:$0xff] %v2945_v49  ;;  %v1366_v50 = vadd.f32 %v1365_v43, %v2945_v49  ;;  %v2948_v51 = vpop.f32.mrb[5].mxu0  ;;  %v2958_v57 = vpop.f32.mrb[5].mxu1 }
  0xe7   :  { %6007 = vst [vmem:[#allocation12_spill] sm:$0xff] %v2948_v51  ;;  %v1435_v52 = vadd.f32 %v1434_v46, %v2948_v51  ;;  %v2951_v53 = vpop.f32.mrb[6].mxu0  ;;  %v2961_v59 = vpop.f32.mrb[6].mxu1 }
  0xe8   :  { %6008 = vst [vmem:[#allocation13_spill] sm:$0xff] %v2951_v53  ;;  %v1367_v55 = vadd.f32 %v1366_v50, %v2951_v53  ;;  %v2956_v56 = vpop.f32.mrb[7].mxu0  ;;  %v2963_v60 = vpop.f32.mrb[7].mxu1 }
  0xe9   :  { %6009 = vst [vmem:[#allocation14_spill] sm:$0xff] %v2956_v56  ;;  %v1436_v58 = vadd.f32 %v1435_v52, %v2956_v56 }
  0xed   :  { %v2965_v61 = vpop.f32.mrb[8].mxu0  ;;  %v2973_v2 = vpop.f32.mrb[8].mxu1 }
  0xee   :  { %6010 = vst [vmem:[#allocation15_spill] sm:$0xff] %v2965_v61  ;;  %v1368_v62 = vadd.f32 %v1367_v55, %v2965_v61  ;;  %v2968_v63 = vpop.f32.mrb[9].mxu0  ;;  %v2978_v5 = vpop.f32.mrb[9].mxu1 }
  0xef   :  { %6011 = vst [vmem:[#allocation16_spill] sm:$0xff] %v2968_v63  ;;  %v1437_v0 = vadd.f32 %v1436_v58, %v2968_v63  ;;  %v2971_v1 = vpop.f32.mrb[10].mxu0  ;;  %v2981_v7 = vpop.f32.mrb[10].mxu1 }
  0xf0   :  { %6012 = vst [vmem:[#allocation17_spill] sm:$0xff] %v2971_v1  ;;  %v1369_v3 = vadd.f32 %v1368_v62, %v2971_v1  ;;  %v2976_v4 = vpop.f32.mrb[11].mxu0  ;;  %v2983_v8 = vpop.f32.mrb[11].mxu1 }
  0xf1   :  { %6013 = vst [vmem:[#allocation18_spill] sm:$0xff] %v2976_v4  ;;  %v1438_v6 = vadd.f32 %v1437_v0, %v2976_v4 }
  0xf5   :  { %v2985_v9 = vpop.f32.mrb[12].mxu0  ;;  %v2993_v14 = vpop.f32.mrb[12].mxu1 }
  0xf6   :  { %6014 = vst [vmem:[#allocation19_spill] sm:$0xff] %v2985_v9  ;;  %v1370_v10 = vadd.f32 %v1369_v3, %v2985_v9  ;;  %v2988_v11 = vpop.f32.mrb[13].mxu0  ;;  %v2998_v17 = vpop.f32.mrb[13].mxu1 }
  0xf7   :  { %6015 = vst [vmem:[#allocation20_spill] sm:$0xff] %v2988_v11  ;;  %v1439_v12 = vadd.f32 %v1438_v6, %v2988_v11  ;;  %v2991_v13 = vpop.f32.mrb[14].mxu0  ;;  %v3001_v19 = vpop.f32.mrb[14].mxu1 }
  0xf8   :  { %6016 = vst [vmem:[#allocation21_spill] sm:$0xff] %v2991_v13  ;;  %v1371_v15 = vadd.f32 %v1370_v10, %v2991_v13  ;;  %v2996_v16 = vpop.f32.mrb[15].mxu0  ;;  %v3003_v20 = vpop.f32.mrb[15].mxu1 }
  0xf9   :  { %6017 = vst [vmem:[#allocation22_spill] sm:$0xff] %v2996_v16  ;;  %v1440_v18 = vadd.f32 %v1439_v12, %v2996_v16 }
  0xfd   :  { %v3005_v21 = vpop.f32.mrb[16].mxu0  ;;  %v3013_v26 = vpop.f32.mrb[16].mxu1 }
  0xfe   :  { %6018 = vst [vmem:[#allocation23_spill] sm:$0xff] %v3005_v21  ;;  %v1372_v22 = vadd.f32 %v1371_v15, %v3005_v21  ;;  %v3008_v23 = vpop.f32.mrb[17].mxu0  ;;  %v3018_v29 = vpop.f32.mrb[17].mxu1 }
  0xff   :  { %6019 = vst [vmem:[#allocation24_spill] sm:$0xff] %v3008_v23  ;;  %v1441_v24 = vadd.f32 %v1440_v18, %v3008_v23  ;;  %v3011_v25 = vpop.f32.mrb[18].mxu0  ;;  %v3021_v31 = vpop.f32.mrb[18].mxu1 }
 0x100   :  { %6020 = vst [vmem:[#allocation25_spill] sm:$0xff] %v3011_v25  ;;  %v1373_v27 = vadd.f32 %v1372_v22, %v3011_v25  ;;  %v3016_v28 = vpop.f32.mrb[19].mxu0  ;;  %v3023_v32 = vpop.f32.mrb[19].mxu1 }
 0x101   :  { %6021 = vst [vmem:[#allocation26_spill] sm:$0xff] %v3016_v28  ;;  %v1442_v30 = vadd.f32 %v1441_v24, %v3016_v28  ;;  %6022 = vst [vmem:[#allocation27_spill] sm:$0xff] %v3023_v32 }
 0x105   :  { %v3025_v33 = vpop.f32.mrb[20].mxu0  ;;  %v3033_v38 = vpop.f32.mrb[20].mxu1 }
 0x106   :  { %6023 = vst [vmem:[#allocation28_spill] sm:$0xff] %v3025_v33  ;;  %v1374_v34 = vadd.f32 %v1373_v27, %v3025_v33  ;;  %v3028_v35 = vpop.f32.mrb[21].mxu0  ;;  %v3038_v50 = vpop.f32.mrb[21].mxu1 }
 0x107   :  { %6024 = vst [vmem:[#allocation29_spill] sm:$0xff] %v3028_v35  ;;  %v1443_v36 = vadd.f32 %v1442_v30, %v3028_v35  ;;  %v3031_v37 = vpop.f32.mrb[22].mxu0  ;;  %6027 = vst [vmem:[#allocation32_spill] sm:$0xff] %v3038_v50  ;;  %v3041_v55 = vpop.f32.mrb[22].mxu1 }
 0x108   :  { %6025 = vst [vmem:[#allocation30_spill] sm:$0xff] %v3031_v37  ;;  %v1375_v43 = vadd.f32 %v1374_v34, %v3031_v37  ;;  %v3036_v46 = vpop.f32.mrb[23].mxu0  ;;  %v3043_v58 = vpop.f32.mrb[23].mxu1 }
 0x109   :  { %6026 = vst [vmem:[#allocation31_spill] sm:$0xff] %v3036_v46  ;;  %v1444_v52 = vadd.f32 %v1443_v36, %v3036_v46  ;;  %6028 = vst [vmem:[#allocation33_spill] sm:$0xff] %v3043_v58 }
 0x10d   :  { %v3045_v62 = vpop.f32.mrb[24].mxu0  ;;  %v3053_v12 = vpop.f32.mrb[24].mxu1 }
 0x10e   :  { %6029 = vst [vmem:[#allocation34_spill] sm:$0xff] %v3045_v62  ;;  %v1376_v0 = vadd.f32 %v1375_v43, %v3045_v62  ;;  %v3048_v3 = vpop.f32.mrb[25].mxu0  ;;  %v3058_v22 = vpop.f32.mrb[25].mxu1 }
 0x10f   :  { %6030 = vst [vmem:[#allocation35_spill] sm:$0xff] %v3048_v3  ;;  %v1445_v6 = vadd.f32 %v1444_v52, %v3048_v3  ;;  %v3051_v10 = vpop.f32.mrb[26].mxu0  ;;  %6033 = vst [vmem:[#allocation38_spill] sm:$0xff] %v3058_v22  ;;  %v3061_v27 = vpop.f32.mrb[26].mxu1 }
 0x110   :  { %6031 = vst [vmem:[#allocation36_spill] sm:$0xff] %v3051_v10  ;;  %v1377_v15 = vadd.f32 %v1376_v0, %v3051_v10  ;;  %v3056_v18 = vpop.f32.mrb[27].mxu0  ;;  %v3063_v30 = vpop.f32.mrb[27].mxu1 }
 0x111   :  { %6032 = vst [vmem:[#allocation37_spill] sm:$0xff] %v3056_v18  ;;  %v1446_v24 = vadd.f32 %v1445_v6, %v3056_v18  ;;  %6034 = vst [vmem:[#allocation39_spill] sm:$0xff] %v3063_v30 }
 0x115   :  { %v3065_v34 = vpop.f32.mrb[28].mxu0  ;;  %v3073_v0 = vpop.f32.mrb[28].mxu1 }
 0x116   :  { %6035 = vst [vmem:[#allocation40_spill] sm:$0xff] %v3065_v34  ;;  %v1378_v36 = vadd.f32 %v1377_v15, %v3065_v34  ;;  %v3068_v43 = vpop.f32.mrb[29].mxu0  ;;  %v3078_v6 = vpop.f32.mrb[29].mxu1 }
 0x117   :  { %6036 = vst [vmem:[#allocation41_spill] sm:$0xff] %v3068_v43  ;;  %v1447_v52 = vadd.f32 %v1446_v24, %v3068_v43  ;;  %v3071_v3 = vpop.f32.mrb[30].mxu0  ;;  %6039 = vst [vmem:[#allocation44_spill] sm:$0xff] %v3078_v6  ;;  %v3081_v28 = vpop.f32.mrb[30].mxu1 }
 0x118   :  { %6037 = vst [vmem:[#allocation42_spill] sm:$0xff] %v3071_v3  ;;  %v1379_v46 = vadd.f32 %v1378_v36, %v3071_v3  ;;  %v3076_v35 = vpop.f32.mrb[31].mxu0  ;;  %v3083_v23 = vpop.f32.mrb[31].mxu1 }
 0x119   :  { %6038 = vst [vmem:[#allocation43_spill] sm:$0xff] %v3076_v35  ;;  %v1448_v18 = vadd.f32 %v1447_v52, %v3076_v35  ;;  %6040 = vst [vmem:[#allocation45_spill] sm:$0xff] %v3083_v23 }
 0x11d   :  { %v3085_v15 = vpop.f32.mrb[32].mxu0  ;;  %v3093_v36 = vpop.f32.mrb[32].mxu1 }
 0x11e   :  { %6041 = vst [vmem:[#allocation46_spill] sm:$0xff] %v3085_v15  ;;  %v1380_v24 = vadd.f32 %v1379_v46, %v3085_v15  ;;  %v3088_v43 = vpop.f32.mrb[33].mxu0  ;;  %v3098_v52 = vpop.f32.mrb[33].mxu1 }
 0x11f   :  { %6042 = vst [vmem:[#allocation47_spill] sm:$0xff] %v3088_v43  ;;  %v1449_v16 = vadd.f32 %v1448_v18, %v3088_v43  ;;  %v3091_v11 = vpop.f32.mrb[34].mxu0  ;;  %6045 = vst [vmem:[#allocation50_spill] sm:$0xff] %v3098_v52  ;;  %v3101_v56 = vpop.f32.mrb[34].mxu1 }
 0x120   :  { %6043 = vst [vmem:[#allocation48_spill] sm:$0xff] %v3091_v11  ;;  %v1381_v4 = vadd.f32 %v1380_v24, %v3091_v11  ;;  %v3096_v63 = vpop.f32.mrb[35].mxu0  ;;  %v3103_v51 = vpop.f32.mrb[35].mxu1 }
 0x121   :  { %6044 = vst [vmem:[#allocation49_spill] sm:$0xff] %v3096_v63  ;;  %v1450_v35 = vadd.f32 %v1449_v16, %v3096_v63  ;;  %6046 = vst [vmem:[#allocation51_spill] sm:$0xff] %v3103_v51 }
 0x125   :  { %v3105_v46 = vpop.f32.mrb[36].mxu0  ;;  %v3113_v24 = vpop.f32.mrb[36].mxu1 }
 0x126   :  { %6047 = vst [vmem:[#allocation52_spill] sm:$0xff] %v3105_v46  ;;  %v1382_v18 = vadd.f32 %v1381_v4, %v3105_v46  ;;  %v3108_v43 = vpop.f32.mrb[37].mxu0  ;;  %v3118_v16 = vpop.f32.mrb[37].mxu1 }
 0x127   :  { %6048 = vst [vmem:[#allocation53_spill] sm:$0xff] %v3108_v43  ;;  %v1451_v44 = vadd.f32 %v1450_v35, %v3108_v43  ;;  %v3111_v40 = vpop.f32.mrb[38].mxu0  ;;  %6051 = vst [vmem:[#allocation56_spill] sm:$0xff] %v3118_v16  ;;  %v3121_v3 = vpop.f32.mrb[38].mxu1 }
 0x128   :  { %6049 = vst [vmem:[#allocation54_spill] sm:$0xff] %v3111_v40  ;;  %v1383_v11 = vadd.f32 %v1382_v18, %v3111_v40  ;;  %v3116_v15 = vpop.f32.mrb[39].mxu0  ;;  %v3123_v34 = vpop.f32.mrb[39].mxu1 }
 0x129   :  { %6050 = vst [vmem:[#allocation55_spill] sm:$0xff] %v3116_v15  ;;  %v1452_v63 = vadd.f32 %v1451_v44, %v3116_v15  ;;  %6052 = vst [vmem:[#allocation57_spill] sm:$0xff] %v3123_v34 }
 0x12d   :  { %v3125_v4 = vpop.f32.mrb[40].mxu0  ;;  %v3133_v18 = vpop.f32.mrb[40].mxu1 }
 0x12e   :  { %6053 = vst [vmem:[#allocation58_spill] sm:$0xff] %v3125_v4  ;;  %v1384_v35 = vadd.f32 %v1383_v11, %v3125_v4  ;;  %v3128_v43 = vpop.f32.mrb[41].mxu0  ;;  %v3138_v44 = vpop.f32.mrb[41].mxu1 }
 0x12f   :  { %6054 = vst [vmem:[#allocation59_spill] sm:$0xff] %v3128_v43  ;;  %v1453_v46 = vadd.f32 %v1452_v63, %v3128_v43  ;;  %v3131_v10 = vpop.f32.mrb[42].mxu0  ;;  %6057 = vst [vmem:[#allocation62_spill] sm:$0xff] %v3138_v44  ;;  %v3141_v37 = vpop.f32.mrb[42].mxu1 }
 0x130   :  { %6055 = vst [vmem:[#allocation60_spill] sm:$0xff] %v3131_v10  ;;  %v1385_v40 = vadd.f32 %v1384_v35, %v3131_v10  ;;  %v3136_v62 = vpop.f32.mrb[43].mxu0  ;;  %v3143_v33 = vpop.f32.mrb[43].mxu1 }
 0x131   :  { %6056 = vst [vmem:[#allocation61_spill] sm:$0xff] %v3136_v62  ;;  %v1454_v15 = vadd.f32 %v1453_v46, %v3136_v62  ;;  %6058 = vst [vmem:[#allocation63_spill] sm:$0xff] %v3143_v33 }
 0x135   :  { %v3145_v11 = vpop.f32.mrb[44].mxu0  ;;  %v3153_v35 = vpop.f32.mrb[44].mxu1 }
 0x136   :  { %6059 = vst [vmem:[#allocation64_spill] sm:$0xff] %v3145_v11  ;;  %v1386_v63 = vadd.f32 %v1385_v40, %v3145_v11  ;;  %v3148_v43 = vpop.f32.mrb[45].mxu0  ;;  %v3158_v46 = vpop.f32.mrb[45].mxu1 }
 0x137   :  { %6060 = vst [vmem:[#allocation65_spill] sm:$0xff] %v3148_v43  ;;  %v1455_v4 = vadd.f32 %v1454_v15, %v3148_v43  ;;  %v3151_v25 = vpop.f32.mrb[46].mxu0  ;;  %6063 = vst [vmem:[#allocation68_spill] sm:$0xff] %v3158_v46  ;;  %v3161_v13 = vpop.f32.mrb[46].mxu1 }
 0x138   :  { %6061 = vst [vmem:[#allocation66_spill] sm:$0xff] %v3151_v25  ;;  %v1387_v10 = vadd.f32 %v1386_v63, %v3151_v25  ;;  %v3156_v21 = vpop.f32.mrb[47].mxu0  ;;  %v3163_v9 = vpop.f32.mrb[47].mxu1 }
 0x139   :  { %6062 = vst [vmem:[#allocation67_spill] sm:$0xff] %v3156_v21  ;;  %v1456_v62 = vadd.f32 %v1455_v4, %v3156_v21  ;;  %6064 = vst [vmem:[#allocation69_spill] sm:$0xff] %v3163_v9 }
 0x13d   :  { %v3165_v40 = vpop.f32.mrb[48].mxu0  ;;  %v3173_v63 = vpop.f32.mrb[48].mxu1 }
 0x13e   :  { %6065 = vst [vmem:[#allocation70_spill] sm:$0xff] %v3165_v40  ;;  %v1388_v15 = vadd.f32 %v1387_v10, %v3165_v40  ;;  %v3168_v43 = vpop.f32.mrb[49].mxu0  ;;  %v3178_v4 = vpop.f32.mrb[49].mxu1 }
 0x13f   :  { %6066 = vst [vmem:[#allocation71_spill] sm:$0xff] %v3168_v43  ;;  %v1457_v11 = vadd.f32 %v1456_v62, %v3168_v43  ;;  %v3171_v1 = vpop.f32.mrb[50].mxu0  ;;  %6069 = vst [vmem:[#allocation74_spill] sm:$0xff] %v3178_v4  ;;  %v3181_v53 = vpop.f32.mrb[50].mxu1 }
 0x140   :  { %6067 = vst [vmem:[#allocation72_spill] sm:$0xff] %v3171_v1  ;;  %v1389_v25 = vadd.f32 %v1388_v15, %v3171_v1  ;;  %v3176_v61 = vpop.f32.mrb[51].mxu0  ;;  %6070 = vst [vmem:[#allocation75_spill] sm:$0xff] %v3181_v53  ;;  %v3183_v49 = vpop.f32.mrb[51].mxu1 }
 0x141   :  { %6068 = vst [vmem:[#allocation73_spill] sm:$0xff] %v3176_v61  ;;  %v1458_v21 = vadd.f32 %v1457_v11, %v3176_v61  ;;  %6071 = vst [vmem:[#allocation76_spill] sm:$0xff] %v3183_v49 }
 0x145   :  { %v3185_v10 = vpop.f32.mrb[52].mxu0  ;;  %v3193_v15 = vpop.f32.mrb[52].mxu1 }
 0x146   :  { %6072 = vst [vmem:[#allocation77_spill] sm:$0xff] %v3185_v10  ;;  %v1390_v62 = vadd.f32 %v1389_v25, %v3185_v10  ;;  %v3188_v43 = vpop.f32.mrb[53].mxu0  ;;  %6075 = vst [vmem:[#allocation80_spill] sm:$0xff] %v3193_v15  ;;  %v3198_v11 = vpop.f32.mrb[53].mxu1 }
 0x147   :  { %6073 = vst [vmem:[#allocation78_spill] sm:$0xff] %v3188_v43  ;;  %v1459_v40 = vadd.f32 %v1458_v21, %v3188_v43  ;;  %v3191_v41 = vpop.f32.mrb[54].mxu0  ;;  %6077 = vst [vmem:[#allocation82_spill] sm:$0xff] %v3198_v11  ;;  %v3201_v49 = vpop.f32.mrb[54].mxu1 }
 0x148   :  { %6074 = vst [vmem:[#allocation79_spill] sm:$0xff] %v3191_v41  ;;  %v1391_v1 = vadd.f32 %v1390_v62, %v3191_v41  ;;  %v3196_v39 = vpop.f32.mrb[55].mxu0  ;;  %6078 = vst [vmem:[#allocation83_spill] sm:$0xff] %v3201_v49  ;;  %v3203_v53 = vpop.f32.mrb[55].mxu1 }
 0x149   :  { %6076 = vst [vmem:[#allocation81_spill] sm:$0xff] %v3196_v39  ;;  %v1460_v61 = vadd.f32 %v1459_v40, %v3196_v39  ;;  %6079 = vst [vmem:[#allocation84_spill] sm:$0xff] %v3203_v53 }
 0x14d   :  { %v3205_v25 = vpop.f32.mrb[56].mxu0  ;;  %v3213_v62 = vpop.f32.mrb[56].mxu1 }
 0x14e   :  { %6080 = vst [vmem:[#allocation85_spill] sm:$0xff] %v3205_v25  ;;  %v1392_v21 = vadd.f32 %v1391_v1, %v3205_v25  ;;  %v3208_v43 = vpop.f32.mrb[57].mxu0  ;;  %6083 = vst [vmem:[#allocation88_spill] sm:$0xff] %v3213_v62  ;;  %v3218_v40 = vpop.f32.mrb[57].mxu1 }
 0x14f   :  { %6081 = vst [vmem:[#allocation86_spill] sm:$0xff] %v3208_v43  ;;  %v1461_v10 = vadd.f32 %v1460_v61, %v3208_v43  ;;  %v3211_v15 = vpop.f32.mrb[58].mxu0  ;;  %6085 = vst [vmem:[#allocation90_spill] sm:$0xff] %v3218_v40  ;;  %v3221_v53 = vpop.f32.mrb[58].mxu1 }
 0x150   :  { %6082 = vst [vmem:[#allocation87_spill] sm:$0xff] %v3211_v15  ;;  %v1393_v41 = vadd.f32 %v1392_v21, %v3211_v15  ;;  %v3216_v11 = vpop.f32.mrb[59].mxu0  ;;  %v3223_v49 = vpop.f32.mrb[59].mxu1 }
 0x151   :  { %6084 = vst [vmem:[#allocation89_spill] sm:$0xff] %v3216_v11  ;;  %v1462_v39 = vadd.f32 %v1461_v10, %v3216_v11  ;;  %6086 = vst [vmem:[#allocation91_spill] sm:$0xff] %v3223_v49 }
 0x155   :  { %v3225_v1 = vpop.f32.mrb[60].mxu0  ;;  %v3233_v21 = vpop.f32.mrb[60].mxu1 }
 0x156   :  { %6087 = vst [vmem:[#allocation92_spill] sm:$0xff] %v3225_v1  ;;  %v1394_v61 = vadd.f32 %v1393_v41, %v3225_v1  ;;  %v3228_v43 = vpop.f32.mrb[61].mxu0  ;;  %6090 = vst [vmem:[#allocation95_spill] sm:$0xff] %v3233_v21  ;;  %v3238_v10 = vpop.f32.mrb[61].mxu1 }
 0x157   :  { %6088 = vst [vmem:[#allocation93_spill] sm:$0xff] %v3228_v43  ;;  %v1463_v25 = vadd.f32 %v1462_v39, %v3228_v43  ;;  %v3231_v62 = vpop.f32.mrb[62].mxu0  ;;  %6092 = vst [vmem:[#allocation97_spill] sm:$0xff] %v3238_v10  ;;  %v3241_v49 = vpop.f32.mrb[62].mxu1 }
 0x158   :  { %6089 = vst [vmem:[#allocation94_spill] sm:$0xff] %v3231_v62  ;;  %v1395_v15 = vadd.f32 %v1394_v61, %v3231_v62  ;;  %v3236_v40 = vpop.f32.mrb[63].mxu0  ;;  %v3244_v1 = vpop.f32.mrb[63].mxu1 }
 0x159   :  { %6091 = vst [vmem:[#allocation96_spill] sm:$0xff] %v3236_v40  ;;  %v1464_v11 = vadd.f32 %v1463_v25, %v3236_v40  ;;  %6093 = vst [vmem:[#allocation98_spill] sm:$0xff] %v3244_v1 }
 0x15a   :  { %v1396_v41 = vadd.f32 %v1395_v15, %v2931_v42 }
 0x15b   :  { %v1465_v39 = vadd.f32 %v1464_v11, %v2937_v45 }
 0x15c   :  { %v1397_v43 = vadd.f32 %v1396_v41, %v2941_v47 }
 0x15d   :  { %v1466_v21 = vadd.f32 %v1465_v39, %v2943_v48 }
 0x15e   :  { %v1398_v61 = vadd.f32 %v1397_v43, %v2953_v54 }
 0x15f   :  { %v1467_v62 = vadd.f32 %v1466_v21, %v2958_v57 }
 0x160   :  { %v1399_v10 = vadd.f32 %v1398_v61, %v2961_v59 }
 0x161   :  { %v1468_v25 = vadd.f32 %v1467_v62, %v2963_v60 }
 0x162   :  { %v1400_v40 = vadd.f32 %v1399_v10, %v2973_v2 }
 0x163   :  { %v1469_v15 = vadd.f32 %v1468_v25, %v2978_v5 }
 0x164   :  { %v1401_v42 = vadd.f32 %v1400_v40, %v2981_v7 }
 0x165   :  { %v1470_v11 = vadd.f32 %v1469_v15, %v2983_v8 }
 0x166   :  { %v1402_v41 = vadd.f32 %v1401_v42, %v2993_v14 }
 0x167   :  { %v1471_v39 = vadd.f32 %v1470_v11, %v2998_v17 }
 0x168   :  { %v1403_v43 = vadd.f32 %v1402_v41, %v3001_v19 }
 0x169   :  { %v1472_v21 = vadd.f32 %v1471_v39, %v3003_v20 }
 0x16a   :  { %v1404_v61 = vadd.f32 %v1403_v43, %v3013_v26 }
 0x16b   :  { %v1473_v62 = vadd.f32 %v1472_v21, %v3018_v29 }
 0x16c   :  { %v1405_v10 = vadd.f32 %v1404_v61, %v3021_v31 }
 0x16d   :  { %v1474_v25 = vadd.f32 %v1473_v62, %v3023_v32  ;;  %v6137_v32 = vld [vmem:[#allocation46_spill] sm:$0xff] }
 0x16e   :  { %v1406_v40 = vadd.f32 %v1405_v10, %v3033_v38 }
 0x16f   :  { %v1475_v15 = vadd.f32 %v1474_v25, %v3038_v50  ;;  %v6135_v50 = vld [vmem:[#allocation42_spill] sm:$0xff] }
 0x170   :  { %v1407_v42 = vadd.f32 %v1406_v40, %v3041_v55 }
 0x171   :  { %v1476_v11 = vadd.f32 %v1475_v15, %v3043_v58  ;;  %v6133_v58 = vld [vmem:[#allocation40_spill] sm:$0xff] }
 0x172   :  { %v1408_v41 = vadd.f32 %v1407_v42, %v3053_v12 }
 0x173   :  { %v1477_v39 = vadd.f32 %v1476_v11, %v3058_v22  ;;  %v6131_v22 = vld [vmem:[#allocation36_spill] sm:$0xff] }
 0x174   :  { %v1409_v43 = vadd.f32 %v1408_v41, %v3061_v27 }
 0x175   :  { %v1478_v21 = vadd.f32 %v1477_v39, %v3063_v30 }
 0x176   :  { %v1410_v61 = vadd.f32 %v1409_v43, %v3073_v0 }
 0x177   :  { %v1479_v62 = vadd.f32 %v1478_v21, %v3078_v6  ;;  %v6104_v6 = vld [vmem:[#allocation97_spill] sm:$0xff] }
 0x178   :  { %v1411_v10 = vadd.f32 %v1410_v61, %v3081_v28 }
 0x179   :  { %v1480_v25 = vadd.f32 %v1479_v62, %v3083_v23  ;;  %v6101_v23 = vld [vmem:[#allocation90_spill] sm:$0xff] }
 0x17a   :  { %v1412_v40 = vadd.f32 %v1411_v10, %v3093_v36 }
 0x17b   :  { %v1481_v15 = vadd.f32 %v1480_v25, %v3098_v52  ;;  %v6099_v52 = vld [vmem:[#allocation84_spill] sm:$0xff] }
 0x17c   :  { %v1413_v42 = vadd.f32 %v1412_v40, %v3101_v56 }
 0x17d   :  { %v1482_v11 = vadd.f32 %v1481_v15, %v3103_v51  ;;  %v6097_v51 = vld [vmem:[#allocation82_spill] sm:$0xff] }
 0x17e   :  { %v1414_v41 = vadd.f32 %v1413_v42, %v3113_v24 }
 0x17f   :  { %v1483_v39 = vadd.f32 %v1482_v11, %v3118_v16  ;;  %v6095_v16 = vld [vmem:[#allocation76_spill] sm:$0xff] }
 0x180   :  { %v1415_v43 = vadd.f32 %v1414_v41, %v3121_v3 }
 0x181   :  { %v1484_v21 = vadd.f32 %v1483_v39, %v3123_v34  ;;  %v6094_v34 = vld [vmem:[#allocation75_spill] sm:$0xff] }
 0x182   :  { %v1416_v61 = vadd.f32 %v1415_v43, %v3133_v18 }
 0x183   :  { %v1485_v62 = vadd.f32 %v1484_v21, %v3138_v44  ;;  %v6096_v44 = vld [vmem:[#allocation80_spill] sm:$0xff] }
 0x184   :  { %v1417_v10 = vadd.f32 %v1416_v61, %v3141_v37 }
 0x185   :  { %v1486_v25 = vadd.f32 %v1485_v62, %v3143_v33  ;;  %v6098_v33 = vld [vmem:[#allocation83_spill] sm:$0xff] }
 0x186   :  { %v1418_v40 = vadd.f32 %v1417_v10, %v3153_v35 }
 0x187   :  { %v1487_v15 = vadd.f32 %v1486_v25, %v3158_v46  ;;  %v6100_v46 = vld [vmem:[#allocation88_spill] sm:$0xff] }
 0x188   :  { %v1419_v42 = vadd.f32 %v1418_v40, %v3161_v13 }
 0x189   :  { %v1488_v11 = vadd.f32 %v1487_v15, %v3163_v9  ;;  %v6102_v9 = vld [vmem:[#allocation91_spill] sm:$0xff] }
 0x18a   :  { %v1420_v41 = vadd.f32 %v1419_v42, %v3173_v63 }
 0x18b   :  { %v1489_v39 = vadd.f32 %v1488_v11, %v3178_v4  ;;  %v6103_v4 = vld [vmem:[#allocation95_spill] sm:$0xff] }
 0x18c   :  { %v1421_v43 = vadd.f32 %v1420_v41, %v6094_v34 }
 0x18d   :  { %v1490_v21 = vadd.f32 %v1489_v39, %v6095_v16 }
 0x18e   :  { %v1422_v61 = vadd.f32 %v1421_v43, %v6096_v44 }
 0x18f   :  { %v1491_v62 = vadd.f32 %v1490_v21, %v6097_v51 }
 0x190   :  { %v1423_v10 = vadd.f32 %v1422_v61, %v6098_v33 }
 0x191   :  { %v1492_v25 = vadd.f32 %v1491_v62, %v6099_v52 }
 0x192   :  { %v1424_v40 = vadd.f32 %v1423_v10, %v6100_v46 }
 0x193   :  { %v1493_v15 = vadd.f32 %v1492_v25, %v6101_v23  ;;  %v6129_v23 = vld [vmem:[#allocation34_spill] sm:$0xff] }
 0x194   :  { %v1425_v42 = vadd.f32 %v1424_v40, %v3221_v53 }
 0x195   :  { %v1494_v11 = vadd.f32 %v1493_v15, %v6102_v9  ;;  %v6121_v15 = vld [vmem:[#allocation23_spill] sm:$0xff]  ;;  %v6127_v9 = vld [vmem:[#allocation30_spill] sm:$0xff] }
 0x196   :  { %v1426_v41 = vadd.f32 %v1425_v42, %v6103_v4  ;;  %v6105_v42 = vld [vmem:[#allocation6_spill] sm:$0xff] }
 0x197   :  { %v1495_v39 = vadd.f32 %v1494_v11, %v6104_v6  ;;  %v6125_v6 = vld [vmem:[#allocation28_spill] sm:$0xff] }
 0x198   :  { %v1427_v43 = vadd.f32 %v1426_v41, %v3241_v49  ;;  %v6107_v41 = vld [vmem:[#allocation8_spill] sm:$0xff] }
 0x199   :  { %v1496_v21 = vadd.f32 %v1495_v39, %v3244_v1  ;;  %v6123_v1 = vld [vmem:[#allocation25_spill] sm:$0xff] }
 0x19a   :  { %v1428_v51 = vrot.slane %v1427_v43, 4 }
 0x19b   :  { %v1497_v62 = vrot.slane %v1496_v21, 4 }
 0x19c   :  { %v1429_v61 = vadd.f32 %v1428_v51, %v1427_v43  ;;  %v6109_v51 = vld [vmem:[#allocation11_spill] sm:$0xff] }
 0x19d   :  { %v3309_v30 = vadd.f32 %v1497_v62, %v1496_v21  ;;  %v6115_v62 = vld [vmem:[#allocation17_spill] sm:$0xff] }
 0x19e   :  { %v1430_v16 = vrot.slane %v1429_v61, 2 }
 0x1a0   :  { %v1431_v52 = vadd.f32 %v1430_v16, %v1429_v61  ;;  %v6111_v16 = vld [vmem:[#allocation13_spill] sm:$0xff] }
 0x1a2   :  { %v1432_v10 = vrot.slane %v1431_v52, 1 }
 0x1a4   :  { %v1433_v25 = vadd.f32 %v1432_v10, %v1431_v52  ;;  %v6113_v52 = vld [vmem:[#allocation15_spill] sm:$0xff] }
 0x1a6   :  { %v3311_v40 = vmul.f32 0.001953125, %v1433_v25  ;;  %v6117_v25 = vld [vmem:[#allocation19_spill] sm:$0xff] }
 0x1a8   :  { %v3316_v11 = vsub.f32 %v6105_v42, %v3311_v40  ;;  %v3320_v39 = vsub.f32 %v6107_v41, %v3311_v40  ;;  %v3324_v43 = vsub.f32 %v6109_v51, %v3311_v40  ;;  %v3328_v21 = vsub.f32 %v6111_v16, %v3311_v40  ;;  %v6119_v41 = vld [vmem:[#allocation21_spill] sm:$0xff] }
 0x1a9   :  { %v3332_v61 = vsub.f32 %v6113_v52, %v3311_v40  ;;  %v3336_v10 = vsub.f32 %v6115_v62, %v3311_v40  ;;  %v3340_v42 = vsub.f32 %v6117_v25, %v3311_v40  ;;  %v3344_v51 = vsub.f32 %v6119_v41, %v3311_v40 }
 0x1aa   :  { %6106 = vst [vmem:[#allocation75_spill] sm:$0xff] %v3316_v11  ;;  %6108 = vst [vmem:[#allocation80_spill] sm:$0xff] %v3320_v39  ;;  %v3348_v16 = vsub.f32 %v6121_v15, %v3311_v40  ;;  %v3352_v52 = vsub.f32 %v6123_v1, %v3311_v40  ;;  %v3356_v62 = vsub.f32 %v6125_v6, %v3311_v40 }
 0x1ab   :  { %6110 = vst [vmem:[#allocation83_spill] sm:$0xff] %v3324_v43  ;;  %6112 = vst [vmem:[#allocation88_spill] sm:$0xff] %v3328_v21  ;;  %v3360_v25 = vsub.f32 %v6127_v9, %v3311_v40  ;;  %v3364_v41 = vsub.f32 %v6129_v23, %v3311_v40  ;;  %v3368_v15 = vsub.f32 %v6131_v22, %v3311_v40 }
 0x1ac   :  { %6114 = vst [vmem:[#allocation95_spill] sm:$0xff] %v3332_v61  ;;  %6116 = vst [vmem:[#allocation6_spill] sm:$0xff] %v3336_v10  ;;  %v3372_v1 = vsub.f32 %v6133_v58, %v3311_v40  ;;  %v3376_v6 = vsub.f32 %v6135_v50, %v3311_v40  ;;  %v3380_v9 = vsub.f32 %v6137_v32, %v3311_v40 }
 0x1ad   :  { %6118 = vst [vmem:[#allocation8_spill] sm:$0xff] %v3340_v42  ;;  %6120 = vst [vmem:[#allocation11_spill] sm:$0xff] %v3344_v51 }
 0x1ae   :  { %6122 = vst [vmem:[#allocation13_spill] sm:$0xff] %v3348_v16  ;;  %6124 = vst [vmem:[#allocation15_spill] sm:$0xff] %v3352_v52 }
 0x1af   :  { %6126 = vst [vmem:[#allocation17_spill] sm:$0xff] %v3356_v62  ;;  %6128 = vst [vmem:[#allocation19_spill] sm:$0xff] %v3360_v25  ;;  %v6139_v25 = vld [vmem:[#allocation48_spill] sm:$0xff] }
 0x1b0   :  { %6130 = vst [vmem:[#allocation21_spill] sm:$0xff] %v3364_v41  ;;  %6132 = vst [vmem:[#allocation23_spill] sm:$0xff] %v3368_v15  ;;  %v3384_v23 = vsub.f32 %v6139_v25, %v3311_v40  ;;  %v6141_v41 = vld [vmem:[#allocation52_spill] sm:$0xff]  ;;  %v6143_v15 = vld [vmem:[#allocation54_spill] sm:$0xff] }
 0x1b1   :  { %6134 = vst [vmem:[#allocation25_spill] sm:$0xff] %v3372_v1  ;;  %6136 = vst [vmem:[#allocation28_spill] sm:$0xff] %v3376_v6  ;;  %v3388_v22 = vsub.f32 %v6141_v41, %v3311_v40  ;;  %v3392_v58 = vsub.f32 %v6143_v15, %v3311_v40  ;;  %v6145_v1 = vld [vmem:[#allocation58_spill] sm:$0xff]  ;;  %v6147_v6 = vld [vmem:[#allocation60_spill] sm:$0xff] }
 0x1b2   :  { %6138 = vst [vmem:[#allocation30_spill] sm:$0xff] %v3380_v9  ;;  %6140 = vst [vmem:[#allocation34_spill] sm:$0xff] %v3384_v23  ;;  %v3396_v50 = vsub.f32 %v6145_v1, %v3311_v40  ;;  %v3400_v32 = vsub.f32 %v6147_v6, %v3311_v40  ;;  %v6149_v9 = vld [vmem:[#allocation64_spill] sm:$0xff]  ;;  %v6151_v23 = vld [vmem:[#allocation66_spill] sm:$0xff] }
 0x1b3   :  { %6142 = vst [vmem:[#allocation36_spill] sm:$0xff] %v3388_v22  ;;  %6144 = vst [vmem:[#allocation40_spill] sm:$0xff] %v3392_v58  ;;  %v3404_v25 = vsub.f32 %v6149_v9, %v3311_v40  ;;  %v3408_v41 = vsub.f32 %v6151_v23, %v3311_v40  ;;  %v6153_v22 = vld [vmem:[#allocation70_spill] sm:$0xff]  ;;  %v6155_v58 = vld [vmem:[#allocation72_spill] sm:$0xff] }
 0x1b4   :  { %6146 = vst [vmem:[#allocation42_spill] sm:$0xff] %v3396_v50  ;;  %6148 = vst [vmem:[#allocation46_spill] sm:$0xff] %v3400_v32  ;;  %v3412_v15 = vsub.f32 %v6153_v22, %v3311_v40  ;;  %v3416_v1 = vsub.f32 %v6155_v58, %v3311_v40  ;;  %v6157_v50 = vld [vmem:[#allocation77_spill] sm:$0xff]  ;;  %v6159_v32 = vld [vmem:[#allocation79_spill] sm:$0xff] }
 0x1b5   :  { %6150 = vst [vmem:[#allocation48_spill] sm:$0xff] %v3404_v25  ;;  %6152 = vst [vmem:[#allocation52_spill] sm:$0xff] %v3408_v41  ;;  %v3420_v6 = vsub.f32 %v6157_v50, %v3311_v40  ;;  %v3424_v9 = vsub.f32 %v6159_v32, %v3311_v40  ;;  %v6160_v25 = vld [vmem:[#allocation85_spill] sm:$0xff]  ;;  %v6161_v41 = vld [vmem:[#allocation87_spill] sm:$0xff] }
 0x1b6   :  { %6154 = vst [vmem:[#allocation54_spill] sm:$0xff] %v3412_v15  ;;  %6156 = vst [vmem:[#allocation58_spill] sm:$0xff] %v3416_v1  ;;  %v3428_v23 = vsub.f32 %v6160_v25, %v3311_v40  ;;  %v3432_v22 = vsub.f32 %v6161_v41, %v3311_v40  ;;  %v6162_v15 = vld [vmem:[#allocation92_spill] sm:$0xff]  ;;  %v6163_v1 = vld [vmem:[#allocation94_spill] sm:$0xff]  ;;  %v3448_v25 = vsub.f32 %v2941_v47, %v3311_v40 }
 0x1b7   :  { %6158 = vst [vmem:[#allocation60_spill] sm:$0xff] %v3420_v6  ;;  %v3436_v58 = vsub.f32 %v6162_v15, %v3311_v40  ;;  %v3440_v50 = vsub.f32 %v6163_v1, %v3311_v40  ;;  %v6164_v6 = vld [vmem:[#allocation9_spill] sm:$0xff]  ;;  %v3452_v41 = vsub.f32 %v2953_v54, %v3311_v40  ;;  %v3456_v15 = vsub.f32 %v2961_v59, %v3311_v40 }
 0x1b8   :  { %v3444_v32 = vsub.f32 %v6164_v6, %v3311_v40  ;;  %v3460_v1 = vsub.f32 %v2973_v2, %v3311_v40  ;;  %v3464_v6 = vsub.f32 %v2981_v7, %v3311_v40  ;;  %v3468_v47 = vsub.f32 %v2993_v14, %v3311_v40 }
 0x1b9   :  { %v3472_v54 = vsub.f32 %v3001_v19, %v3311_v40  ;;  %v3476_v59 = vsub.f32 %v3013_v26, %v3311_v40  ;;  %v3480_v2 = vsub.f32 %v3021_v31, %v3311_v40  ;;  %v3484_v7 = vsub.f32 %v3033_v38, %v3311_v40 }
 0x1ba   :  { %v3488_v14 = vsub.f32 %v3041_v55, %v3311_v40  ;;  %v3492_v19 = vsub.f32 %v3053_v12, %v3311_v40  ;;  %v3496_v26 = vsub.f32 %v3061_v27, %v3311_v40  ;;  %v3500_v31 = vsub.f32 %v3073_v0, %v3311_v40 }
 0x1bb   :  { %6165 = vst [vmem:[#allocation64_spill] sm:$0xff] %v3480_v2  ;;  %6166 = vst [vmem:[#allocation66_spill] sm:$0xff] %v3484_v7  ;;  %v3504_v38 = vsub.f32 %v3081_v28, %v3311_v40  ;;  %v3508_v55 = vsub.f32 %v3093_v36, %v3311_v40  ;;  %v3512_v12 = vsub.f32 %v3101_v56, %v3311_v40 }
 0x1bc   :  { %6167 = vst [vmem:[#allocation70_spill] sm:$0xff] %v3488_v14  ;;  %6168 = vst [vmem:[#allocation72_spill] sm:$0xff] %v3492_v19  ;;  %v3516_v27 = vsub.f32 %v3113_v24, %v3311_v40  ;;  %v3520_v0 = vsub.f32 %v3121_v3, %v3311_v40  ;;  %v3524_v28 = vsub.f32 %v3133_v18, %v3311_v40 }
 0x1bd   :  { %6169 = vst [vmem:[#allocation77_spill] sm:$0xff] %v3496_v26  ;;  %6170 = vst [vmem:[#allocation79_spill] sm:$0xff] %v3500_v31  ;;  %v3528_v36 = vsub.f32 %v3141_v37, %v3311_v40  ;;  %v3532_v56 = vsub.f32 %v3153_v35, %v3311_v40  ;;  %v3536_v24 = vsub.f32 %v3161_v13, %v3311_v40 }
 0x1be   :  { %6171 = vst [vmem:[#allocation85_spill] sm:$0xff] %v3504_v38  ;;  %6172 = vst [vmem:[#allocation87_spill] sm:$0xff] %v3508_v55  ;;  %v3540_v3 = vsub.f32 %v3173_v63, %v3311_v40  ;;  %v3544_v18 = vsub.f32 %v6094_v34, %v3311_v40  ;;  %v3548_v37 = vsub.f32 %v6096_v44, %v3311_v40 }
 0x1bf   :  { %6173 = vst [vmem:[#allocation92_spill] sm:$0xff] %v3512_v12  ;;  %6174 = vst [vmem:[#allocation94_spill] sm:$0xff] %v3516_v27  ;;  %v3552_v35 = vsub.f32 %v6098_v33, %v3311_v40  ;;  %v3556_v13 = vsub.f32 %v6100_v46, %v3311_v40  ;;  %v3560_v63 = vsub.f32 %v3221_v53, %v3311_v40  ;;  %v6188_v33 = vrot.slane %v3309_v30, 2 }
 0x1c0   :  { %6175 = vst [vmem:[#allocation9_spill] sm:$0xff] %v3520_v0  ;;  %6176 = vst [vmem:[#allocation99_spill] sm:$0xff] %v3524_v28  ;;  %v3564_v34 = vsub.f32 %v6103_v4, %v3311_v40  ;;  %v3568_v44 = vsub.f32 %v3241_v49, %v3311_v40  ;;  %v1633_v46 = vmul.f32 %v3316_v11, %v3316_v11 }
 0x1c1   :  { %6177 = vst [vmem:[#allocation100_spill] sm:$0xff] %v3528_v36  ;;  %6178 = vst [vmem:[#allocation101_spill] sm:$0xff] %v3532_v56  ;;  %v1635_v53 = vmul.f32 %v3320_v39, %v3320_v39  ;;  %v1637_v4 = vmul.f32 %v3324_v43, %v3324_v43  ;;  %v1639_v49 = vmul.f32 %v3328_v21, %v3328_v21 }
 0x1c2   :  { %6179 = vst [vmem:[#allocation102_spill] sm:$0xff] %v3536_v24  ;;  %6180 = vst [vmem:[#allocation103_spill] sm:$0xff] %v3540_v3  ;;  %v1641_v40 = vmul.f32 %v3332_v61, %v3332_v61  ;;  %v3599_v21 = vmul.f32 %v3356_v62, %v3356_v62  ;;  %v6197_v62 = vld [vmem:[#allocation16_spill] sm:$0xff] }
 0x1c3   :  { %6181 = vst [vmem:[#allocation104_spill] sm:$0xff] %v3544_v18  ;;  %6182 = vst [vmem:[#allocation105_spill] sm:$0xff] %v3548_v37  ;;  %v1761_v61 = vadd.f32 %v1635_v53, %v1633_v46  ;;  %v6199_v46 = vld [vmem:[#allocation18_spill] sm:$0xff]  ;;  %v6201_v53 = vld [vmem:[#allocation20_spill] sm:$0xff] }
 0x1c4   :  { %6183 = vst [vmem:[#allocation106_spill] sm:$0xff] %v3552_v35  ;;  %6184 = vst [vmem:[#allocation107_spill] sm:$0xff] %v3556_v13  ;;  %v1500_v35 = vadd.f32 %v6188_v33, %v3309_v30  ;;  %v1643_v30 = vmul.f32 %v3336_v10, %v3336_v10  ;;  %v3595_v33 = vmul.f32 %v3352_v52, %v3352_v52  ;;  %v6189_v10 = vld [vmem:[#allocation7_spill] sm:$0xff]  ;;  %v6195_v52 = vld [vmem:[#allocation14_spill] sm:$0xff] }
 0x1c5   :  { %6185 = vst [vmem:[#allocation108_spill] sm:$0xff] %v3560_v63  ;;  %6186 = vst [vmem:[#allocation109_spill] sm:$0xff] %v3564_v34  ;;  %v1762_v34 = vadd.f32 %v1761_v61, %v1637_v4  ;;  %v6213_v61 = vld [vmem:[#allocation35_spill] sm:$0xff] }
 0x1c6   :  { %6187 = vst [vmem:[#allocation110_spill] sm:$0xff] %v3568_v44  ;;  %v1501_v37 = vrot.slane %v1500_v35, 1 }
 0x1c7   :  { %v1763_v28 = vadd.f32 %v1762_v34, %v1639_v49  ;;  %v6227_v34 = vld [vmem:[#allocation55_spill] sm:$0xff] }
 0x1c8   :  { %v1502_v18 = vadd.f32 %v1501_v37, %v1500_v35  ;;  %v1645_v37 = vmul.f32 %v3340_v42, %v3340_v42  ;;  %v1647_v35 = vmul.f32 %v3344_v51, %v3344_v51  ;;  %v6191_v42 = vld [vmem:[#allocation10_spill] sm:$0xff]  ;;  %v6193_v51 = vld [vmem:[#allocation12_spill] sm:$0xff] }
 0x1c9   :  { %v1764_v31 = vadd.f32 %v1763_v28, %v1641_v40  ;;  %v6241_v28 = vld [vmem:[#allocation78_spill] sm:$0xff] }
 0x1ca   :  { %v3577_v63 = vmul.f32 0.001953125, %v1502_v18  ;;  %v1649_v18 = vmul.f32 %v3348_v16, %v3348_v16 }
 0x1cc   :  { %v3603_v43 = vsub.f32 %v6189_v10, %v3577_v63  ;;  %v3607_v39 = vsub.f32 %v6191_v42, %v3577_v63  ;;  %v3611_v16 = vsub.f32 %v6193_v51, %v3577_v63  ;;  %v3615_v11 = vsub.f32 %v6195_v52, %v3577_v63  ;;  %v6203_v51 = vld [vmem:[#allocation22_spill] sm:$0xff]  ;;  %v6205_v52 = vld [vmem:[#allocation24_spill] sm:$0xff] }
 0x1cd   :  { %v3619_v44 = vsub.f32 %v6197_v62, %v3577_v63  ;;  %v3623_v10 = vsub.f32 %v6199_v46, %v3577_v63  ;;  %v3627_v42 = vsub.f32 %v6201_v53, %v3577_v63  ;;  %v3631_v13 = vsub.f32 %v6203_v51, %v3577_v63  ;;  %v6207_v62 = vld [vmem:[#allocation26_spill] sm:$0xff]  ;;  %v6209_v46 = vld [vmem:[#allocation29_spill] sm:$0xff]  ;;  %v6211_v53 = vld [vmem:[#allocation31_spill] sm:$0xff] }
 0x1ce   :  { %6190 = vst [vmem:[#allocation7_spill] sm:$0xff] %v3603_v43  ;;  %6192 = vst [vmem:[#allocation10_spill] sm:$0xff] %v3607_v39  ;;  %v3635_v3 = vsub.f32 %v6205_v52, %v3577_v63  ;;  %v3639_v24 = vsub.f32 %v6207_v62, %v3577_v63  ;;  %v3643_v56 = vsub.f32 %v6209_v46, %v3577_v63  ;;  %v6215_v51 = vld [vmem:[#allocation37_spill] sm:$0xff]  ;;  %v6219_v46 = vld [vmem:[#allocation43_spill] sm:$0xff] }
 0x1cf   :  { %6194 = vst [vmem:[#allocation12_spill] sm:$0xff] %v3611_v16  ;;  %6196 = vst [vmem:[#allocation14_spill] sm:$0xff] %v3615_v11  ;;  %v3647_v36 = vsub.f32 %v6211_v53, %v3577_v63  ;;  %v3651_v4 = vsub.f32 %v6213_v61, %v3577_v63  ;;  %v3655_v52 = vsub.f32 %v6215_v51, %v3577_v63  ;;  %v6217_v62 = vld [vmem:[#allocation41_spill] sm:$0xff]  ;;  %v6221_v53 = vld [vmem:[#allocation47_spill] sm:$0xff] }
 0x1d0   :  { %6198 = vst [vmem:[#allocation16_spill] sm:$0xff] %v3619_v44  ;;  %6200 = vst [vmem:[#allocation18_spill] sm:$0xff] %v3623_v10  ;;  %v3659_v0 = vsub.f32 %v6217_v62, %v3577_v63  ;;  %v3663_v27 = vsub.f32 %v6219_v46, %v3577_v63  ;;  %v3667_v12 = vsub.f32 %v6221_v53, %v3577_v63  ;;  %v6223_v61 = vld [vmem:[#allocation49_spill] sm:$0xff]  ;;  %v6229_v62 = vld [vmem:[#allocation59_spill] sm:$0xff] }
 0x1d1   :  { %6202 = vst [vmem:[#allocation20_spill] sm:$0xff] %v3627_v42  ;;  %6204 = vst [vmem:[#allocation22_spill] sm:$0xff] %v3631_v13  ;;  %v3671_v55 = vsub.f32 %v6223_v61, %v3577_v63  ;;  %v6225_v51 = vld [vmem:[#allocation53_spill] sm:$0xff]  ;;  %v3679_v49 = vsub.f32 %v6227_v34, %v3577_v63  ;;  %v3683_v46 = vsub.f32 %v6229_v62, %v3577_v63  ;;  %v6237_v34 = vld [vmem:[#allocation71_spill] sm:$0xff] }
 0x1d2   :  { %6206 = vst [vmem:[#allocation24_spill] sm:$0xff] %v3635_v3  ;;  %6208 = vst [vmem:[#allocation26_spill] sm:$0xff] %v3639_v24  ;;  %v3675_v38 = vsub.f32 %v6225_v51, %v3577_v63  ;;  %v6231_v53 = vld [vmem:[#allocation61_spill] sm:$0xff]  ;;  %v6235_v51 = vld [vmem:[#allocation67_spill] sm:$0xff]  ;;  %v3699_v7 = vsub.f32 %v6237_v34, %v3577_v63  ;;  %v3707_v40 = vsub.f32 %v6241_v28, %v3577_v63 }
 0x1d3   :  { %6210 = vst [vmem:[#allocation29_spill] sm:$0xff] %v3643_v56  ;;  %6212 = vst [vmem:[#allocation31_spill] sm:$0xff] %v3647_v36  ;;  %v3687_v26 = vsub.f32 %v6231_v53, %v3577_v63  ;;  %v6233_v61 = vld [vmem:[#allocation65_spill] sm:$0xff]  ;;  %v3695_v14 = vsub.f32 %v6235_v51, %v3577_v63  ;;  %v6245_v51 = vld [vmem:[#allocation86_spill] sm:$0xff] }
 0x1d4   :  { %6214 = vst [vmem:[#allocation35_spill] sm:$0xff] %v3651_v4  ;;  %6216 = vst [vmem:[#allocation37_spill] sm:$0xff] %v3655_v52  ;;  %v3691_v19 = vsub.f32 %v6233_v61, %v3577_v63  ;;  %v6239_v62 = vld [vmem:[#allocation73_spill] sm:$0xff]  ;;  %v6251_v28 = vld [vmem:[#allocation96_spill] sm:$0xff] }
 0x1d5   :  { %6218 = vst [vmem:[#allocation41_spill] sm:$0xff] %v3659_v0  ;;  %6220 = vst [vmem:[#allocation43_spill] sm:$0xff] %v3663_v27  ;;  %v3703_v2 = vsub.f32 %v6239_v62, %v3577_v63  ;;  %v6243_v53 = vld [vmem:[#allocation81_spill] sm:$0xff] }
 0x1d6   :  { %6222 = vst [vmem:[#allocation47_spill] sm:$0xff] %v3667_v12  ;;  %6224 = vst [vmem:[#allocation49_spill] sm:$0xff] %v3671_v55  ;;  %v3711_v61 = vsub.f32 %v6243_v53, %v3577_v63  ;;  %v6247_v34 = vld [vmem:[#allocation89_spill] sm:$0xff]  ;;  %v3731_v53 = vsub.f32 %v2937_v45, %v3577_v63  ;;  %v3751_v45 = vsub.f32 %v2983_v8, %v3577_v63  ;;  %v6264_v8 = vld [vmem:[#allocation32_spill] sm:$0xff] }
 0x1d7   :  { %6226 = vst [vmem:[#allocation53_spill] sm:$0xff] %v3675_v38  ;;  %6228 = vst [vmem:[#allocation55_spill] sm:$0xff] %v3679_v49  ;;  %v6249_v62 = vld [vmem:[#allocation93_spill] sm:$0xff] }
 0x1d8   :  { %6230 = vst [vmem:[#allocation59_spill] sm:$0xff] %v3683_v46  ;;  %6232 = vst [vmem:[#allocation61_spill] sm:$0xff] %v3687_v26 }
 0x1d9   :  { %6234 = vst [vmem:[#allocation65_spill] sm:$0xff] %v3691_v19  ;;  %6236 = vst [vmem:[#allocation67_spill] sm:$0xff] %v3695_v14  ;;  %v1765_v19 = vadd.f32 %v1764_v31, %v1643_v30  ;;  %v3715_v14 = vsub.f32 %v6245_v51, %v3577_v63  ;;  %v3735_v31 = vsub.f32 %v2943_v48, %v3577_v63 }
 0x1da   :  { %6238 = vst [vmem:[#allocation71_spill] sm:$0xff] %v3699_v7  ;;  %6240 = vst [vmem:[#allocation73_spill] sm:$0xff] %v3703_v2  ;;  %v3719_v7 = vsub.f32 %v6247_v34, %v3577_v63  ;;  %v3723_v2 = vsub.f32 %v6249_v62, %v3577_v63  ;;  %v3739_v30 = vsub.f32 %v2958_v57, %v3577_v63 }
 0x1db   :  { %6242 = vst [vmem:[#allocation78_spill] sm:$0xff] %v3707_v40  ;;  %6244 = vst [vmem:[#allocation81_spill] sm:$0xff] %v3711_v61  ;;  %v3727_v40 = vsub.f32 %v6251_v28, %v3577_v63  ;;  %v1766_v51 = vadd.f32 %v1765_v19, %v1645_v37  ;;  %v3743_v34 = vsub.f32 %v2963_v60, %v3577_v63  ;;  %v6262_v19 = vld [vmem:[#allocation27_spill] sm:$0xff] }
 0x1dc   :  { %6246 = vst [vmem:[#allocation86_spill] sm:$0xff] %v3715_v14  ;;  %6248 = vst [vmem:[#allocation89_spill] sm:$0xff] %v3719_v7  ;;  %v3747_v62 = vsub.f32 %v2978_v5, %v3577_v63  ;;  %v3755_v48 = vsub.f32 %v2998_v17, %v3577_v63  ;;  %v3759_v57 = vsub.f32 %v3003_v20, %v3577_v63  ;;  %v6266_v17 = vld [vmem:[#allocation33_spill] sm:$0xff]  ;;  %v6268_v20 = vld [vmem:[#allocation38_spill] sm:$0xff] }
 0x1dd   :  { %6250 = vst [vmem:[#allocation93_spill] sm:$0xff] %v3723_v2  ;;  %6252 = vst [vmem:[#allocation96_spill] sm:$0xff] %v3727_v40  ;;  %v3763_v60 = vsub.f32 %v3018_v29, %v3577_v63  ;;  %v3767_v5 = vsub.f32 %v6262_v19, %v3577_v63  ;;  %v1767_v37 = vadd.f32 %v1766_v51, %v1647_v35  ;;  %v6270_v29 = vld [vmem:[#allocation39_spill] sm:$0xff]  ;;  %v6272_v19 = vld [vmem:[#allocation44_spill] sm:$0xff] }
 0x1de   :  { %6253 = vst [vmem:[#allocation111_spill] sm:$0xff] %v3731_v53  ;;  %6254 = vst [vmem:[#allocation112_spill] sm:$0xff] %v3735_v31  ;;  %v3771_v28 = vsub.f32 %v6264_v8, %v3577_v63  ;;  %v6274_v35 = vld [vmem:[#allocation45_spill] sm:$0xff]  ;;  %v6276_v8 = vld [vmem:[#allocation50_spill] sm:$0xff] }
 0x1df   :  { %6255 = vst [vmem:[#allocation113_spill] sm:$0xff] %v3739_v30  ;;  %6256 = vst [vmem:[#allocation114_spill] sm:$0xff] %v3743_v34  ;;  %v3791_v51 = vsub.f32 %v6274_v35, %v3577_v63  ;;  %v6284_v35 = vld [vmem:[#allocation62_spill] sm:$0xff] }
 0x1e0   :  { %6257 = vst [vmem:[#allocation115_spill] sm:$0xff] %v3747_v62  ;;  %6258 = vst [vmem:[#allocation116_spill] sm:$0xff] %v3751_v45  ;;  %v6312_v45 = vld [vmem:[#allocation28_spill] sm:$0xff] }
 0x1e1   :  { %6259 = vst [vmem:[#allocation117_spill] sm:$0xff] %v3755_v48  ;;  %6260 = vst [vmem:[#allocation118_spill] sm:$0xff] %v3759_v57  ;;  %v3775_v48 = vsub.f32 %v6266_v17, %v3577_v63  ;;  %v3779_v57 = vsub.f32 %v6268_v20, %v3577_v63  ;;  %v3795_v17 = vsub.f32 %v6276_v8, %v3577_v63  ;;  %v6278_v20 = vld [vmem:[#allocation51_spill] sm:$0xff] }
 0x1e2   :  { %6261 = vst [vmem:[#allocation119_spill] sm:$0xff] %v3763_v60  ;;  %6263 = vst [vmem:[#allocation27_spill] sm:$0xff] %v3767_v5  ;;  %v3783_v60 = vsub.f32 %v6270_v29, %v3577_v63  ;;  %v3787_v5 = vsub.f32 %v6272_v19, %v3577_v63  ;;  %v6280_v29 = vld [vmem:[#allocation56_spill] sm:$0xff]  ;;  %v6282_v19 = vld [vmem:[#allocation57_spill] sm:$0xff] }
 0x1e3   :  { %6265 = vst [vmem:[#allocation32_spill] sm:$0xff] %v3771_v28  ;;  %6267 = vst [vmem:[#allocation33_spill] sm:$0xff] %v3775_v48  ;;  %v1768_v48 = vadd.f32 %v1767_v37, %v1649_v18  ;;  %v6286_v8 = vld [vmem:[#allocation63_spill] sm:$0xff]  ;;  %v6288_v18 = vld [vmem:[#allocation68_spill] sm:$0xff] }
 0x1e4   :  { %6269 = vst [vmem:[#allocation38_spill] sm:$0xff] %v3779_v57  ;;  %6271 = vst [vmem:[#allocation39_spill] sm:$0xff] %v3783_v60  ;;  %v3799_v57 = vsub.f32 %v6278_v20, %v3577_v63  ;;  %v3803_v60 = vsub.f32 %v6280_v29, %v3577_v63  ;;  %v3819_v37 = vsub.f32 %v6288_v18, %v3577_v63  ;;  %v6290_v20 = vld [vmem:[#allocation69_spill] sm:$0xff]  ;;  %v6298_v18 = vld [vmem:[#allocation84_spill] sm:$0xff] }
 0x1e5   :  { %6273 = vst [vmem:[#allocation44_spill] sm:$0xff] %v3787_v5  ;;  %6275 = vst [vmem:[#allocation45_spill] sm:$0xff] %v3791_v51  ;;  %v3807_v5 = vsub.f32 %v6282_v19, %v3577_v63  ;;  %v3811_v51 = vsub.f32 %v6284_v35, %v3577_v63  ;;  %v3823_v29 = vsub.f32 %v6290_v20, %v3577_v63  ;;  %v6292_v19 = vld [vmem:[#allocation74_spill] sm:$0xff]  ;;  %v6294_v35 = vld [vmem:[#allocation76_spill] sm:$0xff] }
 0x1e6   :  { %6277 = vst [vmem:[#allocation50_spill] sm:$0xff] %v3795_v17  ;;  %6279 = vst [vmem:[#allocation51_spill] sm:$0xff] %v3799_v57  ;;  %v3815_v17 = vsub.f32 %v6286_v8, %v3577_v63  ;;  %v6296_v8 = vld [vmem:[#allocation82_spill] sm:$0xff]  ;;  %v6310_v57 = vld [vmem:[#allocation23_spill] sm:$0xff] }
 0x1e7   :  { %6281 = vst [vmem:[#allocation56_spill] sm:$0xff] %v3803_v60  ;;  %6283 = vst [vmem:[#allocation57_spill] sm:$0xff] %v3807_v5  ;;  %v1769_v60 = vadd.f32 %v1768_v48, %v3595_v33  ;;  %v3828_v5 = vsub.f32 %v6292_v19, %v3577_v63  ;;  %v6300_v20 = vld [vmem:[#allocation90_spill] sm:$0xff]  ;;  %v6302_v33 = vld [vmem:[#allocation91_spill] sm:$0xff] }
 0x1e8   :  { %6285 = vst [vmem:[#allocation62_spill] sm:$0xff] %v3811_v51  ;;  %6287 = vst [vmem:[#allocation63_spill] sm:$0xff] %v3815_v17  ;;  %v3832_v51 = vsub.f32 %v6294_v35, %v3577_v63  ;;  %v3836_v17 = vsub.f32 %v6296_v8, %v3577_v63  ;;  %v3848_v48 = vsub.f32 %v6302_v33, %v3577_v63  ;;  %v6304_v19 = vld [vmem:[#allocation97_spill] sm:$0xff] }
 0x1e9   :  { %6289 = vst [vmem:[#allocation68_spill] sm:$0xff] %v3819_v37  ;;  %6291 = vst [vmem:[#allocation69_spill] sm:$0xff] %v3823_v29  ;;  %v3840_v37 = vsub.f32 %v6298_v18, %v3577_v63  ;;  %v3844_v29 = vsub.f32 %v6300_v20, %v3577_v63  ;;  %v3852_v35 = vsub.f32 %v6304_v19, %v3577_v63  ;;  %v6307_v18 = vld [vmem:[#allocation98_spill] sm:$0xff]  ;;  %v6311_v28 = vld [vmem:[#allocation25_spill] sm:$0xff] }
 0x1ea   :  { %6293 = vst [vmem:[#allocation74_spill] sm:$0xff] %v3828_v5  ;;  %6295 = vst [vmem:[#allocation76_spill] sm:$0xff] %v3832_v51  ;;  %v6306_v51 = vld [vmem:[#allocation19_spill] sm:$0xff]  ;;  %v6309_v5 = vld [vmem:[#allocation21_spill] sm:$0xff]  ;;  %v1659_v33 = vmul.f32 %v6310_v57, %v6310_v57  ;;  %v1661_v19 = vmul.f32 %v6311_v28, %v6311_v28 }
 0x1eb   :  { %6297 = vst [vmem:[#allocation82_spill] sm:$0xff] %v3836_v17  ;;  %6299 = vst [vmem:[#allocation84_spill] sm:$0xff] %v3840_v37  ;;  %v1655_v8 = vmul.f32 %v6306_v51, %v6306_v51  ;;  %v1770_v17 = vadd.f32 %v1769_v60, %v3599_v21  ;;  %v3859_v37 = vsub.f32 %v6307_v18, %v3577_v63  ;;  %v6313_v60 = vld [vmem:[#allocation30_spill] sm:$0xff] }
 0x1ec   :  { %6301 = vst [vmem:[#allocation90_spill] sm:$0xff] %v3844_v29  ;;  %6303 = vst [vmem:[#allocation91_spill] sm:$0xff] %v3848_v48  ;;  %v1657_v20 = vmul.f32 %v6309_v5, %v6309_v5  ;;  %v1663_v51 = vmul.f32 %v6312_v45, %v6312_v45  ;;  %v1665_v63 = vmul.f32 %v6313_v60, %v6313_v60  ;;  %v6317_v60 = vld [vmem:[#allocation42_spill] sm:$0xff] }
 0x1ed   :  { %6305 = vst [vmem:[#allocation97_spill] sm:$0xff] %v3852_v35  ;;  %6308 = vst [vmem:[#allocation98_spill] sm:$0xff] %v3859_v37  ;;  %v1771_v29 = vadd.f32 %v1770_v17, %v1655_v8  ;;  %v6314_v37 = vld [vmem:[#allocation34_spill] sm:$0xff]  ;;  %v6315_v8 = vld [vmem:[#allocation36_spill] sm:$0xff] }
 0x1ee   :  { %v1667_v5 = vmul.f32 %v6314_v37, %v6314_v37  ;;  %v1669_v57 = vmul.f32 %v6315_v8, %v6315_v8  ;;  %v6318_v8 = vld [vmem:[#allocation46_spill] sm:$0xff]  ;;  %v6319_v37 = vld [vmem:[#allocation48_spill] sm:$0xff] }
 0x1ef   :  { %v1772_v48 = vadd.f32 %v1771_v29, %v1657_v20  ;;  %v1634_v20 = vmul.f32 %v3603_v43, %v3603_v43  ;;  %v1640_v43 = vmul.f32 %v3615_v11, %v3615_v11 }
 0x1f1   :  { %v1773_v35 = vadd.f32 %v1772_v48, %v1659_v33  ;;  %v1636_v48 = vmul.f32 %v3607_v39, %v3607_v39  ;;  %v6316_v33 = vld [vmem:[#allocation40_spill] sm:$0xff] }
 0x1f3   :  { %v1774_v21 = vadd.f32 %v1773_v35, %v1661_v19  ;;  %v1671_v35 = vmul.f32 %v6316_v33, %v6316_v33  ;;  %v1677_v33 = vmul.f32 %v6319_v37, %v6319_v37 }
 0x1f5   :  { %v1775_v18 = vadd.f32 %v1774_v21, %v1663_v51  ;;  %v1673_v51 = vmul.f32 %v6317_v60, %v6317_v60 }
 0x1f7   :  { %v1776_v17 = vadd.f32 %v1775_v18, %v1665_v63  ;;  %v1638_v63 = vmul.f32 %v3611_v16, %v3611_v16  ;;  %v1830_v18 = vadd.f32 %v1636_v48, %v1634_v20  ;;  %v1644_v48 = vmul.f32 %v3623_v10, %v3623_v10 }
 0x1f9   :  { %v1777_v29 = vadd.f32 %v1776_v17, %v1667_v5  ;;  %v1675_v5 = vmul.f32 %v6318_v8, %v6318_v8  ;;  %v1831_v39 = vadd.f32 %v1830_v18, %v1638_v63  ;;  %v1646_v18 = vmul.f32 %v3627_v42, %v3627_v42 }
 0x1fb   :  { %v1778_v19 = vadd.f32 %v1777_v29, %v1669_v57  ;;  %v1642_v29 = vmul.f32 %v3619_v44, %v3619_v44 }
 0x1fd   :  { %v1779_v21 = vadd.f32 %v1778_v19, %v1671_v35  ;;  %v1832_v35 = vadd.f32 %v1831_v39, %v1640_v43  ;;  %v6320_v19 = vld [vmem:[#allocation52_spill] sm:$0xff]  ;;  %v1648_v43 = vmul.f32 %v3631_v13, %v3631_v13 }
 0x1fe   :  { %v1679_v16 = vmul.f32 %v6320_v19, %v6320_v19 }
 0x1ff   :  { %v1780_v17 = vadd.f32 %v1779_v21, %v1673_v51  ;;  %v1833_v51 = vadd.f32 %v1832_v35, %v1642_v29  ;;  %v6321_v21 = vld [vmem:[#allocation54_spill] sm:$0xff]  ;;  %v1650_v35 = vmul.f32 %v3635_v3, %v3635_v3 }
 0x200   :  { %v1681_v11 = vmul.f32 %v6321_v21, %v6321_v21 }
 0x201   :  { %v1781_v57 = vadd.f32 %v1780_v17, %v1675_v5  ;;  %v1834_v5 = vadd.f32 %v1833_v51, %v1644_v48  ;;  %v6322_v17 = vld [vmem:[#allocation58_spill] sm:$0xff]  ;;  %v1652_v51 = vmul.f32 %v3639_v24, %v3639_v24 }
 0x202   :  { %v1683_v44 = vmul.f32 %v6322_v17, %v6322_v17 }
 0x203   :  { %v1782_v20 = vadd.f32 %v1781_v57, %v1677_v33  ;;  %v1835_v33 = vadd.f32 %v1834_v5, %v1646_v18  ;;  %v6323_v57 = vld [vmem:[#allocation60_spill] sm:$0xff]  ;;  %v1654_v5 = vmul.f32 %v3643_v56, %v3643_v56 }
 0x204   :  { %v1685_v10 = vmul.f32 %v6323_v57, %v6323_v57 }
 0x205   :  { %v1783_v63 = vadd.f32 %v1782_v20, %v1679_v16  ;;  %v1836_v16 = vadd.f32 %v1835_v33, %v1648_v43  ;;  %v1687_v20 = vmul.f32 %v3424_v9, %v3424_v9  ;;  %v1656_v33 = vmul.f32 %v3647_v36, %v3647_v36 }
 0x207   :  { %v1784_v39 = vadd.f32 %v1783_v63, %v1681_v11  ;;  %v1837_v11 = vadd.f32 %v1836_v16, %v1650_v35  ;;  %v1689_v63 = vmul.f32 %v3428_v23, %v3428_v23  ;;  %v1658_v16 = vmul.f32 %v3651_v4, %v3651_v4 }
 0x209   :  { %v1785_v29 = vadd.f32 %v1784_v39, %v1683_v44  ;;  %v1838_v44 = vadd.f32 %v1837_v11, %v1652_v51  ;;  %v1691_v39 = vmul.f32 %v3432_v22, %v3432_v22  ;;  %v1660_v11 = vmul.f32 %v3655_v52, %v3655_v52 }
 0x20b   :  { %v1786_v48 = vadd.f32 %v1785_v29, %v1685_v10  ;;  %v1839_v10 = vadd.f32 %v1838_v44, %v1654_v5  ;;  %v1693_v29 = vmul.f32 %v3436_v58, %v3436_v58  ;;  %v1662_v44 = vmul.f32 %v3659_v0, %v3659_v0 }
 0x20d   :  { %v1787_v18 = vadd.f32 %v1786_v48, %v1687_v20  ;;  %v1840_v20 = vadd.f32 %v1839_v10, %v1656_v33  ;;  %v1695_v48 = vmul.f32 %v3440_v50, %v3440_v50  ;;  %v1664_v10 = vmul.f32 %v3663_v27, %v3663_v27 }
 0x20f   :  { %v1788_v43 = vadd.f32 %v1787_v18, %v1689_v63  ;;  %v1841_v63 = vadd.f32 %v1840_v20, %v1658_v16  ;;  %v1697_v18 = vmul.f32 %v3444_v32, %v3444_v32  ;;  %v1666_v20 = vmul.f32 %v3667_v12, %v3667_v12 }
 0x211   :  { %v1789_v35 = vadd.f32 %v1788_v43, %v1691_v39  ;;  %v1842_v39 = vadd.f32 %v1841_v63, %v1660_v11  ;;  %v1699_v43 = vmul.f32 %v3448_v25, %v3448_v25  ;;  %v1668_v63 = vmul.f32 %v3671_v55, %v3671_v55 }
 0x213   :  { %v1790_v51 = vadd.f32 %v1789_v35, %v1693_v29  ;;  %v1843_v29 = vadd.f32 %v1842_v39, %v1662_v44  ;;  %v1701_v35 = vmul.f32 %v3452_v41, %v3452_v41  ;;  %v1670_v39 = vmul.f32 %v3675_v38, %v3675_v38 }
 0x215   :  { %v1791_v5 = vadd.f32 %v1790_v51, %v1695_v48  ;;  %v1844_v48 = vadd.f32 %v1843_v29, %v1664_v10  ;;  %v1703_v51 = vmul.f32 %v3456_v15, %v3456_v15  ;;  %v1672_v29 = vmul.f32 %v3679_v49, %v3679_v49 }
 0x217   :  { %v1792_v33 = vadd.f32 %v1791_v5, %v1697_v18  ;;  %v1845_v18 = vadd.f32 %v1844_v48, %v1666_v20  ;;  %v1705_v5 = vmul.f32 %v3460_v1, %v3460_v1  ;;  %v1674_v48 = vmul.f32 %v3683_v46, %v3683_v46 }
 0x219   :  { %v1793_v16 = vadd.f32 %v1792_v33, %v1699_v43  ;;  %v1846_v43 = vadd.f32 %v1845_v18, %v1668_v63  ;;  %v1707_v33 = vmul.f32 %v3464_v6, %v3464_v6  ;;  %v1676_v18 = vmul.f32 %v3687_v26, %v3687_v26 }
 0x21b   :  { %v1794_v11 = vadd.f32 %v1793_v16, %v1701_v35  ;;  %v1847_v35 = vadd.f32 %v1846_v43, %v1670_v39  ;;  %v1709_v16 = vmul.f32 %v3468_v47, %v3468_v47  ;;  %v6324_v43 = vld [vmem:[#allocation65_spill] sm:$0xff] }
 0x21c   :  { %v1678_v49 = vmul.f32 %v6324_v43, %v6324_v43 }
 0x21d   :  { %v1795_v44 = vadd.f32 %v1794_v11, %v1703_v51  ;;  %v1848_v51 = vadd.f32 %v1847_v35, %v1672_v29  ;;  %v1711_v11 = vmul.f32 %v3472_v54, %v3472_v54  ;;  %v6326_v35 = vld [vmem:[#allocation67_spill] sm:$0xff] }
 0x21e   :  { %v1680_v38 = vmul.f32 %v6326_v35, %v6326_v35 }
 0x21f   :  { %v1796_v10 = vadd.f32 %v1795_v44, %v1705_v5  ;;  %v1849_v5 = vadd.f32 %v1848_v51, %v1674_v48  ;;  %v1713_v44 = vmul.f32 %v3476_v59, %v3476_v59  ;;  %v6328_v51 = vld [vmem:[#allocation71_spill] sm:$0xff] }
 0x220   :  { %v1682_v55 = vmul.f32 %v6328_v51, %v6328_v51 }
 0x221   :  { %v1797_v20 = vadd.f32 %v1796_v10, %v1707_v33  ;;  %v1850_v33 = vadd.f32 %v1849_v5, %v1676_v18  ;;  %v6325_v10 = vld [vmem:[#allocation64_spill] sm:$0xff]  ;;  %v6330_v5 = vld [vmem:[#allocation73_spill] sm:$0xff] }
 0x222   :  { %v1715_v46 = vmul.f32 %v6325_v10, %v6325_v10  ;;  %v1684_v12 = vmul.f32 %v6330_v5, %v6330_v5 }
 0x223   :  { %v1798_v63 = vadd.f32 %v1797_v20, %v1709_v16  ;;  %v1851_v16 = vadd.f32 %v1850_v33, %v1678_v49  ;;  %v6327_v20 = vld [vmem:[#allocation66_spill] sm:$0xff] }
 0x224   :  { %v1717_v26 = vmul.f32 %v6327_v20, %v6327_v20  ;;  %v6332_v33 = vld [vmem:[#allocation78_spill] sm:$0xff] }
 0x225   :  { %v1799_v39 = vadd.f32 %v1798_v63, %v1711_v11  ;;  %v1852_v11 = vadd.f32 %v1851_v16, %v1680_v38  ;;  %v6329_v63 = vld [vmem:[#allocation70_spill] sm:$0xff]  ;;  %v1686_v27 = vmul.f32 %v6332_v33, %v6332_v33  ;;  %v1688_v16 = vmul.f32 %v3711_v61, %v3711_v61 }
 0x226   :  { %v1719_v43 = vmul.f32 %v6329_v63, %v6329_v63 }
 0x227   :  { %v1800_v29 = vadd.f32 %v1799_v39, %v1713_v44  ;;  %v1853_v44 = vadd.f32 %v1852_v11, %v1682_v55  ;;  %v6331_v39 = vld [vmem:[#allocation72_spill] sm:$0xff]  ;;  %v1690_v11 = vmul.f32 %v3715_v14, %v3715_v14 }
 0x228   :  { %v1721_v35 = vmul.f32 %v6331_v39, %v6331_v39 }
 0x229   :  { %v1801_v48 = vadd.f32 %v1800_v29, %v1715_v46  ;;  %v1854_v46 = vadd.f32 %v1853_v44, %v1684_v12  ;;  %v6333_v29 = vld [vmem:[#allocation77_spill] sm:$0xff]  ;;  %v1692_v44 = vmul.f32 %v3719_v7, %v3719_v7 }
 0x22a   :  { %v1723_v51 = vmul.f32 %v6333_v29, %v6333_v29 }
 0x22b   :  { %v1802_v18 = vadd.f32 %v1801_v48, %v1717_v26  ;;  %v1855_v26 = vadd.f32 %v1854_v46, %v1686_v27  ;;  %v6334_v48 = vld [vmem:[#allocation79_spill] sm:$0xff]  ;;  %v1694_v46 = vmul.f32 %v3723_v2, %v3723_v2 }
 0x22c   :  { %v1725_v5 = vmul.f32 %v6334_v48, %v6334_v48 }
 0x22d   :  { %v1803_v49 = vadd.f32 %v1802_v18, %v1719_v43  ;;  %v1856_v43 = vadd.f32 %v1855_v26, %v1688_v16  ;;  %v6335_v18 = vld [vmem:[#allocation85_spill] sm:$0xff]  ;;  %v1696_v26 = vmul.f32 %v3727_v40, %v3727_v40 }
 0x22e   :  { %v1727_v33 = vmul.f32 %v6335_v18, %v6335_v18 }
 0x22f   :  { %v1804_v38 = vadd.f32 %v1803_v49, %v1721_v35  ;;  %v1857_v35 = vadd.f32 %v1856_v43, %v1690_v11  ;;  %v6336_v49 = vld [vmem:[#allocation87_spill] sm:$0xff]  ;;  %v1698_v43 = vmul.f32 %v3731_v53, %v3731_v53 }
 0x230   :  { %v1729_v61 = vmul.f32 %v6336_v49, %v6336_v49 }
 0x231   :  { %v1805_v55 = vadd.f32 %v1804_v38, %v1723_v51  ;;  %v1858_v51 = vadd.f32 %v1857_v35, %v1692_v44  ;;  %v6337_v38 = vld [vmem:[#allocation92_spill] sm:$0xff]  ;;  %v1700_v35 = vmul.f32 %v3735_v31, %v3735_v31 }
 0x232   :  { %v1731_v14 = vmul.f32 %v6337_v38, %v6337_v38 }
 0x233   :  { %v1806_v12 = vadd.f32 %v1805_v55, %v1725_v5  ;;  %v1859_v5 = vadd.f32 %v1858_v51, %v1694_v46  ;;  %v6338_v55 = vld [vmem:[#allocation94_spill] sm:$0xff]  ;;  %v1702_v51 = vmul.f32 %v3739_v30, %v3739_v30 }
 0x234   :  { %v1733_v7 = vmul.f32 %v6338_v55, %v6338_v55 }
 0x235   :  { %v1807_v27 = vadd.f32 %v1806_v12, %v1727_v33  ;;  %v1860_v33 = vadd.f32 %v1859_v5, %v1696_v26  ;;  %v6339_v12 = vld [vmem:[#allocation9_spill] sm:$0xff]  ;;  %v1704_v5 = vmul.f32 %v3743_v34, %v3743_v34 }
 0x236   :  { %v1735_v2 = vmul.f32 %v6339_v12, %v6339_v12 }
 0x237   :  { %v1808_v16 = vadd.f32 %v1807_v27, %v1729_v61  ;;  %v1861_v61 = vadd.f32 %v1860_v33, %v1698_v43  ;;  %v6340_v27 = vld [vmem:[#allocation99_spill] sm:$0xff]  ;;  %v1706_v33 = vmul.f32 %v3747_v62, %v3747_v62 }
 0x238   :  { %v1737_v40 = vmul.f32 %v6340_v27, %v6340_v27 }
 0x239   :  { %v1809_v11 = vadd.f32 %v1808_v16, %v1731_v14  ;;  %v1862_v14 = vadd.f32 %v1861_v61, %v1700_v35  ;;  %v6341_v16 = vld [vmem:[#allocation100_spill] sm:$0xff] }
 0x23a   :  { %v1739_v53 = vmul.f32 %v6341_v16, %v6341_v16  ;;  %v6344_v61 = vld [vmem:[#allocation116_spill] sm:$0xff] }
 0x23b   :  { %v1810_v44 = vadd.f32 %v1809_v11, %v1733_v7  ;;  %v1863_v7 = vadd.f32 %v1862_v14, %v1702_v51  ;;  %v6342_v11 = vld [vmem:[#allocation101_spill] sm:$0xff]  ;;  %v1708_v0 = vmul.f32 %v6344_v61, %v6344_v61 }
 0x23c   :  { %v1741_v31 = vmul.f32 %v6342_v11, %v6342_v11  ;;  %v6346_v14 = vld [vmem:[#allocation117_spill] sm:$0xff] }
 0x23d   :  { %v1811_v46 = vadd.f32 %v1810_v44, %v1735_v2  ;;  %v1864_v2 = vadd.f32 %v1863_v7, %v1704_v5  ;;  %v6343_v44 = vld [vmem:[#allocation102_spill] sm:$0xff]  ;;  %v1710_v52 = vmul.f32 %v6346_v14, %v6346_v14 }
 0x23e   :  { %v1743_v30 = vmul.f32 %v6343_v44, %v6343_v44  ;;  %v6348_v7 = vld [vmem:[#allocation118_spill] sm:$0xff] }
 0x23f   :  { %v1812_v26 = vadd.f32 %v1811_v46, %v1737_v40  ;;  %v1865_v40 = vadd.f32 %v1864_v2, %v1706_v33  ;;  %v6345_v46 = vld [vmem:[#allocation103_spill] sm:$0xff]  ;;  %v1712_v4 = vmul.f32 %v6348_v7, %v6348_v7 }
 0x240   :  { %v1745_v34 = vmul.f32 %v6345_v46, %v6345_v46  ;;  %v6350_v2 = vld [vmem:[#allocation119_spill] sm:$0xff] }
 0x241   :  { %v1813_v43 = vadd.f32 %v1812_v26, %v1739_v53  ;;  %v1866_v53 = vadd.f32 %v1865_v40, %v1708_v0  ;;  %v6347_v26 = vld [vmem:[#allocation104_spill] sm:$0xff]  ;;  %v1714_v36 = vmul.f32 %v6350_v2, %v6350_v2  ;;  %v6352_v40 = vld [vmem:[#allocation27_spill] sm:$0xff] }
 0x242   :  { %v1747_v62 = vmul.f32 %v6347_v26, %v6347_v26  ;;  %v1716_v56 = vmul.f32 %v6352_v40, %v6352_v40 }
 0x243   :  { %v1814_v35 = vadd.f32 %v1813_v43, %v1741_v31  ;;  %v1867_v31 = vadd.f32 %v1866_v53, %v1710_v52  ;;  %v6349_v43 = vld [vmem:[#allocation105_spill] sm:$0xff]  ;;  %v6354_v53 = vld [vmem:[#allocation32_spill] sm:$0xff] }
 0x244   :  { %v1749_v61 = vmul.f32 %v6349_v43, %v6349_v43  ;;  %v1718_v24 = vmul.f32 %v6354_v53, %v6354_v53 }
 0x245   :  { %v1815_v51 = vadd.f32 %v1814_v35, %v1743_v30  ;;  %v1868_v30 = vadd.f32 %v1867_v31, %v1712_v4  ;;  %v6351_v35 = vld [vmem:[#allocation106_spill] sm:$0xff]  ;;  %v6356_v31 = vld [vmem:[#allocation33_spill] sm:$0xff] }
 0x246   :  { %v1751_v14 = vmul.f32 %v6351_v35, %v6351_v35  ;;  %v1720_v3 = vmul.f32 %v6356_v31, %v6356_v31  ;;  %v6368_v35 = vld [vmem:[#allocation63_spill] sm:$0xff] }
 0x247   :  { %v1816_v5 = vadd.f32 %v1815_v51, %v1745_v34  ;;  %v1869_v34 = vadd.f32 %v1868_v30, %v1714_v36  ;;  %v6353_v51 = vld [vmem:[#allocation107_spill] sm:$0xff]  ;;  %v6358_v30 = vld [vmem:[#allocation38_spill] sm:$0xff] }
 0x248   :  { %v1753_v7 = vmul.f32 %v6353_v51, %v6353_v51  ;;  %v1722_v13 = vmul.f32 %v6358_v30, %v6358_v30 }
 0x249   :  { %v1817_v33 = vadd.f32 %v1816_v5, %v1747_v62  ;;  %v1870_v62 = vadd.f32 %v1869_v34, %v1716_v56  ;;  %v6355_v5 = vld [vmem:[#allocation108_spill] sm:$0xff]  ;;  %v6360_v34 = vld [vmem:[#allocation39_spill] sm:$0xff] }
 0x24a   :  { %v1755_v2 = vmul.f32 %v6355_v5, %v6355_v5  ;;  %v1724_v42 = vmul.f32 %v6360_v34, %v6360_v34  ;;  %v6361_v5 = vld [vmem:[#allocation44_spill] sm:$0xff] }
 0x24b   :  { %v1818_v0 = vadd.f32 %v1817_v33, %v1749_v61  ;;  %v1871_v61 = vadd.f32 %v1870_v62, %v1718_v24  ;;  %v6357_v33 = vld [vmem:[#allocation109_spill] sm:$0xff]  ;;  %v1726_v24 = vmul.f32 %v6361_v5, %v6361_v5 }
 0x24c   :  { %v1757_v40 = vmul.f32 %v6357_v33, %v6357_v33  ;;  %v6362_v33 = vld [vmem:[#allocation45_spill] sm:$0xff] }
 0x24d   :  { %v1819_v52 = vadd.f32 %v1818_v0, %v1751_v14  ;;  %v1872_v14 = vadd.f32 %v1871_v61, %v1720_v3  ;;  %v6359_v0 = vld [vmem:[#allocation110_spill] sm:$0xff]  ;;  %v6366_v5 = vld [vmem:[#allocation57_spill] sm:$0xff] }
 0x24e   :  { %v1759_v53 = vmul.f32 %v6359_v0, %v6359_v0  ;;  %v6363_v3 = vld [vmem:[#allocation50_spill] sm:$0xff] }
 0x24f   :  { %v1820_v4 = vadd.f32 %v1819_v52, %v1753_v7  ;;  %v1873_v7 = vadd.f32 %v1872_v14, %v1722_v13  ;;  %v1730_v61 = vmul.f32 %v6363_v3, %v6363_v3  ;;  %v6365_v14 = vld [vmem:[#allocation56_spill] sm:$0xff] }
 0x251   :  { %v1821_v36 = vadd.f32 %v1820_v4, %v1755_v2  ;;  %v1874_v62 = vadd.f32 %v1873_v7, %v1724_v42  ;;  %v1728_v2 = vmul.f32 %v6362_v33, %v6362_v33  ;;  %v1736_v33 = vmul.f32 %v6366_v5, %v6366_v5  ;;  %v6370_v5 = vld [vmem:[#allocation69_spill] sm:$0xff] }
 0x253   :  { %v1822_v56 = vadd.f32 %v1821_v36, %v1757_v40  ;;  %v1875_v4 = vadd.f32 %v1874_v62, %v1726_v24  ;;  %v6364_v36 = vld [vmem:[#allocation51_spill] sm:$0xff] }
 0x254   :  { %v1732_v34 = vmul.f32 %v6364_v36, %v6364_v36 }
 0x255   :  { %v1823_v52 = vadd.f32 %v1822_v56, %v1759_v53  ;;  %v1876_v51 = vadd.f32 %v1875_v4, %v1728_v2  ;;  %v1734_v56 = vmul.f32 %v6365_v14, %v6365_v14  ;;  %v2035_v4 = vlaneseq }
 0x257   :  { %v1824_v31 = vrot.slane %v1823_v52, 4  ;;  %v1877_v13 = vadd.f32 %v1876_v51, %v1730_v61  ;;  %v1740_v51 = vmul.f32 %v6368_v35, %v6368_v35  ;;  %v2036_v14 = vshrl.u32 %v2035_v4, 7  ;;  %v2173_v4 = vld [vmem:[%s5787_s3] sm:$0x3] }
 0x259   :  { %v1825_v30 = vadd.f32 %v1824_v31, %v1823_v52  ;;  %v1878_v42 = vadd.f32 %v1877_v13, %v1732_v34  ;;  %v6367_v52 = vld [vmem:[#allocation62_spill] sm:$0xff] }
 0x25a   :  { %v1738_v62 = vmul.f32 %v6367_v52, %v6367_v52  ;;  %v6387_v52 = vld [vmem:[#allocation88_spill] sm:$0xff] }
 0x25b   :  { %v1826_v40 = vrot.slane %v1825_v30, 2  ;;  %v1879_v24 = vadd.f32 %v1878_v42, %v1734_v56  ;;  %v6371_v42 = vld [vmem:[#allocation74_spill] sm:$0xff] }
 0x25d   :  { %v1827_v53 = vadd.f32 %v1826_v40, %v1825_v30  ;;  %v1880_v2 = vadd.f32 %v1879_v24, %v1736_v33  ;;  %v6369_v40 = vld [vmem:[#allocation68_spill] sm:$0xff]  ;;  %v1746_v33 = vmul.f32 %v6371_v42, %v6371_v42  ;;  %v2037_v24 = vsub.s32 0, %v2036_v14 }
 0x25e   :  { %v1742_v34 = vmul.f32 %v6369_v40, %v6369_v40  ;;  %v6386_v40 = vld [vmem:[#allocation83_spill] sm:$0xff] }
 0x25f   :  { %v1828_v7 = vrot.slane %v1827_v53, 1  ;;  %v1881_v30 = vadd.f32 %v1880_v2, %v1738_v62  ;;  %v2041_v2 = vsub.s32 1, %v2036_v14  ;;  %v6378_v14 = vld [vmem:[#allocation90_spill] sm:$0xff] }
 0x260   :  { %v4101_v42 = vmul.f32 %v6378_v14, %v6378_v14  ;;  %v6385_v14 = vld [vmem:[#allocation80_spill] sm:$0xff] }
 0x261   :  { %v1829_v31 = vadd.f32 %v1828_v7, %v1827_v53  ;;  %v1882_v13 = vadd.f32 %v1881_v30, %v1740_v51  ;;  %v1744_v53 = vmul.f32 %v6370_v5, %v6370_v5  ;;  %v6373_v51 = vld [vmem:[#allocation82_spill] sm:$0xff] }
 0x262   :  { %v1750_v30 = vmul.f32 %v6373_v51, %v6373_v51  ;;  %v6379_v51 = vld [vmem:[#allocation91_spill] sm:$0xff] }
 0x263   :  { %v1899_v3 = vmul.f32 0.001953125, %v1829_v31  ;;  %v1883_v56 = vadd.f32 %v1882_v13, %v1742_v34  ;;  %v6372_v31 = vld [vmem:[#allocation76_spill] sm:$0xff] }
 0x264   :  { %v1748_v35 = vmul.f32 %v6372_v31, %v6372_v31  ;;  %v6374_v13 = vld [vmem:[#allocation84_spill] sm:$0xff]  ;;  %v4097_v31 = vrot.slane %v2173_v4, %v2041_v2 }
 0x265   :  { %v1901_v61 = vadd.f32 1e-05, %v1899_v3  ;;  %v1884_v7 = vadd.f32 %v1883_v56, %v1744_v53  ;;  %v2033_v3 = vld [vmem:[%s5786_s2] sm:$0x3]  ;;  %v1752_v53 = vmul.f32 %v6374_v13, %v6374_v13  ;;  %s2728_s2 = smov [#allocation3]  }
 0x266   :  { %v4089_v34 = vrot.slane %v2033_v3, %v2037_v24  ;;  %6377 = vst [vmem:[#allocation42_spill] sm:$0xff] %v4097_v31  ;;  %v6391_v31 = vld [vmem:[#allocation8_spill] sm:$0xff]  ;;  %s2574_s3 = sshll.u32 %s2728_s2, 4  ;;  %s2575_s3 = int_to_ptr.vmem [resolvable:$true] %s2574_s3 }
 0x267   :  { %2699 = vrsqrt.f32 %v1901_v61  ;;  %v1885_v62 = vadd.f32 %v1884_v7, %v1746_v33  ;;  %v4093_v33 = vrot.slane %v2173_v4, %v2037_v24  ;;  %v4095_v7 = vrot.slane %v2033_v3, %v2041_v2  ;;  %v6382_v24 = vld [vmem:[#allocation98_spill] sm:$0xff]  ;;  %s2703_s7 = scalar_lea.vmem %s2575_s3, 16384  ;;  %p2708_p1 = scmp.lt.s32.totalorder %s2575_s3, %s2575_s3 }
 0x268   :  { %v4115_v3 = vmul.f32 %v6382_v24, %v6382_v24  ;;  %p2704_p0 = scmp.ne.s32.totalorder %s2575_s3, %s2703_s7  ;;  %p2709_p2 = scmp.lt.s32.totalorder %s2703_s7, %s2703_s7 }
 0x269   :  { %v1886_v61 = vadd.f32 %v1885_v62, %v1748_v35  ;;  %6375 = vst [vmem:[#allocation25_spill] sm:$0xff] %v4093_v33  ;;  %6376 = vst [vmem:[#allocation28_spill] sm:$0xff] %v4095_v7  ;;  %v4107_v35 = vmul.f32 %v6379_v51, %v6379_v51  ;;  %v6380_v62 = vld [vmem:[#allocation97_spill] sm:$0xff] }
 0x26a   :  { %v4111_v13 = vmul.f32 %v6380_v62, %v6380_v62  ;;  %6383 = vst [vmem:[#allocation48_spill] sm:$0xff] %v4115_v3  ;;  %p2710_p3 = por %p2709_p2, %p2708_p1 }
 0x26b   :  { %v1887_v56 = vadd.f32 %v1886_v61, %v1750_v30  ;;  %v6384_v30 = vld [vmem:[#allocation75_spill] sm:$0xff] }
 0x26c   :  { %6381 = vst [vmem:[#allocation46_spill] sm:$0xff] %v4111_v13  ;;  %p2711_p4 = pnand %p2710_p3, %p2704_p0 }
 0x26d   :  { %v4117_v2 = vadd.f32 %v1887_v56, %v1752_v53  ;;  %v6388_v53 = vld [vmem:[#allocation95_spill] sm:$0xff] }
 0x271   :  { %v4103_v5 = vpop.eup %2699 }
 0x272   :  { %v2031_v4 = vmul.f32 %v4103_v5, %v6359_v0  ;;  %v4123_v61 = vmul.f32 %v4103_v5, %v6384_v30  ;;  %v4127_v51 = vmul.f32 %v4103_v5, %v6385_v14  ;;  %v4131_v62 = vmul.f32 %v4103_v5, %v6386_v40  ;;  %v6389_v0 = vld [vmem:[#allocation6_spill] sm:$0xff]  ;;  %v6393_v40 = vld [vmem:[#allocation11_spill] sm:$0xff] }
 0x273   :  { %v4135_v36 = vmul.f32 %v4103_v5, %v6387_v52  ;;  %v4139_v56 = vmul.f32 %v4103_v5, %v6388_v53  ;;  %v4143_v30 = vmul.f32 %v4103_v5, %v6389_v0  ;;  %v4147_v14 = vmul.f32 %v4103_v5, %v6391_v31  ;;  %v6395_v52 = vld [vmem:[#allocation13_spill] sm:$0xff]  ;;  %v6397_v53 = vld [vmem:[#allocation15_spill] sm:$0xff] }
 0x274   :  { %v2171_v7 = vmul.f32 %v4089_v34, %v2031_v4  ;;  %v4152_v24 = vmul.f32 %v4103_v5, %v6393_v40  ;;  %v4156_v3 = vmul.f32 %v4103_v5, %v6395_v52  ;;  %v4160_v13 = vmul.f32 %v4103_v5, %v6397_v53  ;;  %v6398_v0 = vld [vmem:[#allocation17_spill] sm:$0xff]  ;;  %v6399_v31 = vld [vmem:[#allocation19_spill] sm:$0xff] }
 0x275   :  { %6390 = vst [vmem:[#allocation52_spill] sm:$0xff] %v4143_v30  ;;  %6392 = vst [vmem:[#allocation54_spill] sm:$0xff] %v4147_v14  ;;  %v4164_v30 = vmul.f32 %v4103_v5, %v6398_v0  ;;  %v4168_v14 = vmul.f32 %v4103_v5, %v6399_v31  ;;  %v6401_v4 = vld [vmem:[#allocation21_spill] sm:$0xff]  ;;  %v4181_v53 = vmul.f32 %v4103_v5, %v6311_v28  ;;  %v6405_v31 = vld [vmem:[#allocation30_spill] sm:$0xff] }
 0x276   :  { %6394 = vst [vmem:[#allocation58_spill] sm:$0xff] %v4152_v24  ;;  %6396 = vst [vmem:[#allocation60_spill] sm:$0xff] %v4156_v3  ;;  %v4172_v40 = vmul.f32 %v4103_v5, %v6401_v4  ;;  %v6403_v24 = vld [vmem:[#allocation23_spill] sm:$0xff]  ;;  %v2311_v3 = vadd.f32 %v4093_v33, %v2171_v7  ;;  %v4185_v0 = vmul.f32 %v4103_v5, %v6312_v45  ;;  %v6406_v4 = vld [vmem:[#allocation34_spill] sm:$0xff] }
 0x277   :  { %6400 = vst [vmem:[#allocation64_spill] sm:$0xff] %v4168_v14  ;;  %v4176_v52 = vmul.f32 %v4103_v5, %v6403_v24  ;;  %v4189_v14 = vmul.f32 %v4103_v5, %v6405_v31  ;;  %v6407_v24 = vld [vmem:[#allocation36_spill] sm:$0xff]  ;;  %v4205_v45 = vmul.f32 %v4103_v5, %v6317_v60  ;;  %v4209_v31 = vmul.f32 %v4103_v5, %v6318_v8 }
 0x278   :  { %6402 = vst [vmem:[#allocation66_spill] sm:$0xff] %v4172_v40  ;;  %v4193_v40 = vmul.f32 %v4103_v5, %v6406_v4  ;;  %v6408_v7 = vld [vmem:[#allocation40_spill] sm:$0xff]  ;;  %v2439_v33 = vmax.f32 %v2311_v3, 0.0  ;;  %v4213_v4 = vmul.f32 %v4103_v5, %v6319_v37  ;;  %v4225_v60 = vmul.f32 %v4103_v5, %v6322_v17  ;;  %v6413_v3 = vld [vmem:[#allocation107_spill] sm:$0xff] }
 0x279   :  { %6404 = vst [vmem:[#allocation70_spill] sm:$0xff] %v4176_v52  ;;  %v4197_v52 = vmul.f32 %v4103_v5, %v6407_v24  ;;  %v4201_v28 = vmul.f32 %v4103_v5, %v6408_v7  ;;  %v4217_v24 = vmul.f32 %v4103_v5, %v6320_v19  ;;  %v4221_v7 = vmul.f32 %v4103_v5, %v6321_v21 }
 0x27a   :  { %v4229_v8 = vmul.f32 %v4103_v5, %v6323_v57  ;;  %v4233_v37 = vmul.f32 %v4103_v5, %v3424_v9  ;;  %2567 = vst [vmem:[#allocation3 + $0x3f0] sm:$0xff] %v2439_v33  ;;  %v4237_v19 = vmul.f32 %v4103_v5, %v3428_v23  ;;  %v4241_v21 = vmul.f32 %v4103_v5, %v3432_v22  ;;  %v6412_v33 = vld [vmem:[#allocation106_spill] sm:$0xff] }
 0x27b   :  { %v4245_v17 = vmul.f32 %v4103_v5, %v3436_v58  ;;  %v4249_v57 = vmul.f32 %v4103_v5, %v3440_v50  ;;  %v4253_v9 = vmul.f32 %v4103_v5, %v3444_v32  ;;  %v4257_v23 = vmul.f32 %v4103_v5, %v3448_v25 }
 0x27c   :  { %v4261_v22 = vmul.f32 %v4103_v5, %v3452_v41  ;;  %v4265_v58 = vmul.f32 %v4103_v5, %v3456_v15  ;;  %v4269_v50 = vmul.f32 %v4103_v5, %v3460_v1  ;;  %v4273_v32 = vmul.f32 %v4103_v5, %v3464_v6 }
 0x27d   :  { %v4277_v25 = vmul.f32 %v4103_v5, %v3468_v47  ;;  %v4281_v41 = vmul.f32 %v4103_v5, %v3472_v54  ;;  %v4285_v15 = vmul.f32 %v4103_v5, %v3476_v59  ;;  %v4289_v1 = vmul.f32 %v4103_v5, %v6325_v10 }
 0x27e   :  { %v4293_v6 = vmul.f32 %v4103_v5, %v6327_v20  ;;  %v4297_v47 = vmul.f32 %v4103_v5, %v6329_v63  ;;  %v4301_v54 = vmul.f32 %v4103_v5, %v6331_v39  ;;  %v4305_v59 = vmul.f32 %v4103_v5, %v6333_v29 }
 0x27f   :  { %v4309_v10 = vmul.f32 %v4103_v5, %v6334_v48  ;;  %v4313_v20 = vmul.f32 %v4103_v5, %v6335_v18  ;;  %v4317_v63 = vmul.f32 %v4103_v5, %v6336_v49  ;;  %v4321_v39 = vmul.f32 %v4103_v5, %v6337_v38 }
 0x280   :  { %v4325_v29 = vmul.f32 %v4103_v5, %v6338_v55  ;;  %v4329_v48 = vmul.f32 %v4103_v5, %v6339_v12  ;;  %v4333_v18 = vmul.f32 %v4103_v5, %v6340_v27  ;;  %v4337_v49 = vmul.f32 %v4103_v5, %v6341_v16 }
 0x281   :  { %v4341_v38 = vmul.f32 %v4103_v5, %v6342_v11  ;;  %v4345_v55 = vmul.f32 %v4103_v5, %v6343_v44  ;;  %v4349_v12 = vmul.f32 %v4103_v5, %v6345_v46  ;;  %v4353_v27 = vmul.f32 %v4103_v5, %v6347_v26 }
 0x282   :  { %v4357_v16 = vmul.f32 %v4103_v5, %v6349_v43  ;;  %v4361_v11 = vmul.f32 %v4103_v5, %v6412_v33  ;;  %v4365_v44 = vmul.f32 %v4103_v5, %v6413_v3  ;;  %v1889_v43 = vadd.f32 %v4117_v2, %v4101_v42  ;;  %v6418_v2 = vld [vmem:[#allocation52_spill] sm:$0xff] }
 0x283   :  { %6409 = vst [vmem:[#allocation72_spill] sm:$0xff] %v4345_v55  ;;  %6410 = vst [vmem:[#allocation77_spill] sm:$0xff] %v4349_v12  ;;  %v6414_v55 = vld [vmem:[#allocation108_spill] sm:$0xff]  ;;  %v6415_v12 = vld [vmem:[#allocation109_spill] sm:$0xff]  ;;  %v4383_v33 = vmul.f32 %v4089_v34, %v4127_v51  ;;  %v4387_v3 = vmul.f32 %v4089_v34, %v4131_v62  ;;  %v4396_v42 = vmul.f32 %v4089_v34, %v4139_v56 }
 0x284   :  { %6411 = vst [vmem:[#allocation79_spill] sm:$0xff] %v4357_v16  ;;  %v4369_v46 = vmul.f32 %v4103_v5, %v6414_v55  ;;  %v4373_v26 = vmul.f32 %v4103_v5, %v6415_v12  ;;  %v4379_v16 = vmul.f32 %v4089_v34, %v4123_v61  ;;  %v4391_v55 = vmul.f32 %v4089_v34, %v4135_v36  ;;  %v6419_v51 = vld [vmem:[#allocation54_spill] sm:$0xff]  ;;  %v6423_v36 = vld [vmem:[#allocation60_spill] sm:$0xff] }
 0x285   :  { %6416 = vst [vmem:[#allocation85_spill] sm:$0xff] %v4387_v3  ;;  %v1890_v5 = vadd.f32 %v1889_v43, %v4107_v35  ;;  %v4400_v61 = vmul.f32 %v4089_v34, %v6418_v2  ;;  %v4404_v12 = vmul.f32 %v4089_v34, %v6419_v51  ;;  %v6421_v62 = vld [vmem:[#allocation58_spill] sm:$0xff]  ;;  %v4416_v35 = vmul.f32 %v4089_v34, %v4160_v13  ;;  %v6426_v51 = vld [vmem:[#allocation64_spill] sm:$0xff] }
 0x286   :  { %6417 = vst [vmem:[#allocation87_spill] sm:$0xff] %v4391_v55  ;;  %v4408_v3 = vmul.f32 %v4089_v34, %v6421_v62  ;;  %v4412_v55 = vmul.f32 %v4089_v34, %v6423_v36  ;;  %v4420_v56 = vmul.f32 %v4089_v34, %v4164_v30  ;;  %v6425_v43 = vld [vmem:[#allocation46_spill] sm:$0xff]  ;;  %v4437_v13 = vmul.f32 %v4089_v34, %v4181_v53 }
 0x287   :  { %6420 = vst [vmem:[#allocation92_spill] sm:$0xff] %v4404_v12  ;;  %v1891_v2 = vadd.f32 %v1890_v5, %v6425_v43  ;;  %v4425_v12 = vmul.f32 %v4089_v34, %v6426_v51  ;;  %v6427_v62 = vld [vmem:[#allocation66_spill] sm:$0xff]  ;;  %v4441_v30 = vmul.f32 %v4089_v34, %v4185_v0  ;;  %v4445_v5 = vmul.f32 %v4089_v34, %v4189_v14  ;;  %v6429_v51 = vld [vmem:[#allocation48_spill] sm:$0xff] }
 0x288   :  { %6422 = vst [vmem:[#allocation94_spill] sm:$0xff] %v4408_v3  ;;  %6424 = vst [vmem:[#allocation9_spill] sm:$0xff] %v4412_v55  ;;  %v4429_v3 = vmul.f32 %v4089_v34, %v6427_v62  ;;  %v6428_v36 = vld [vmem:[#allocation70_spill] sm:$0xff]  ;;  %v4449_v43 = vmul.f32 %v4089_v34, %v4193_v40  ;;  %v4458_v53 = vmul.f32 %v4089_v34, %v4201_v28 }
 0x289   :  { %v4433_v55 = vmul.f32 %v4089_v34, %v6428_v36  ;;  %v1892_v62 = vadd.f32 %v1891_v2, %v6429_v51  ;;  %v4454_v36 = vmul.f32 %v4089_v34, %v4197_v52  ;;  %v4462_v0 = vmul.f32 %v4089_v34, %v4205_v45 }
 0x28a   :  { %v4466_v14 = vmul.f32 %v4089_v34, %v4209_v31  ;;  %v4470_v40 = vmul.f32 %v4089_v34, %v4213_v4  ;;  %v4474_v52 = vmul.f32 %v4089_v34, %v4217_v24  ;;  %v4478_v28 = vmul.f32 %v4089_v34, %v4221_v7 }
 0x28b   :  { %v1893_v2 = vrot.slane %v1892_v62, 4  ;;  %v4482_v45 = vmul.f32 %v4089_v34, %v4225_v60  ;;  %v4486_v31 = vmul.f32 %v4089_v34, %v4229_v8  ;;  %v4490_v4 = vmul.f32 %v4089_v34, %v4233_v37 }
 0x28c   :  { %v4494_v24 = vmul.f32 %v4089_v34, %v4237_v19  ;;  %v4498_v7 = vmul.f32 %v4089_v34, %v4241_v21  ;;  %v4502_v60 = vmul.f32 %v4089_v34, %v4245_v17  ;;  %v4506_v8 = vmul.f32 %v4089_v34, %v4249_v57 }
 0x28d   :  { %v1894_v51 = vadd.f32 %v1893_v2, %v1892_v62  ;;  %v4510_v37 = vmul.f32 %v4089_v34, %v4253_v9  ;;  %v4514_v19 = vmul.f32 %v4089_v34, %v4257_v23  ;;  %v4518_v21 = vmul.f32 %v4089_v34, %v4261_v22 }
 0x28e   :  { %v4522_v17 = vmul.f32 %v4089_v34, %v4265_v58  ;;  %v4526_v57 = vmul.f32 %v4089_v34, %v4269_v50  ;;  %v4530_v9 = vmul.f32 %v4089_v34, %v4273_v32  ;;  %v4534_v23 = vmul.f32 %v4089_v34, %v4277_v25 }
 0x28f   :  { %v1895_v62 = vrot.slane %v1894_v51, 2  ;;  %v4538_v22 = vmul.f32 %v4089_v34, %v4281_v41  ;;  %v4542_v58 = vmul.f32 %v4089_v34, %v4285_v15  ;;  %v4546_v50 = vmul.f32 %v4089_v34, %v4289_v1 }
 0x290   :  { %v4550_v32 = vmul.f32 %v4089_v34, %v4293_v6  ;;  %v4554_v25 = vmul.f32 %v4089_v34, %v4297_v47  ;;  %v4558_v41 = vmul.f32 %v4089_v34, %v4301_v54  ;;  %v4562_v15 = vmul.f32 %v4089_v34, %v4305_v59 }
 0x291   :  { %v1896_v2 = vadd.f32 %v1895_v62, %v1894_v51  ;;  %v4566_v1 = vmul.f32 %v4089_v34, %v4309_v10  ;;  %v4570_v6 = vmul.f32 %v4089_v34, %v4313_v20  ;;  %v4574_v47 = vmul.f32 %v4089_v34, %v4317_v63  ;;  %v6433_v62 = vld [vmem:[#allocation72_spill] sm:$0xff] }
 0x292   :  { %v4578_v54 = vmul.f32 %v4089_v34, %v4321_v39  ;;  %v4582_v59 = vmul.f32 %v4089_v34, %v4325_v29  ;;  %v4586_v10 = vmul.f32 %v4089_v34, %v4329_v48  ;;  %v4590_v20 = vmul.f32 %v4089_v34, %v4333_v18 }
 0x293   :  { %v1897_v51 = vrot.slane %v1896_v2, 1  ;;  %v4594_v63 = vmul.f32 %v4089_v34, %v4337_v49  ;;  %v4598_v39 = vmul.f32 %v4089_v34, %v4341_v38  ;;  %v4602_v29 = vmul.f32 %v4089_v34, %v6433_v62 }
 0x294   :  { %6430 = vst [vmem:[#allocation99_spill] sm:$0xff] %v4582_v59  ;;  %6431 = vst [vmem:[#allocation100_spill] sm:$0xff] %v4590_v20  ;;  %v6434_v59 = vld [vmem:[#allocation77_spill] sm:$0xff]  ;;  %v4610_v18 = vmul.f32 %v4089_v34, %v4353_v27  ;;  %v6435_v20 = vld [vmem:[#allocation79_spill] sm:$0xff]  ;;  %v4618_v38 = vmul.f32 %v4089_v34, %v4361_v11  ;;  %v4622_v62 = vmul.f32 %v4089_v34, %v4365_v44 }
 0x295   :  { %6432 = vst [vmem:[#allocation101_spill] sm:$0xff] %v4598_v39  ;;  %v4606_v48 = vmul.f32 %v4089_v34, %v6434_v59  ;;  %v4614_v49 = vmul.f32 %v4089_v34, %v6435_v20  ;;  %v1898_v39 = vadd.f32 %v1897_v51, %v1896_v2  ;;  %v4626_v59 = vmul.f32 %v4089_v34, %v4369_v46  ;;  %v6439_v20 = vld [vmem:[#allocation25_spill] sm:$0xff]  ;;  %v6444_v51 = vld [vmem:[#allocation87_spill] sm:$0xff] }
 0x296   :  { %v4630_v27 = vmul.f32 %v4089_v34, %v4373_v26  ;;  %v4638_v11 = vadd.f32 %v6439_v20, %v4383_v33  ;;  %v6442_v2 = vld [vmem:[#allocation85_spill] sm:$0xff]  ;;  %v4646_v46 = vadd.f32 %v6439_v20, %v6444_v51  ;;  %v4650_v34 = vadd.f32 %v6439_v20, %v4396_v42  ;;  %v6448_v26 = vld [vmem:[#allocation92_spill] sm:$0xff] }
 0x297   :  { %6436 = vst [vmem:[#allocation102_spill] sm:$0xff] %v4614_v49  ;;  %6437 = vst [vmem:[#allocation103_spill] sm:$0xff] %v4626_v59  ;;  %v4634_v49 = vadd.f32 %v6439_v20, %v4379_v16  ;;  %v4642_v44 = vadd.f32 %v6439_v20, %v6442_v2  ;;  %v1900_v59 = vmul.f32 0.001953125, %v1898_v39  ;;  %v4654_v16 = vadd.f32 %v6439_v20, %v4400_v61 }
 0x298   :  { %6438 = vst [vmem:[#allocation104_spill] sm:$0xff] %v4630_v27  ;;  %6441 = vst [vmem:[#allocation110_spill] sm:$0xff] %v4638_v11  ;;  %v4658_v33 = vadd.f32 %v6439_v20, %v6448_v26  ;;  %v6450_v11 = vld [vmem:[#allocation94_spill] sm:$0xff]  ;;  %v4670_v42 = vadd.f32 %v6439_v20, %v4416_v35  ;;  %v4674_v61 = vadd.f32 %v6439_v20, %v4420_v56  ;;  %v6570_v27 = vld [vmem:[#allocation68_spill] sm:$0xff] }
 0x299   :  { %6440 = vst [vmem:[#allocation105_spill] sm:$0xff] %v4634_v49  ;;  %6443 = vst [vmem:[#allocation75_spill] sm:$0xff] %v4642_v44  ;;  %v4662_v2 = vadd.f32 %v6439_v20, %v6450_v11  ;;  %v6452_v44 = vld [vmem:[#allocation9_spill] sm:$0xff]  ;;  %v1902_v39 = vadd.f32 1e-05, %v1900_v59  ;;  %v4678_v26 = vadd.f32 %v6439_v20, %v4425_v12  ;;  %v4682_v11 = vadd.f32 %v6439_v20, %v4429_v3  ;;  %v6568_v49 = vld [vmem:[#allocation63_spill] sm:$0xff] }
 0x29a   :  { %6445 = vst [vmem:[#allocation80_spill] sm:$0xff] %v4646_v46  ;;  %6446 = vst [vmem:[#allocation83_spill] sm:$0xff] %v4650_v34  ;;  %v4666_v51 = vadd.f32 %v6439_v20, %v6452_v44  ;;  %v4686_v44 = vadd.f32 %v6439_v20, %v4433_v55  ;;  %v4690_v35 = vadd.f32 %v6439_v20, %v4437_v13  ;;  %v6564_v34 = vld [vmem:[#allocation57_spill] sm:$0xff]  ;;  %v6566_v46 = vld [vmem:[#allocation62_spill] sm:$0xff] }
 0x29b   :  { %6447 = vst [vmem:[#allocation88_spill] sm:$0xff] %v4654_v16  ;;  %6449 = vst [vmem:[#allocation95_spill] sm:$0xff] %v4658_v33  ;;  %v4694_v56 = vadd.f32 %v6439_v20, %v4441_v30  ;;  %v4698_v12 = vadd.f32 %v6439_v20, %v4445_v5  ;;  %v4702_v3 = vadd.f32 %v6439_v20, %v4449_v43  ;;  %2701 = vrsqrt.f32 %v1902_v39  ;;  %v6495_v59 = vld [vmem:[#allocation99_spill] sm:$0xff]  ;;  %v6498_v39 = vld [vmem:[#allocation100_spill] sm:$0xff] }
 0x29c   :  { %6451 = vst [vmem:[#allocation6_spill] sm:$0xff] %v4662_v2  ;;  %6453 = vst [vmem:[#allocation8_spill] sm:$0xff] %v4666_v51  ;;  %v4706_v55 = vadd.f32 %v6439_v20, %v4454_v36  ;;  %v4710_v13 = vadd.f32 %v6439_v20, %v4458_v53  ;;  %v4714_v30 = vadd.f32 %v6439_v20, %v4462_v0  ;;  %v6560_v51 = vld [vmem:[#allocation45_spill] sm:$0xff]  ;;  %v6561_v2 = vld [vmem:[#allocation50_spill] sm:$0xff] }
 0x29d   :  { %6454 = vst [vmem:[#allocation11_spill] sm:$0xff] %v4670_v42  ;;  %6455 = vst [vmem:[#allocation13_spill] sm:$0xff] %v4674_v61  ;;  %v4718_v5 = vadd.f32 %v6439_v20, %v4466_v14  ;;  %v4722_v43 = vadd.f32 %v6439_v20, %v4470_v40  ;;  %v4726_v36 = vadd.f32 %v6439_v20, %v4474_v52  ;;  %v6558_v61 = vld [vmem:[#allocation39_spill] sm:$0xff]  ;;  %v6559_v42 = vld [vmem:[#allocation44_spill] sm:$0xff] }
 0x29e   :  { %6456 = vst [vmem:[#allocation15_spill] sm:$0xff] %v4678_v26  ;;  %6457 = vst [vmem:[#allocation17_spill] sm:$0xff] %v4682_v11  ;;  %v4730_v53 = vadd.f32 %v6439_v20, %v4478_v28  ;;  %v4734_v0 = vadd.f32 %v6439_v20, %v4482_v45  ;;  %v4738_v14 = vadd.f32 %v6439_v20, %v4486_v31  ;;  %v6556_v11 = vld [vmem:[#allocation33_spill] sm:$0xff]  ;;  %v6557_v26 = vld [vmem:[#allocation38_spill] sm:$0xff] }
 0x29f   :  { %6458 = vst [vmem:[#allocation19_spill] sm:$0xff] %v4686_v44  ;;  %6459 = vst [vmem:[#allocation21_spill] sm:$0xff] %v4690_v35  ;;  %v4742_v40 = vadd.f32 %v6439_v20, %v4490_v4  ;;  %v4746_v52 = vadd.f32 %v6439_v20, %v4494_v24  ;;  %v4750_v28 = vadd.f32 %v6439_v20, %v4498_v7  ;;  %v6554_v35 = vld [vmem:[#allocation27_spill] sm:$0xff]  ;;  %v6555_v44 = vld [vmem:[#allocation32_spill] sm:$0xff] }
 0x2a0   :  { %6460 = vst [vmem:[#allocation23_spill] sm:$0xff] %v4694_v56  ;;  %6461 = vst [vmem:[#allocation30_spill] sm:$0xff] %v4698_v12  ;;  %v4754_v45 = vadd.f32 %v6439_v20, %v4502_v60  ;;  %v4758_v31 = vadd.f32 %v6439_v20, %v4506_v8  ;;  %v4762_v4 = vadd.f32 %v6439_v20, %v4510_v37  ;;  %v6552_v12 = vld [vmem:[#allocation118_spill] sm:$0xff]  ;;  %v6553_v56 = vld [vmem:[#allocation119_spill] sm:$0xff] }
 0x2a1   :  { %6462 = vst [vmem:[#allocation34_spill] sm:$0xff] %v4702_v3  ;;  %6463 = vst [vmem:[#allocation36_spill] sm:$0xff] %v4706_v55  ;;  %v4766_v24 = vadd.f32 %v6439_v20, %v4514_v19  ;;  %v4770_v7 = vadd.f32 %v6439_v20, %v4518_v21  ;;  %v4774_v60 = vadd.f32 %v6439_v20, %v4522_v17  ;;  %v6550_v55 = vld [vmem:[#allocation116_spill] sm:$0xff]  ;;  %v6551_v3 = vld [vmem:[#allocation117_spill] sm:$0xff] }
 0x2a2   :  { %6464 = vst [vmem:[#allocation40_spill] sm:$0xff] %v4710_v13  ;;  %6465 = vst [vmem:[#allocation106_spill] sm:$0xff] %v4714_v30  ;;  %v4778_v8 = vadd.f32 %v6439_v20, %v4526_v57  ;;  %v4782_v37 = vadd.f32 %v6439_v20, %v4530_v9  ;;  %v4786_v19 = vadd.f32 %v6439_v20, %v4534_v23  ;;  %v6548_v30 = vld [vmem:[#allocation114_spill] sm:$0xff]  ;;  %v6549_v13 = vld [vmem:[#allocation115_spill] sm:$0xff] }
 0x2a3   :  { %6466 = vst [vmem:[#allocation107_spill] sm:$0xff] %v4718_v5  ;;  %6467 = vst [vmem:[#allocation108_spill] sm:$0xff] %v4722_v43  ;;  %v4790_v21 = vadd.f32 %v6439_v20, %v4538_v22  ;;  %v4794_v17 = vadd.f32 %v6439_v20, %v4542_v58  ;;  %v4798_v57 = vadd.f32 %v6439_v20, %v4546_v50  ;;  %v6545_v43 = vld [vmem:[#allocation111_spill] sm:$0xff]  ;;  %v6547_v5 = vld [vmem:[#allocation113_spill] sm:$0xff] }
 0x2a4   :  { %6468 = vst [vmem:[#allocation109_spill] sm:$0xff] %v4726_v36  ;;  %6469 = vst [vmem:[#allocation52_spill] sm:$0xff] %v4730_v53  ;;  %v4802_v9 = vadd.f32 %v6439_v20, %v4550_v32  ;;  %v4806_v23 = vadd.f32 %v6439_v20, %v4554_v25  ;;  %v4810_v22 = vadd.f32 %v6439_v20, %v4558_v41  ;;  %v6543_v53 = vld [vmem:[#allocation93_spill] sm:$0xff]  ;;  %v6544_v36 = vld [vmem:[#allocation96_spill] sm:$0xff] }
 0x2a5   :  { %6470 = vst [vmem:[#allocation54_spill] sm:$0xff] %v4734_v0  ;;  %6471 = vst [vmem:[#allocation58_spill] sm:$0xff] %v4738_v14  ;;  %v4814_v58 = vadd.f32 %v6439_v20, %v4562_v15  ;;  %v4818_v50 = vadd.f32 %v6439_v20, %v4566_v1  ;;  %v4822_v32 = vadd.f32 %v6439_v20, %v4570_v6  ;;  %v6541_v14 = vld [vmem:[#allocation86_spill] sm:$0xff]  ;;  %v6542_v0 = vld [vmem:[#allocation89_spill] sm:$0xff] }
 0x2a6   :  { %6472 = vst [vmem:[#allocation60_spill] sm:$0xff] %v4742_v40  ;;  %6473 = vst [vmem:[#allocation46_spill] sm:$0xff] %v4746_v52  ;;  %v4826_v25 = vadd.f32 %v6439_v20, %v4574_v47  ;;  %v4830_v41 = vadd.f32 %v6439_v20, %v4578_v54  ;;  %v4834_v15 = vadd.f32 %v6439_v20, %v6495_v59  ;;  %v6538_v52 = vld [vmem:[#allocation73_spill] sm:$0xff]  ;;  %v6562_v33 = vld [vmem:[#allocation51_spill] sm:$0xff] }
 0x2a7   :  { %6474 = vst [vmem:[#allocation64_spill] sm:$0xff] %v4750_v28  ;;  %6475 = vst [vmem:[#allocation66_spill] sm:$0xff] %v4754_v45  ;;  %v4838_v1 = vadd.f32 %v6439_v20, %v4586_v10  ;;  %v4842_v6 = vadd.f32 %v6439_v20, %v6498_v39  ;;  %v4846_v47 = vadd.f32 %v6439_v20, %v4594_v63  ;;  %v6506_v63 = vld [vmem:[#allocation102_spill] sm:$0xff]  ;;  %v6536_v45 = vld [vmem:[#allocation67_spill] sm:$0xff] }
 0x2a8   :  { %6476 = vst [vmem:[#allocation70_spill] sm:$0xff] %v4758_v31  ;;  %6477 = vst [vmem:[#allocation48_spill] sm:$0xff] %v4762_v4  ;;  %v4854_v59 = vadd.f32 %v6439_v20, %v4602_v29  ;;  %v4858_v10 = vadd.f32 %v6439_v20, %v4606_v48  ;;  %v4864_v39 = vadd.f32 %v6439_v20, %v4610_v18  ;;  %v6510_v48 = vld [vmem:[#allocation98_spill] sm:$0xff]  ;;  %v6534_v4 = vld [vmem:[#allocation61_spill] sm:$0xff] }
 0x2a9   :  { %6478 = vst [vmem:[#allocation72_spill] sm:$0xff] %v4766_v24  ;;  %6479 = vst [vmem:[#allocation77_spill] sm:$0xff] %v4770_v7  ;;  %v4876_v29 = vadd.f32 %v6439_v20, %v4622_v62  ;;  %v6512_v18 = vld [vmem:[#allocation10_spill] sm:$0xff]  ;;  %v6515_v62 = vld [vmem:[#allocation16_spill] sm:$0xff] }
 0x2aa   :  { %6480 = vst [vmem:[#allocation79_spill] sm:$0xff] %v4774_v60  ;;  %6481 = vst [vmem:[#allocation85_spill] sm:$0xff] %v4778_v8  ;;  %v6533_v7 = vld [vmem:[#allocation59_spill] sm:$0xff]  ;;  %v6535_v31 = vld [vmem:[#allocation65_spill] sm:$0xff] }
 0x2ab   :  { %6482 = vst [vmem:[#allocation87_spill] sm:$0xff] %v4782_v37  ;;  %6483 = vst [vmem:[#allocation92_spill] sm:$0xff] %v4786_v19  ;;  %v6537_v28 = vld [vmem:[#allocation71_spill] sm:$0xff]  ;;  %v6540_v40 = vld [vmem:[#allocation81_spill] sm:$0xff] }
 0x2ac   :  { %6484 = vst [vmem:[#allocation94_spill] sm:$0xff] %v4790_v21  ;;  %6485 = vst [vmem:[#allocation9_spill] sm:$0xff] %v4794_v17  ;;  %v6563_v16 = vld [vmem:[#allocation56_spill] sm:$0xff] }
 0x2ad   :  { %6486 = vst [vmem:[#allocation120_spill] sm:$0xff] %v4798_v57  ;;  %6487 = vst [vmem:[#allocation121_spill] sm:$0xff] %v4802_v9  ;;  %v6525_v9 = vld [vmem:[#allocation37_spill] sm:$0xff]  ;;  %v6526_v57 = vld [vmem:[#allocation42_spill] sm:$0xff] }
 0x2ae   :  { %6488 = vst [vmem:[#allocation122_spill] sm:$0xff] %v4806_v23  ;;  %6489 = vst [vmem:[#allocation123_spill] sm:$0xff] %v4810_v22 }
 0x2af   :  { %6490 = vst [vmem:[#allocation124_spill] sm:$0xff] %v4814_v58  ;;  %6491 = vst [vmem:[#allocation125_spill] sm:$0xff] %v4818_v50 }
 0x2b0   :  { %6492 = vst [vmem:[#allocation126_spill] sm:$0xff] %v4822_v32  ;;  %6493 = vst [vmem:[#allocation127_spill] sm:$0xff] %v4826_v25  ;;  %v6501_v25 = vld [vmem:[#allocation101_spill] sm:$0xff] }
 0x2b1   :  { %6494 = vst [vmem:[#allocation128_spill] sm:$0xff] %v4830_v41  ;;  %6496 = vst [vmem:[#allocation99_spill] sm:$0xff] %v4834_v15  ;;  %v4850_v54 = vadd.f32 %v6439_v20, %v6501_v25  ;;  %v4872_v25 = vadd.f32 %v6439_v20, %v4618_v38  ;;  %v6514_v38 = vld [vmem:[#allocation14_spill] sm:$0xff]  ;;  %v6518_v15 = vld [vmem:[#allocation28_spill] sm:$0xff] }
 0x2b2   :  { %6497 = vst [vmem:[#allocation129_spill] sm:$0xff] %v4838_v1  ;;  %6499 = vst [vmem:[#allocation100_spill] sm:$0xff] %v4842_v6  ;;  %v4860_v1 = vpop.eup %2701  ;;  %v6517_v6 = vld [vmem:[#allocation20_spill] sm:$0xff] }
 0x2b3   :  { %6500 = vst [vmem:[#allocation130_spill] sm:$0xff] %v4846_v47  ;;  %6502 = vst [vmem:[#allocation101_spill] sm:$0xff] %v4850_v54  ;;  %v4868_v47 = vadd.f32 %v6439_v20, %v6506_v63  ;;  %v6513_v63 = vld [vmem:[#allocation12_spill] sm:$0xff]  ;;  %v6572_v20 = vld [vmem:[#allocation69_spill] sm:$0xff] }
 0x2b4   :  { %6503 = vst [vmem:[#allocation131_spill] sm:$0xff] %v4854_v59  ;;  %6504 = vst [vmem:[#allocation132_spill] sm:$0xff] %v4858_v10  ;;  %v2032_v10 = vmul.f32 %v4860_v1, %v6510_v48  ;;  %v6511_v59 = vld [vmem:[#allocation7_spill] sm:$0xff]  ;;  %v6516_v48 = vld [vmem:[#allocation18_spill] sm:$0xff] }
 0x2b5   :  { %6505 = vst [vmem:[#allocation133_spill] sm:$0xff] %v4864_v39  ;;  %6507 = vst [vmem:[#allocation102_spill] sm:$0xff] %v4868_v47  ;;  %v4882_v54 = vmul.f32 %v4860_v1, %v6511_v59  ;;  %v4886_v39 = vmul.f32 %v4860_v1, %v6512_v18  ;;  %v4890_v47 = vmul.f32 %v4860_v1, %v6513_v63  ;;  %v6519_v63 = vld [vmem:[#allocation22_spill] sm:$0xff] }
 0x2b6   :  { %6508 = vst [vmem:[#allocation134_spill] sm:$0xff] %v4872_v25  ;;  %6509 = vst [vmem:[#allocation135_spill] sm:$0xff] %v4876_v29  ;;  %v4894_v25 = vmul.f32 %v4860_v1, %v6514_v38  ;;  %v4898_v29 = vmul.f32 %v4860_v1, %v6515_v62  ;;  %v4902_v59 = vmul.f32 %v4860_v1, %v6516_v48  ;;  %v6520_v38 = vld [vmem:[#allocation24_spill] sm:$0xff]  ;;  %v6521_v62 = vld [vmem:[#allocation26_spill] sm:$0xff] }
 0x2b7   :  { %v4906_v18 = vmul.f32 %v4860_v1, %v6517_v6  ;;  %v2172_v41 = vmul.f32 %v6518_v15, %v2032_v10  ;;  %v4911_v32 = vmul.f32 %v4860_v1, %v6519_v63  ;;  %v4915_v50 = vmul.f32 %v4860_v1, %v6520_v38  ;;  %v6522_v48 = vld [vmem:[#allocation29_spill] sm:$0xff]  ;;  %v6523_v6 = vld [vmem:[#allocation31_spill] sm:$0xff] }
 0x2b8   :  { %v4919_v58 = vmul.f32 %v4860_v1, %v6521_v62  ;;  %v4923_v22 = vmul.f32 %v4860_v1, %v6522_v48  ;;  %v4927_v23 = vmul.f32 %v4860_v1, %v6523_v6  ;;  %v6524_v10 = vld [vmem:[#allocation35_spill] sm:$0xff]  ;;  %v4935_v38 = vmul.f32 %v4860_v1, %v6525_v9  ;;  %v6527_v62 = vld [vmem:[#allocation41_spill] sm:$0xff] }
 0x2b9   :  { %v4931_v63 = vmul.f32 %v4860_v1, %v6524_v10  ;;  %v2312_v17 = vadd.f32 %v6526_v57, %v2172_v41  ;;  %v4940_v21 = vmul.f32 %v4860_v1, %v6527_v62  ;;  %v6528_v48 = vld [vmem:[#allocation43_spill] sm:$0xff]  ;;  %v6530_v10 = vld [vmem:[#allocation49_spill] sm:$0xff]  ;;  %v6574_v57 = vld [vmem:[#allocation74_spill] sm:$0xff] }
 0x2ba   :  { %v4944_v19 = vmul.f32 %v4860_v1, %v6528_v48  ;;  %v6529_v6 = vld [vmem:[#allocation47_spill] sm:$0xff]  ;;  %v4952_v8 = vmul.f32 %v4860_v1, %v6530_v10  ;;  %v6531_v9 = vld [vmem:[#allocation53_spill] sm:$0xff]  ;;  %v4964_v48 = vmul.f32 %v4860_v1, %v6533_v7  ;;  %v4972_v10 = vmul.f32 %v4860_v1, %v6535_v31 }
 0x2bb   :  { %v4948_v37 = vmul.f32 %v4860_v1, %v6529_v6  ;;  %v4956_v60 = vmul.f32 %v4860_v1, %v6531_v9  ;;  %v6532_v41 = vld [vmem:[#allocation55_spill] sm:$0xff]  ;;  %v2440_v24 = vmax.f32 %v2312_v17, 0.0  ;;  %v4968_v6 = vmul.f32 %v4860_v1, %v6534_v4  ;;  %v6539_v17 = vld [vmem:[#allocation78_spill] sm:$0xff] }
 0x2bc   :  { %v4960_v62 = vmul.f32 %v4860_v1, %v6532_v41  ;;  %v4976_v9 = vmul.f32 %v4860_v1, %v6536_v45  ;;  %v4980_v41 = vmul.f32 %v4860_v1, %v6537_v28  ;;  %v4984_v7 = vmul.f32 %v4860_v1, %v6538_v52 }
 0x2bd   :  { %v4988_v4 = vmul.f32 %v4860_v1, %v6539_v17  ;;  %v4992_v31 = vmul.f32 %v4860_v1, %v6540_v40  ;;  %2568 = vst [vmem:[#allocation3 + $0x3f8] sm:$0xff] %v2440_v24  ;;  %v4996_v45 = vmul.f32 %v4860_v1, %v6541_v14  ;;  %v5000_v28 = vmul.f32 %v4860_v1, %v6542_v0  ;;  %v6546_v24 = vld [vmem:[#allocation112_spill] sm:$0xff] }
 0x2be   :  { %v5004_v52 = vmul.f32 %v4860_v1, %v6543_v53  ;;  %v5008_v17 = vmul.f32 %v4860_v1, %v6544_v36  ;;  %v5012_v40 = vmul.f32 %v4860_v1, %v6545_v43  ;;  %v5016_v14 = vmul.f32 %v4860_v1, %v6546_v24 }
 0x2bf   :  { %v5020_v0 = vmul.f32 %v4860_v1, %v6547_v5  ;;  %v5024_v53 = vmul.f32 %v4860_v1, %v6548_v30  ;;  %v5028_v36 = vmul.f32 %v4860_v1, %v6549_v13  ;;  %v5032_v43 = vmul.f32 %v4860_v1, %v6550_v55 }
 0x2c0   :  { %v5036_v24 = vmul.f32 %v4860_v1, %v6551_v3  ;;  %v5040_v5 = vmul.f32 %v4860_v1, %v6552_v12  ;;  %v5044_v30 = vmul.f32 %v4860_v1, %v6553_v56  ;;  %v5048_v13 = vmul.f32 %v4860_v1, %v6554_v35 }
 0x2c1   :  { %v5052_v55 = vmul.f32 %v4860_v1, %v6555_v44  ;;  %v5056_v3 = vmul.f32 %v4860_v1, %v6556_v11  ;;  %v5060_v12 = vmul.f32 %v4860_v1, %v6557_v26  ;;  %v5064_v56 = vmul.f32 %v4860_v1, %v6558_v61 }
 0x2c2   :  { %v5068_v35 = vmul.f32 %v4860_v1, %v6559_v42  ;;  %v5072_v44 = vmul.f32 %v4860_v1, %v6560_v51  ;;  %v5076_v11 = vmul.f32 %v4860_v1, %v6561_v2  ;;  %v5080_v26 = vmul.f32 %v4860_v1, %v6562_v33 }
 0x2c3   :  { %v5084_v61 = vmul.f32 %v4860_v1, %v6563_v16  ;;  %v5088_v42 = vmul.f32 %v4860_v1, %v6564_v34  ;;  %v5092_v51 = vmul.f32 %v4860_v1, %v6566_v46  ;;  %v5096_v2 = vmul.f32 %v4860_v1, %v6568_v49 }
 0x2c4   :  { %v5100_v33 = vmul.f32 %v4860_v1, %v6570_v27  ;;  %v5104_v16 = vmul.f32 %v4860_v1, %v6572_v20  ;;  %v5108_v34 = vmul.f32 %v4860_v1, %v6574_v57 }
 0x2c5   :  { %6565 = vst [vmem:[#allocation98_spill] sm:$0xff] %v5088_v42  ;;  %6567 = vst [vmem:[#allocation7_spill] sm:$0xff] %v5092_v51  ;;  %v6576_v42 = vld [vmem:[#allocation76_spill] sm:$0xff]  ;;  %v6577_v51 = vld [vmem:[#allocation82_spill] sm:$0xff] }
 0x2c6   :  { %6569 = vst [vmem:[#allocation10_spill] sm:$0xff] %v5096_v2  ;;  %6571 = vst [vmem:[#allocation12_spill] sm:$0xff] %v5100_v33  ;;  %v5112_v46 = vmul.f32 %v4860_v1, %v6576_v42  ;;  %v5116_v49 = vmul.f32 %v4860_v1, %v6577_v51  ;;  %v6578_v2 = vld [vmem:[#allocation84_spill] sm:$0xff]  ;;  %v6579_v33 = vld [vmem:[#allocation90_spill] sm:$0xff]  ;;  %v5136_v51 = vmul.f32 %v6518_v15, %v4882_v54 }
 0x2c7   :  { %6573 = vst [vmem:[#allocation14_spill] sm:$0xff] %v5104_v16  ;;  %6575 = vst [vmem:[#allocation16_spill] sm:$0xff] %v5108_v34  ;;  %v5120_v27 = vmul.f32 %v4860_v1, %v6578_v2  ;;  %v5124_v20 = vmul.f32 %v4860_v1, %v6579_v33  ;;  %v6580_v16 = vld [vmem:[#allocation91_spill] sm:$0xff]  ;;  %v6581_v34 = vld [vmem:[#allocation97_spill] sm:$0xff]  ;;  %v5140_v2 = vmul.f32 %v6518_v15, %v4886_v39 }
 0x2c8   :  { %v5128_v57 = vmul.f32 %v4860_v1, %v6580_v16  ;;  %v5132_v42 = vmul.f32 %v4860_v1, %v6581_v34  ;;  %v5144_v33 = vmul.f32 %v6518_v15, %v4890_v47  ;;  %v5148_v16 = vmul.f32 %v6518_v15, %v4894_v25 }
 0x2c9   :  { %v5152_v1 = vmul.f32 %v6518_v15, %v4898_v29  ;;  %v5156_v54 = vmul.f32 %v6518_v15, %v4902_v59  ;;  %v5160_v39 = vmul.f32 %v6518_v15, %v4906_v18  ;;  %v5164_v47 = vmul.f32 %v6518_v15, %v4911_v32 }
 0x2ca   :  { %v5168_v25 = vmul.f32 %v6518_v15, %v4915_v50  ;;  %v5172_v29 = vmul.f32 %v6518_v15, %v4919_v58  ;;  %v5176_v59 = vmul.f32 %v6518_v15, %v4923_v22  ;;  %v5180_v18 = vmul.f32 %v6518_v15, %v4927_v23 }
 0x2cb   :  { %v5184_v32 = vmul.f32 %v6518_v15, %v4931_v63  ;;  %v5188_v50 = vmul.f32 %v6518_v15, %v4935_v38  ;;  %v5192_v58 = vmul.f32 %v6518_v15, %v4940_v21  ;;  %v5196_v22 = vmul.f32 %v6518_v15, %v4944_v19 }
 0x2cc   :  { %v5200_v23 = vmul.f32 %v6518_v15, %v4948_v37  ;;  %v5204_v63 = vmul.f32 %v6518_v15, %v4952_v8  ;;  %v5208_v38 = vmul.f32 %v6518_v15, %v4956_v60  ;;  %v5212_v21 = vmul.f32 %v6518_v15, %v4960_v62  ;;  %v6587_v34 = vld [vmem:[#allocation98_spill] sm:$0xff] }
 0x2cd   :  { %v5216_v19 = vmul.f32 %v6518_v15, %v4964_v48  ;;  %v5220_v37 = vmul.f32 %v6518_v15, %v4968_v6  ;;  %v5224_v8 = vmul.f32 %v6518_v15, %v4972_v10  ;;  %v5228_v60 = vmul.f32 %v6518_v15, %v4976_v9 }
 0x2ce   :  { %v5232_v62 = vmul.f32 %v6518_v15, %v4980_v41  ;;  %v5236_v48 = vmul.f32 %v6518_v15, %v4984_v7  ;;  %v5240_v6 = vmul.f32 %v6518_v15, %v4988_v4  ;;  %v5244_v10 = vmul.f32 %v6518_v15, %v4992_v31 }
 0x2cf   :  { %v5248_v9 = vmul.f32 %v6518_v15, %v4996_v45  ;;  %v5252_v41 = vmul.f32 %v6518_v15, %v5000_v28  ;;  %v5256_v7 = vmul.f32 %v6518_v15, %v5004_v52  ;;  %v5260_v4 = vmul.f32 %v6518_v15, %v5008_v17 }
 0x2d0   :  { %v5264_v31 = vmul.f32 %v6518_v15, %v5012_v40  ;;  %v5268_v45 = vmul.f32 %v6518_v15, %v5016_v14  ;;  %v5272_v28 = vmul.f32 %v6518_v15, %v5020_v0  ;;  %v5276_v52 = vmul.f32 %v6518_v15, %v5024_v53 }
 0x2d1   :  { %v5280_v17 = vmul.f32 %v6518_v15, %v5028_v36  ;;  %v5284_v40 = vmul.f32 %v6518_v15, %v5032_v43  ;;  %v5288_v14 = vmul.f32 %v6518_v15, %v5036_v24  ;;  %v5292_v0 = vmul.f32 %v6518_v15, %v5040_v5 }
 0x2d2   :  { %v5296_v53 = vmul.f32 %v6518_v15, %v5044_v30  ;;  %v5300_v36 = vmul.f32 %v6518_v15, %v5048_v13  ;;  %v5304_v43 = vmul.f32 %v6518_v15, %v5052_v55  ;;  %v5308_v24 = vmul.f32 %v6518_v15, %v5056_v3 }
 0x2d3   :  { %v5312_v5 = vmul.f32 %v6518_v15, %v5060_v12  ;;  %v5316_v30 = vmul.f32 %v6518_v15, %v5064_v56  ;;  %v5320_v13 = vmul.f32 %v6518_v15, %v5068_v35  ;;  %v5324_v55 = vmul.f32 %v6518_v15, %v5072_v44 }
 0x2d4   :  { %v5328_v3 = vmul.f32 %v6518_v15, %v5076_v11  ;;  %v5332_v12 = vmul.f32 %v6518_v15, %v5080_v26  ;;  %v5336_v56 = vmul.f32 %v6518_v15, %v5084_v61  ;;  %v5340_v35 = vmul.f32 %v6518_v15, %v6587_v34 }
 0x2d5   :  { %6582 = vst [vmem:[#allocation18_spill] sm:$0xff] %v5320_v13  ;;  %6583 = vst [vmem:[#allocation20_spill] sm:$0xff] %v5324_v55  ;;  %v6588_v13 = vld [vmem:[#allocation7_spill] sm:$0xff]  ;;  %v6589_v55 = vld [vmem:[#allocation10_spill] sm:$0xff] }
 0x2d6   :  { %6584 = vst [vmem:[#allocation28_spill] sm:$0xff] %v5328_v3  ;;  %6585 = vst [vmem:[#allocation22_spill] sm:$0xff] %v5332_v12  ;;  %v5344_v44 = vmul.f32 %v6518_v15, %v6588_v13  ;;  %v5348_v11 = vmul.f32 %v6518_v15, %v6589_v55  ;;  %v6590_v3 = vld [vmem:[#allocation12_spill] sm:$0xff]  ;;  %v6591_v12 = vld [vmem:[#allocation14_spill] sm:$0xff]  ;;  %v5364_v13 = vmul.f32 %v6518_v15, %v5112_v46 }
 0x2d7   :  { %6586 = vst [vmem:[#allocation24_spill] sm:$0xff] %v5336_v56  ;;  %v5352_v26 = vmul.f32 %v6518_v15, %v6590_v3  ;;  %v5356_v61 = vmul.f32 %v6518_v15, %v6591_v12  ;;  %v6592_v56 = vld [vmem:[#allocation16_spill] sm:$0xff]  ;;  %v5368_v55 = vmul.f32 %v6518_v15, %v5116_v49  ;;  %v5372_v3 = vmul.f32 %v6518_v15, %v5120_v27 }
 0x2d8   :  { %v5360_v34 = vmul.f32 %v6518_v15, %v6592_v56  ;;  %6593 = vst [vmem:[#allocation26_spill] sm:$0xff] %v5364_v13  ;;  %v5376_v12 = vmul.f32 %v6518_v15, %v5124_v20  ;;  %v5380_v56 = vmul.f32 %v6518_v15, %v5128_v57  ;;  %v5384_v46 = vmul.f32 %v6518_v15, %v5132_v42  ;;  %v6594_v13 = vld [vmem:[#allocation42_spill] sm:$0xff] }
 0x2d9   :  { %v5388_v49 = vadd.f32 %v6594_v13, %v5136_v51  ;;  %v5392_v27 = vadd.f32 %v6594_v13, %v5140_v2  ;;  %v5396_v20 = vadd.f32 %v6594_v13, %v5144_v33  ;;  %v5400_v57 = vadd.f32 %v6594_v13, %v5148_v16 }
 0x2da   :  { %v5404_v15 = vadd.f32 %v6594_v13, %v5152_v1  ;;  %v5408_v42 = vadd.f32 %v6594_v13, %v5156_v54  ;;  %v5412_v51 = vadd.f32 %v6594_v13, %v5160_v39  ;;  %v5416_v2 = vadd.f32 %v6594_v13, %v5164_v47 }
 0x2db   :  { %v5420_v33 = vadd.f32 %v6594_v13, %v5168_v25  ;;  %v5424_v16 = vadd.f32 %v6594_v13, %v5172_v29  ;;  %v5428_v1 = vadd.f32 %v6594_v13, %v5176_v59  ;;  %v5432_v54 = vadd.f32 %v6594_v13, %v5180_v18 }
 0x2dc   :  { %v5436_v39 = vadd.f32 %v6594_v13, %v5184_v32  ;;  %v5440_v47 = vadd.f32 %v6594_v13, %v5188_v50  ;;  %v5444_v25 = vadd.f32 %v6594_v13, %v5192_v58  ;;  %v5448_v29 = vadd.f32 %v6594_v13, %v5196_v22 }
 0x2dd   :  { %v5452_v59 = vadd.f32 %v6594_v13, %v5200_v23  ;;  %v5456_v18 = vadd.f32 %v6594_v13, %v5204_v63  ;;  %v5460_v32 = vadd.f32 %v6594_v13, %v5208_v38  ;;  %v5464_v50 = vadd.f32 %v6594_v13, %v5212_v21 }
 0x2de   :  { %v5468_v58 = vadd.f32 %v6594_v13, %v5216_v19  ;;  %v5472_v22 = vadd.f32 %v6594_v13, %v5220_v37  ;;  %v5476_v23 = vadd.f32 %v6594_v13, %v5224_v8  ;;  %v5480_v63 = vadd.f32 %v6594_v13, %v5228_v60 }
 0x2df   :  { %v5484_v38 = vadd.f32 %v6594_v13, %v5232_v62  ;;  %v5488_v21 = vadd.f32 %v6594_v13, %v5236_v48  ;;  %v5492_v19 = vadd.f32 %v6594_v13, %v5240_v6  ;;  %v5496_v37 = vadd.f32 %v6594_v13, %v5244_v10 }
 0x2e0   :  { %v5500_v8 = vadd.f32 %v6594_v13, %v5248_v9  ;;  %v5504_v60 = vadd.f32 %v6594_v13, %v5252_v41  ;;  %v5508_v62 = vadd.f32 %v6594_v13, %v5256_v7  ;;  %v5512_v48 = vadd.f32 %v6594_v13, %v5260_v4 }
 0x2e1   :  { %v5516_v6 = vadd.f32 %v6594_v13, %v5264_v31  ;;  %v5520_v10 = vadd.f32 %v6594_v13, %v5268_v45  ;;  %v5524_v9 = vadd.f32 %v6594_v13, %v5272_v28  ;;  %v5528_v41 = vadd.f32 %v6594_v13, %v5276_v52 }
 0x2e2   :  { %v5532_v7 = vadd.f32 %v6594_v13, %v5280_v17  ;;  %v5536_v4 = vadd.f32 %v6594_v13, %v5284_v40  ;;  %v5540_v31 = vadd.f32 %v6594_v13, %v5288_v14  ;;  %v5544_v45 = vadd.f32 %v6594_v13, %v5292_v0 }
 0x2e3   :  { %v5548_v28 = vadd.f32 %v6594_v13, %v5296_v53  ;;  %v5552_v52 = vadd.f32 %v6594_v13, %v5300_v36  ;;  %v5556_v17 = vadd.f32 %v6594_v13, %v5304_v43  ;;  %v5560_v40 = vadd.f32 %v6594_v13, %v5308_v24  ;;  %v6599_v53 = vld [vmem:[#allocation18_spill] sm:$0xff] }
 0x2e4   :  { %v5564_v14 = vadd.f32 %v6594_v13, %v5312_v5  ;;  %v5568_v0 = vadd.f32 %v6594_v13, %v5316_v30  ;;  %v5572_v36 = vadd.f32 %v6594_v13, %v6599_v53  ;;  %v5592_v53 = vadd.f32 %v6594_v13, %v5340_v35 }
 0x2e5   :  { %6595 = vst [vmem:[#allocation29_spill] sm:$0xff] %v5552_v52  ;;  %6596 = vst [vmem:[#allocation31_spill] sm:$0xff] %v5556_v17  ;;  %v6600_v52 = vld [vmem:[#allocation20_spill] sm:$0xff]  ;;  %v5612_v35 = vadd.f32 %v6594_v13, %v5360_v34 }
 0x2e6   :  { %6597 = vst [vmem:[#allocation35_spill] sm:$0xff] %v5560_v40  ;;  %6598 = vst [vmem:[#allocation37_spill] sm:$0xff] %v5564_v14  ;;  %v5576_v43 = vadd.f32 %v6594_v13, %v6600_v52  ;;  %v6601_v17 = vld [vmem:[#allocation28_spill] sm:$0xff]  ;;  %v6602_v40 = vld [vmem:[#allocation22_spill] sm:$0xff]  ;;  %v5596_v52 = vadd.f32 %v6594_v13, %v5344_v44 }
 0x2e7   :  { %v5580_v24 = vadd.f32 %v6594_v13, %v6601_v17  ;;  %v5584_v5 = vadd.f32 %v6594_v13, %v6602_v40  ;;  %v6603_v14 = vld [vmem:[#allocation24_spill] sm:$0xff]  ;;  %6604 = vst [vmem:[#allocation41_spill] sm:$0xff] %v5592_v53  ;;  %v5600_v17 = vadd.f32 %v6594_v13, %v5348_v11  ;;  %v5604_v40 = vadd.f32 %v6594_v13, %v5352_v26  ;;  %v6610_v53 = vld [vmem:[#allocation26_spill] sm:$0xff] }
 0x2e8   :  { %v5588_v30 = vadd.f32 %v6594_v13, %v6603_v14  ;;  %6605 = vst [vmem:[#allocation43_spill] sm:$0xff] %v5596_v52  ;;  %v5608_v14 = vadd.f32 %v6594_v13, %v5356_v61  ;;  %6609 = vst [vmem:[#allocation55_spill] sm:$0xff] %v5612_v35  ;;  %v5616_v44 = vadd.f32 %v6594_v13, %v6610_v53 }
 0x2e9   :  { %6606 = vst [vmem:[#allocation47_spill] sm:$0xff] %v5600_v17  ;;  %6607 = vst [vmem:[#allocation49_spill] sm:$0xff] %v5604_v40  ;;  %v5620_v11 = vadd.f32 %v6594_v13, %v5368_v55  ;;  %v5624_v26 = vadd.f32 %v6594_v13, %v5372_v3  ;;  %v5628_v61 = vadd.f32 %v6594_v13, %v5376_v12  ;;  %v6616_v40 = vld [vmem:[#allocation25_spill] sm:$0xff]  ;;  %v2314_v12 = vmax.f32 %v5388_v49, 0.0 }
 0x2ea   :  { %6608 = vst [vmem:[#allocation53_spill] sm:$0xff] %v5608_v14  ;;  %6611 = vst [vmem:[#allocation59_spill] sm:$0xff] %v5616_v44  ;;  %v6615_v14 = vld [vmem:[#allocation103_spill] sm:$0xff]  ;;  %v5636_v53 = vadd.f32 %v6594_v13, %v5380_v56  ;;  %v6619_v44 = vld [vmem:[#allocation104_spill] sm:$0xff]  ;;  %v5644_v3 = vadd.f32 %v6594_v13, %v5384_v46  ;;  %v2318_v56 = vmax.f32 %v5396_v20, 0.0  ;;  %v2322_v13 = vmax.f32 %v5404_v15, 0.0 }
 0x2eb   :  { %6612 = vst [vmem:[#allocation61_spill] sm:$0xff] %v5620_v11  ;;  %6613 = vst [vmem:[#allocation65_spill] sm:$0xff] %v5624_v26  ;;  %v5632_v34 = vadd.f32 %v6616_v40, %v6615_v14  ;;  %v5640_v55 = vadd.f32 %v6616_v40, %v6619_v44  ;;  %v6622_v26 = vld [vmem:[#allocation105_spill] sm:$0xff]  ;;  %v2316_v14 = vmax.f32 %v5392_v27, 0.0  ;;  %v2320_v40 = vmax.f32 %v5400_v57, 0.0  ;;  %v6626_v44 = vld [vmem:[#allocation83_spill] sm:$0xff] }
 0x2ec   :  { %6614 = vst [vmem:[#allocation67_spill] sm:$0xff] %v5628_v61  ;;  %6618 = vst [vmem:[#allocation73_spill] sm:$0xff] %v5636_v53  ;;  %v2313_v11 = vmax.f32 %v6622_v26, 0.0  ;;  %v6623_v61 = vld [vmem:[#allocation110_spill] sm:$0xff]  ;;  %v6625_v53 = vld [vmem:[#allocation80_spill] sm:$0xff]  ;;  %v2324_v49 = vmax.f32 %v5408_v42, 0.0 }
 0x2ed   :  { %6617 = vst [vmem:[#allocation71_spill] sm:$0xff] %v5632_v34  ;;  %6620 = vst [vmem:[#allocation78_spill] sm:$0xff] %v5640_v55  ;;  %v2315_v35 = vmax.f32 %v6623_v61, 0.0  ;;  %v6624_v34 = vld [vmem:[#allocation75_spill] sm:$0xff]  ;;  %v2319_v52 = vmax.f32 %v6625_v53, 0.0  ;;  %v2321_v55 = vmax.f32 %v6626_v44, 0.0 }
 0x2ee   :  { %6621 = vst [vmem:[#allocation81_spill] sm:$0xff] %v5644_v3  ;;  %v2317_v17 = vmax.f32 %v6624_v34, 0.0  ;;  %2441 = vst [vmem:[#allocation3] sm:$0xff] %v2313_v11  ;;  %v6627_v46 = vld [vmem:[#allocation88_spill] sm:$0xff]  ;;  %v6628_v61 = vld [vmem:[#allocation95_spill] sm:$0xff]  ;;  %v2326_v27 = vmax.f32 %v5412_v51, 0.0 }
 0x2ef   :  { %v2323_v26 = vmax.f32 %v6627_v46, 0.0  ;;  %v2325_v3 = vmax.f32 %v6628_v61, 0.0  ;;  %2442 = vst [vmem:[#allocation3 + $0x8] sm:$0xff] %v2314_v12  ;;  %2443 = vst [vmem:[#allocation3 + $0x10] sm:$0xff] %v2315_v35  ;;  %v6629_v20 = vld [vmem:[#allocation6_spill] sm:$0xff]  ;;  %v2328_v57 = vmax.f32 %v5416_v2, 0.0 }
 0x2f0   :  { %2444 = vst [vmem:[#allocation3 + $0x18] sm:$0xff] %v2316_v14  ;;  %2445 = vst [vmem:[#allocation3 + $0x20] sm:$0xff] %v2317_v17  ;;  %v2327_v34 = vmax.f32 %v6629_v20, 0.0  ;;  %v6630_v53 = vld [vmem:[#allocation8_spill] sm:$0xff]  ;;  %v2330_v15 = vmax.f32 %v5420_v33, 0.0  ;;  %v6631_v42 = vld [vmem:[#allocation11_spill] sm:$0xff] }
 0x2f1   :  { %v2329_v11 = vmax.f32 %v6630_v53, 0.0  ;;  %2446 = vst [vmem:[#allocation3 + $0x28] sm:$0xff] %v2318_v56  ;;  %2447 = vst [vmem:[#allocation3 + $0x30] sm:$0xff] %v2319_v52  ;;  %v2331_v44 = vmax.f32 %v6631_v42, 0.0  ;;  %v2332_v35 = vmax.f32 %v5424_v16, 0.0  ;;  %v6632_v12 = vld [vmem:[#allocation13_spill] sm:$0xff] }
 0x2f2   :  { %2448 = vst [vmem:[#allocation3 + $0x38] sm:$0xff] %v2320_v40  ;;  %2449 = vst [vmem:[#allocation3 + $0x40] sm:$0xff] %v2321_v55  ;;  %v2333_v17 = vmax.f32 %v6632_v12, 0.0  ;;  %v2334_v51 = vmax.f32 %v5428_v1, 0.0  ;;  %v6633_v2 = vld [vmem:[#allocation15_spill] sm:$0xff]  ;;  %v2336_v52 = vmax.f32 %v5432_v54, 0.0 }
 0x2f3   :  { %2450 = vst [vmem:[#allocation3 + $0x48] sm:$0xff] %v2322_v13  ;;  %2451 = vst [vmem:[#allocation3 + $0x50] sm:$0xff] %v2323_v26  ;;  %v2335_v14 = vmax.f32 %v6633_v2, 0.0  ;;  %v6634_v56 = vld [vmem:[#allocation17_spill] sm:$0xff]  ;;  %v2338_v33 = vmax.f32 %v5436_v39, 0.0  ;;  %v6635_v16 = vld [vmem:[#allocation19_spill] sm:$0xff] }
 0x2f4   :  { %2452 = vst [vmem:[#allocation3 + $0x58] sm:$0xff] %v2324_v49  ;;  %2453 = vst [vmem:[#allocation3 + $0x60] sm:$0xff] %v2325_v3  ;;  %v2337_v55 = vmax.f32 %v6634_v56, 0.0  ;;  %v2339_v40 = vmax.f32 %v6635_v16, 0.0  ;;  %v2340_v13 = vmax.f32 %v5440_v47, 0.0  ;;  %v6636_v46 = vld [vmem:[#allocation21_spill] sm:$0xff] }
 0x2f5   :  { %2454 = vst [vmem:[#allocation3 + $0x68] sm:$0xff] %v2326_v27  ;;  %2455 = vst [vmem:[#allocation3 + $0x70] sm:$0xff] %v2327_v34  ;;  %v2341_v3 = vmax.f32 %v6636_v46, 0.0  ;;  %v2342_v1 = vmax.f32 %v5444_v25, 0.0  ;;  %v6637_v54 = vld [vmem:[#allocation23_spill] sm:$0xff]  ;;  %v2344_v49 = vmax.f32 %v5448_v29, 0.0 }
 0x2f6   :  { %2456 = vst [vmem:[#allocation3 + $0x78] sm:$0xff] %v2328_v57  ;;  %2457 = vst [vmem:[#allocation3 + $0x80] sm:$0xff] %v2329_v11  ;;  %v2343_v26 = vmax.f32 %v6637_v54, 0.0  ;;  %v6638_v61 = vld [vmem:[#allocation30_spill] sm:$0xff]  ;;  %v2346_v39 = vmax.f32 %v5452_v59, 0.0  ;;  %v2348_v34 = vmax.f32 %v5456_v18, 0.0 }
 0x2f7   :  { %2458 = vst [vmem:[#allocation3 + $0x88] sm:$0xff] %v2330_v15  ;;  %2459 = vst [vmem:[#allocation3 + $0x90] sm:$0xff] %v2331_v44  ;;  %v2345_v27 = vmax.f32 %v6638_v61, 0.0  ;;  %v6639_v47 = vld [vmem:[#allocation34_spill] sm:$0xff]  ;;  %v6640_v57 = vld [vmem:[#allocation36_spill] sm:$0xff]  ;;  %v2350_v25 = vmax.f32 %v5460_v32, 0.0 }
 0x2f8   :  { %2460 = vst [vmem:[#allocation3 + $0x98] sm:$0xff] %v2332_v35  ;;  %2461 = vst [vmem:[#allocation3 + $0xa0] sm:$0xff] %v2333_v17  ;;  %v2347_v20 = vmax.f32 %v6639_v47, 0.0  ;;  %v2349_v53 = vmax.f32 %v6640_v57, 0.0  ;;  %v6641_v29 = vld [vmem:[#allocation40_spill] sm:$0xff]  ;;  %v2352_v15 = vmax.f32 %v5464_v50, 0.0 }
 0x2f9   :  { %2462 = vst [vmem:[#allocation3 + $0xa8] sm:$0xff] %v2334_v51  ;;  %2463 = vst [vmem:[#allocation3 + $0xb0] sm:$0xff] %v2335_v14  ;;  %v2351_v11 = vmax.f32 %v6641_v29, 0.0  ;;  %v6642_v42 = vld [vmem:[#allocation106_spill] sm:$0xff]  ;;  %v2354_v59 = vmax.f32 %v5468_v58, 0.0  ;;  %v6643_v18 = vld [vmem:[#allocation107_spill] sm:$0xff] }
 0x2fa   :  { %2464 = vst [vmem:[#allocation3 + $0xb8] sm:$0xff] %v2336_v52  ;;  %2465 = vst [vmem:[#allocation3 + $0xc0] sm:$0xff] %v2337_v55  ;;  %v2353_v44 = vmax.f32 %v6642_v42, 0.0  ;;  %v2355_v35 = vmax.f32 %v6643_v18, 0.0  ;;  %v2356_v12 = vmax.f32 %v5472_v22, 0.0  ;;  %v6644_v17 = vld [vmem:[#allocation108_spill] sm:$0xff] }
 0x2fb   :  { %2466 = vst [vmem:[#allocation3 + $0xc8] sm:$0xff] %v2338_v33  ;;  %2467 = vst [vmem:[#allocation3 + $0xd0] sm:$0xff] %v2339_v40  ;;  %v2357_v51 = vmax.f32 %v6644_v17, 0.0  ;;  %v2358_v32 = vmax.f32 %v5476_v23, 0.0  ;;  %v6645_v50 = vld [vmem:[#allocation109_spill] sm:$0xff]  ;;  %v2360_v14 = vmax.f32 %v5480_v63, 0.0 }
 0x2fc   :  { %2468 = vst [vmem:[#allocation3 + $0xd8] sm:$0xff] %v2340_v13  ;;  %2469 = vst [vmem:[#allocation3 + $0xe0] sm:$0xff] %v2341_v3  ;;  %v2359_v2 = vmax.f32 %v6645_v50, 0.0  ;;  %v6646_v52 = vld [vmem:[#allocation52_spill] sm:$0xff]  ;;  %v2362_v58 = vmax.f32 %v5484_v38, 0.0  ;;  %v6647_v22 = vld [vmem:[#allocation54_spill] sm:$0xff] }
 0x2fd   :  { %2470 = vst [vmem:[#allocation3 + $0xe8] sm:$0xff] %v2342_v1  ;;  %2471 = vst [vmem:[#allocation3 + $0xf0] sm:$0xff] %v2343_v26  ;;  %v2361_v56 = vmax.f32 %v6646_v52, 0.0  ;;  %v2363_v55 = vmax.f32 %v6647_v22, 0.0  ;;  %v2364_v33 = vmax.f32 %v5488_v21, 0.0  ;;  %v6648_v16 = vld [vmem:[#allocation58_spill] sm:$0xff] }
 0x2fe   :  { %2472 = vst [vmem:[#allocation3 + $0xf8] sm:$0xff] %v2344_v49  ;;  %2473 = vst [vmem:[#allocation3 + $0x100] sm:$0xff] %v2345_v27  ;;  %v2365_v40 = vmax.f32 %v6648_v16, 0.0  ;;  %v2366_v23 = vmax.f32 %v5492_v19, 0.0  ;;  %v6649_v63 = vld [vmem:[#allocation60_spill] sm:$0xff]  ;;  %v2368_v46 = vmax.f32 %v5496_v37, 0.0 }
 0x2ff   :  { %2474 = vst [vmem:[#allocation3 + $0x108] sm:$0xff] %v2346_v39  ;;  %2475 = vst [vmem:[#allocation3 + $0x110] sm:$0xff] %v2347_v20  ;;  %v2367_v13 = vmax.f32 %v6649_v63, 0.0  ;;  %v6650_v3 = vld [vmem:[#allocation46_spill] sm:$0xff]  ;;  %v2370_v38 = vmax.f32 %v5500_v8, 0.0  ;;  %v6651_v21 = vld [vmem:[#allocation64_spill] sm:$0xff] }
 0x300   :  { %2476 = vst [vmem:[#allocation3 + $0x118] sm:$0xff] %v2348_v34  ;;  %2477 = vst [vmem:[#allocation3 + $0x120] sm:$0xff] %v2349_v53  ;;  %v2369_v1 = vmax.f32 %v6650_v3, 0.0  ;;  %v2371_v54 = vmax.f32 %v6651_v21, 0.0  ;;  %v2372_v26 = vmax.f32 %v5504_v60, 0.0  ;;  %v6652_v49 = vld [vmem:[#allocation66_spill] sm:$0xff] }
 0x301   :  { %2478 = vst [vmem:[#allocation3 + $0x128] sm:$0xff] %v2350_v25  ;;  %2479 = vst [vmem:[#allocation3 + $0x130] sm:$0xff] %v2351_v11  ;;  %v2373_v61 = vmax.f32 %v6652_v49, 0.0  ;;  %v2374_v19 = vmax.f32 %v5508_v62, 0.0  ;;  %v6653_v37 = vld [vmem:[#allocation70_spill] sm:$0xff]  ;;  %v2376_v39 = vmax.f32 %v5512_v48, 0.0 }
 0x302   :  { %2480 = vst [vmem:[#allocation3 + $0x138] sm:$0xff] %v2352_v15  ;;  %2481 = vst [vmem:[#allocation3 + $0x140] sm:$0xff] %v2353_v44  ;;  %v2375_v27 = vmax.f32 %v6653_v37, 0.0  ;;  %v6654_v47 = vld [vmem:[#allocation48_spill] sm:$0xff]  ;;  %v2378_v8 = vmax.f32 %v5516_v6, 0.0  ;;  %v2380_v57 = vmax.f32 %v5520_v10, 0.0 }
 0x303   :  { %2482 = vst [vmem:[#allocation3 + $0x148] sm:$0xff] %v2354_v59  ;;  %2483 = vst [vmem:[#allocation3 + $0x150] sm:$0xff] %v2355_v35  ;;  %v2377_v20 = vmax.f32 %v6654_v47, 0.0  ;;  %v6655_v60 = vld [vmem:[#allocation72_spill] sm:$0xff]  ;;  %v6656_v53 = vld [vmem:[#allocation77_spill] sm:$0xff]  ;;  %v2382_v62 = vmax.f32 %v5524_v9, 0.0 }
 0x304   :  { %2484 = vst [vmem:[#allocation3 + $0x158] sm:$0xff] %v2356_v12  ;;  %2485 = vst [vmem:[#allocation3 + $0x160] sm:$0xff] %v2357_v51  ;;  %v2379_v34 = vmax.f32 %v6655_v60, 0.0  ;;  %v2381_v25 = vmax.f32 %v6656_v53, 0.0  ;;  %v6657_v48 = vld [vmem:[#allocation79_spill] sm:$0xff]  ;;  %v2384_v11 = vmax.f32 %v5528_v41, 0.0 }
 0x305   :  { %2486 = vst [vmem:[#allocation3 + $0x168] sm:$0xff] %v2358_v32  ;;  %2487 = vst [vmem:[#allocation3 + $0x170] sm:$0xff] %v2359_v2  ;;  %v2383_v29 = vmax.f32 %v6657_v48, 0.0  ;;  %v6658_v15 = vld [vmem:[#allocation85_spill] sm:$0xff]  ;;  %v2386_v6 = vmax.f32 %v5532_v7, 0.0  ;;  %v6659_v10 = vld [vmem:[#allocation87_spill] sm:$0xff] }
 0x306   :  { %2488 = vst [vmem:[#allocation3 + $0x178] sm:$0xff] %v2360_v14  ;;  %2489 = vst [vmem:[#allocation3 + $0x180] sm:$0xff] %v2361_v56  ;;  %v2385_v42 = vmax.f32 %v6658_v15, 0.0  ;;  %v2387_v44 = vmax.f32 %v6659_v10, 0.0  ;;  %v2388_v59 = vmax.f32 %v5536_v4, 0.0  ;;  %v6660_v18 = vld [vmem:[#allocation92_spill] sm:$0xff] }
 0x307   :  { %2490 = vst [vmem:[#allocation3 + $0x188] sm:$0xff] %v2362_v58  ;;  %2491 = vst [vmem:[#allocation3 + $0x190] sm:$0xff] %v2363_v55  ;;  %v2389_v35 = vmax.f32 %v6660_v18, 0.0  ;;  %v2390_v9 = vmax.f32 %v5540_v31, 0.0  ;;  %v6661_v41 = vld [vmem:[#allocation94_spill] sm:$0xff]  ;;  %v2392_v17 = vmax.f32 %v5544_v45, 0.0 }
 0x308   :  { %2492 = vst [vmem:[#allocation3 + $0x198] sm:$0xff] %v2364_v33  ;;  %2493 = vst [vmem:[#allocation3 + $0x1a0] sm:$0xff] %v2365_v40  ;;  %v2391_v12 = vmax.f32 %v6661_v41, 0.0  ;;  %v6662_v51 = vld [vmem:[#allocation9_spill] sm:$0xff]  ;;  %v2394_v7 = vmax.f32 %v5548_v28, 0.0  ;;  %v6663_v4 = vld [vmem:[#allocation120_spill] sm:$0xff] }
 0x309   :  { %2494 = vst [vmem:[#allocation3 + $0x1a8] sm:$0xff] %v2366_v23  ;;  %2495 = vst [vmem:[#allocation3 + $0x1b0] sm:$0xff] %v2367_v13  ;;  %v2393_v32 = vmax.f32 %v6662_v51, 0.0  ;;  %v2395_v50 = vmax.f32 %v6663_v4, 0.0  ;;  %v6664_v2 = vld [vmem:[#allocation29_spill] sm:$0xff]  ;;  %v6666_v31 = vld [vmem:[#allocation31_spill] sm:$0xff] }
 0x30a   :  { %2496 = vst [vmem:[#allocation3 + $0x1b8] sm:$0xff] %v2368_v46  ;;  %2497 = vst [vmem:[#allocation3 + $0x1c0] sm:$0xff] %v2369_v1  ;;  %v2396_v14 = vmax.f32 %v6664_v2, 0.0  ;;  %v6665_v52 = vld [vmem:[#allocation121_spill] sm:$0xff]  ;;  %v2398_v45 = vmax.f32 %v6666_v31, 0.0  ;;  %v6667_v58 = vld [vmem:[#allocation122_spill] sm:$0xff] }
 0x30b   :  { %2498 = vst [vmem:[#allocation3 + $0x1c8] sm:$0xff] %v2370_v38  ;;  %2499 = vst [vmem:[#allocation3 + $0x1d0] sm:$0xff] %v2371_v54  ;;  %v2397_v56 = vmax.f32 %v6665_v52, 0.0  ;;  %v2399_v22 = vmax.f32 %v6667_v58, 0.0  ;;  %v6668_v55 = vld [vmem:[#allocation35_spill] sm:$0xff]  ;;  %v6670_v28 = vld [vmem:[#allocation37_spill] sm:$0xff] }
 0x30c   :  { %2500 = vst [vmem:[#allocation3 + $0x1d8] sm:$0xff] %v2372_v26  ;;  %2501 = vst [vmem:[#allocation3 + $0x1e0] sm:$0xff] %v2373_v61  ;;  %v2400_v33 = vmax.f32 %v6668_v55, 0.0  ;;  %v6669_v16 = vld [vmem:[#allocation123_spill] sm:$0xff]  ;;  %v2402_v23 = vmax.f32 %v6670_v28, 0.0  ;;  %v6671_v63 = vld [vmem:[#allocation124_spill] sm:$0xff] }
 0x30d   :  { %2502 = vst [vmem:[#allocation3 + $0x1e8] sm:$0xff] %v2374_v19  ;;  %2503 = vst [vmem:[#allocation3 + $0x1f0] sm:$0xff] %v2375_v27  ;;  %v2401_v40 = vmax.f32 %v6669_v16, 0.0  ;;  %v2403_v13 = vmax.f32 %v6671_v63, 0.0  ;;  %v2404_v46 = vmax.f32 %v5568_v0, 0.0  ;;  %v6672_v3 = vld [vmem:[#allocation125_spill] sm:$0xff] }
 0x30e   :  { %2504 = vst [vmem:[#allocation3 + $0x1f8] sm:$0xff] %v2376_v39  ;;  %2505 = vst [vmem:[#allocation3 + $0x200] sm:$0xff] %v2377_v20  ;;  %v2405_v1 = vmax.f32 %v6672_v3, 0.0  ;;  %v2406_v38 = vmax.f32 %v5572_v36, 0.0  ;;  %v6673_v21 = vld [vmem:[#allocation126_spill] sm:$0xff]  ;;  %v2408_v26 = vmax.f32 %v5576_v43, 0.0 }
 0x30f   :  { %2506 = vst [vmem:[#allocation3 + $0x208] sm:$0xff] %v2378_v8  ;;  %2507 = vst [vmem:[#allocation3 + $0x210] sm:$0xff] %v2379_v34  ;;  %v2407_v54 = vmax.f32 %v6673_v21, 0.0  ;;  %v6674_v49 = vld [vmem:[#allocation127_spill] sm:$0xff]  ;;  %v2410_v0 = vmax.f32 %v5580_v24, 0.0  ;;  %v6675_v19 = vld [vmem:[#allocation128_spill] sm:$0xff] }
 0x310   :  { %2508 = vst [vmem:[#allocation3 + $0x218] sm:$0xff] %v2380_v57  ;;  %2509 = vst [vmem:[#allocation3 + $0x220] sm:$0xff] %v2381_v25  ;;  %v2409_v61 = vmax.f32 %v6674_v49, 0.0  ;;  %v2411_v37 = vmax.f32 %v6675_v19, 0.0  ;;  %v2412_v27 = vmax.f32 %v5584_v5, 0.0  ;;  %v6676_v39 = vld [vmem:[#allocation99_spill] sm:$0xff] }
 0x311   :  { %2510 = vst [vmem:[#allocation3 + $0x228] sm:$0xff] %v2382_v62  ;;  %2511 = vst [vmem:[#allocation3 + $0x230] sm:$0xff] %v2383_v29  ;;  %v2413_v47 = vmax.f32 %v6676_v39, 0.0  ;;  %v2414_v36 = vmax.f32 %v5588_v30, 0.0  ;;  %v6677_v43 = vld [vmem:[#allocation129_spill] sm:$0xff]  ;;  %v6679_v34 = vld [vmem:[#allocation100_spill] sm:$0xff] }
 0x312   :  { %2512 = vst [vmem:[#allocation3 + $0x238] sm:$0xff] %v2384_v11  ;;  %2513 = vst [vmem:[#allocation3 + $0x240] sm:$0xff] %v2385_v42  ;;  %v2415_v20 = vmax.f32 %v6677_v43, 0.0  ;;  %v6678_v8 = vld [vmem:[#allocation41_spill] sm:$0xff]  ;;  %v2417_v57 = vmax.f32 %v6679_v34, 0.0  ;;  %v6680_v24 = vld [vmem:[#allocation43_spill] sm:$0xff] }
 0x313   :  { %2514 = vst [vmem:[#allocation3 + $0x248] sm:$0xff] %v2386_v6  ;;  %2515 = vst [vmem:[#allocation3 + $0x250] sm:$0xff] %v2387_v44  ;;  %v2416_v60 = vmax.f32 %v6678_v8, 0.0  ;;  %v2418_v5 = vmax.f32 %v6680_v24, 0.0  ;;  %v6681_v53 = vld [vmem:[#allocation130_spill] sm:$0xff]  ;;  %v6682_v62 = vld [vmem:[#allocation47_spill] sm:$0xff] }
 0x314   :  { %2516 = vst [vmem:[#allocation3 + $0x258] sm:$0xff] %v2388_v59  ;;  %2517 = vst [vmem:[#allocation3 + $0x260] sm:$0xff] %v2389_v35  ;;  %v2419_v25 = vmax.f32 %v6681_v53, 0.0  ;;  %v2420_v48 = vmax.f32 %v6682_v62, 0.0  ;;  %v6683_v29 = vld [vmem:[#allocation101_spill] sm:$0xff]  ;;  %v6685_v42 = vld [vmem:[#allocation131_spill] sm:$0xff] }
 0x315   :  { %2518 = vst [vmem:[#allocation3 + $0x268] sm:$0xff] %v2390_v9  ;;  %2519 = vst [vmem:[#allocation3 + $0x270] sm:$0xff] %v2391_v12  ;;  %v2421_v11 = vmax.f32 %v6683_v29, 0.0  ;;  %v6684_v30 = vld [vmem:[#allocation49_spill] sm:$0xff]  ;;  %v2423_v6 = vmax.f32 %v6685_v42, 0.0  ;;  %v6687_v59 = vld [vmem:[#allocation132_spill] sm:$0xff] }
 0x316   :  { %2520 = vst [vmem:[#allocation3 + $0x278] sm:$0xff] %v2392_v17  ;;  %2521 = vst [vmem:[#allocation3 + $0x280] sm:$0xff] %v2393_v32  ;;  %v2422_v15 = vmax.f32 %v6684_v30, 0.0  ;;  %v6686_v10 = vld [vmem:[#allocation53_spill] sm:$0xff]  ;;  %v2425_v18 = vmax.f32 %v6687_v59, 0.0  ;;  %v6688_v35 = vld [vmem:[#allocation55_spill] sm:$0xff] }
 0x317   :  { %2522 = vst [vmem:[#allocation3 + $0x288] sm:$0xff] %v2394_v7  ;;  %2523 = vst [vmem:[#allocation3 + $0x290] sm:$0xff] %v2395_v50  ;;  %v2424_v44 = vmax.f32 %v6686_v10, 0.0  ;;  %v2426_v9 = vmax.f32 %v6688_v35, 0.0  ;;  %v6689_v41 = vld [vmem:[#allocation133_spill] sm:$0xff]  ;;  %v6690_v17 = vld [vmem:[#allocation59_spill] sm:$0xff] }
 0x318   :  { %2524 = vst [vmem:[#allocation3 + $0x298] sm:$0xff] %v2396_v14  ;;  %2525 = vst [vmem:[#allocation3 + $0x2a0] sm:$0xff] %v2397_v56  ;;  %v2427_v12 = vmax.f32 %v6689_v41, 0.0  ;;  %v2428_v51 = vmax.f32 %v6690_v17, 0.0  ;;  %v6691_v32 = vld [vmem:[#allocation102_spill] sm:$0xff]  ;;  %v6692_v4 = vld [vmem:[#allocation61_spill] sm:$0xff] }
 0x319   :  { %2526 = vst [vmem:[#allocation3 + $0x2a8] sm:$0xff] %v2398_v45  ;;  %2527 = vst [vmem:[#allocation3 + $0x2b0] sm:$0xff] %v2399_v22  ;;  %v2429_v7 = vmax.f32 %v6691_v32, 0.0  ;;  %v2430_v50 = vmax.f32 %v6692_v4, 0.0  ;;  %v6693_v2 = vld [vmem:[#allocation134_spill] sm:$0xff]  ;;  %v6694_v52 = vld [vmem:[#allocation65_spill] sm:$0xff] }
 0x31a   :  { %2528 = vst [vmem:[#allocation3 + $0x2b8] sm:$0xff] %v2400_v33  ;;  %2529 = vst [vmem:[#allocation3 + $0x2c0] sm:$0xff] %v2401_v40  ;;  %v2431_v14 = vmax.f32 %v6693_v2, 0.0  ;;  %v2432_v56 = vmax.f32 %v6694_v52, 0.0  ;;  %v6695_v31 = vld [vmem:[#allocation135_spill] sm:$0xff]  ;;  %v6698_v16 = vld [vmem:[#allocation73_spill] sm:$0xff] }
 0x31b   :  { %2530 = vst [vmem:[#allocation3 + $0x2c8] sm:$0xff] %v2402_v23  ;;  %2531 = vst [vmem:[#allocation3 + $0x2d0] sm:$0xff] %v2403_v13  ;;  %v2433_v45 = vmax.f32 %v6695_v31, 0.0  ;;  %v6696_v58 = vld [vmem:[#allocation67_spill] sm:$0xff]  ;;  %v2436_v40 = vmax.f32 %v6698_v16, 0.0  ;;  %v6699_v28 = vld [vmem:[#allocation78_spill] sm:$0xff] }
 0x31c   :  { %2532 = vst [vmem:[#allocation3 + $0x2d8] sm:$0xff] %v2404_v46  ;;  %2533 = vst [vmem:[#allocation3 + $0x2e0] sm:$0xff] %v2405_v1  ;;  %v2434_v22 = vmax.f32 %v6696_v58, 0.0  ;;  %v6697_v55 = vld [vmem:[#allocation71_spill] sm:$0xff]  ;;  %v2437_v23 = vmax.f32 %v6699_v28, 0.0  ;;  %v6700_v63 = vld [vmem:[#allocation81_spill] sm:$0xff] }
 0x31d   :  { %2534 = vst [vmem:[#allocation3 + $0x2e8] sm:$0xff] %v2406_v38  ;;  %2535 = vst [vmem:[#allocation3 + $0x2f0] sm:$0xff] %v2407_v54  ;;  %v2435_v33 = vmax.f32 %v6697_v55, 0.0  ;;  %v2438_v13 = vmax.f32 %v6700_v63, 0.0 }
 0x31e   :  { %2536 = vst [vmem:[#allocation3 + $0x2f8] sm:$0xff] %v2408_v26  ;;  %2537 = vst [vmem:[#allocation3 + $0x300] sm:$0xff] %v2409_v61 }
 0x31f   :  { %2538 = vst [vmem:[#allocation3 + $0x308] sm:$0xff] %v2410_v0  ;;  %2539 = vst [vmem:[#allocation3 + $0x310] sm:$0xff] %v2411_v37 }
 0x320   :  { %2540 = vst [vmem:[#allocation3 + $0x318] sm:$0xff] %v2412_v27  ;;  %2541 = vst [vmem:[#allocation3 + $0x320] sm:$0xff] %v2413_v47 }
 0x321   :  { %2542 = vst [vmem:[#allocation3 + $0x328] sm:$0xff] %v2414_v36  ;;  %2543 = vst [vmem:[#allocation3 + $0x330] sm:$0xff] %v2415_v20 }
 0x322   :  { %2544 = vst [vmem:[#allocation3 + $0x338] sm:$0xff] %v2416_v60  ;;  %2545 = vst [vmem:[#allocation3 + $0x340] sm:$0xff] %v2417_v57 }
 0x323   :  { %2546 = vst [vmem:[#allocation3 + $0x348] sm:$0xff] %v2418_v5  ;;  %2547 = vst [vmem:[#allocation3 + $0x350] sm:$0xff] %v2419_v25 }
 0x324   :  { %2548 = vst [vmem:[#allocation3 + $0x358] sm:$0xff] %v2420_v48  ;;  %2549 = vst [vmem:[#allocation3 + $0x360] sm:$0xff] %v2421_v11 }
 0x325   :  { %2550 = vst [vmem:[#allocation3 + $0x368] sm:$0xff] %v2422_v15  ;;  %2551 = vst [vmem:[#allocation3 + $0x370] sm:$0xff] %v2423_v6 }
 0x326   :  { %2552 = vst [vmem:[#allocation3 + $0x378] sm:$0xff] %v2424_v44  ;;  %2553 = vst [vmem:[#allocation3 + $0x380] sm:$0xff] %v2425_v18 }
 0x327   :  { %2554 = vst [vmem:[#allocation3 + $0x388] sm:$0xff] %v2426_v9  ;;  %2555 = vst [vmem:[#allocation3 + $0x390] sm:$0xff] %v2427_v12 }
 0x328   :  { %2556 = vst [vmem:[#allocation3 + $0x398] sm:$0xff] %v2428_v51  ;;  %2557 = vst [vmem:[#allocation3 + $0x3a0] sm:$0xff] %v2429_v7 }
 0x329   :  { %2558 = vst [vmem:[#allocation3 + $0x3a8] sm:$0xff] %v2430_v50  ;;  %2559 = vst [vmem:[#allocation3 + $0x3b0] sm:$0xff] %v2431_v14 }
 0x32a   :  { %2560 = vst [vmem:[#allocation3 + $0x3b8] sm:$0xff] %v2432_v56  ;;  %2561 = vst [vmem:[#allocation3 + $0x3c0] sm:$0xff] %v2433_v45 }
 0x32b   :  { %2562 = vst [vmem:[#allocation3 + $0x3c8] sm:$0xff] %v2434_v22  ;;  %2563 = vst [vmem:[#allocation3 + $0x3d0] sm:$0xff] %v2435_v33 }
 0x32c   :  { %2564 = vst [vmem:[#allocation3 + $0x3d8] sm:$0xff] %v2436_v40  ;;  %2565 = vst [vmem:[#allocation3 + $0x3e0] sm:$0xff] %v2437_v23 }
 0x32d   :  { %2566 = vst [vmem:[#allocation3 + $0x3e8] sm:$0xff] %v2438_v13 }
 0x32e   :  { %2714 = shalt.err (!%p2711_p4)
}
 0x32f   :  { %s2715_s10 = scalar_lea.hbm %s5788_s4, 16384 }
 0x330   :  { %p2716_p5 = scmp.ne.s32.totalorder %s5788_s4, %s2715_s10  ;;  %p2719_p6 = scmp.lt.u32.totalorder %s2715_s10, %s5788_s4 }
 0x332   :  { %p2721_p7 = pnand %p2719_p6, %p2716_p5 }
 0x334   :  { %2724 = shalt.err (!%p2721_p7)
}
 0x335   :  { %s2729_s15 = smov 256   ;;  %s2730_s16 = smov 16  }
 0x336   :  { %2580 = dma.vmem_to_hbm [thread:$0]  %s2575_s3, 16384, %s5788_s4, [#allocation4], %s2729_s15, %s2729_s15, %s2730_s16  }
 0x337   :  { %2725 = dma.done.wait [#allocation4], 16384  }
 0x338   :  { %2726 = vsyncadd [#allocation4], 4294950912 }
 0x339   :  { %2584 = vsyncpa [#allocation4], 1 }

</bundles_post_ra>
